<compile_context>
chip_gen: v5e
topology: v5e:2x2
jax: 0.10.0
libtpu: 0.0.40
codegen_flags: <defaults>
</compile_context>

<pallas_src>
import math
from functools import partial

import jax
import jax.numpy as jnp
from jax import lax
from jax.experimental import pallas as pl
from jax.experimental.pallas import tpu as pltpu


# ----------------------------------------------------------------------------
# Generation-aware defaults
# ----------------------------------------------------------------------------

def _tpu_vmem_limit():
    try:
        cap = int(pltpu.get_tpu_info().vmem_capacity_bytes)
    except Exception:
        return 32 << 20                    # conservative fallback, safe on v7x
    # leave headroom below physical capacity; 48 MiB on v7x, 100 MiB on v5e/v6e
    return min(max(cap - (16 << 20), 32 << 20), 100 << 20)


_VMEM_LIMIT = _tpu_vmem_limit()
_TM_DEFAULT = 512 if _VMEM_LIMIT >= (96 << 20) else 256


def _round_up(x, m):
    return ((x + m - 1) // m) * m


def _pad_rows(a, mp):
    m = a.shape[0]
    if m == mp:
        return a
    return jnp.pad(a, ((0, mp - m),) + ((0, 0),) * (a.ndim - 1))


def _channel_block(d):
    """Channel split so (batch, channel) grids feed both v7x TensorCores."""
    if d > 256 and d % 256 == 0:
        return 256
    if d > 128 and d % 128 == 0:
        return 128
    return d


# In-kernel math helpers (only exp/log/tanh/rsqrt -> safe Mosaic lowerings).
def _sigmoid(x):
    return 1.0 / (1.0 + jnp.exp(-x))


def _softplus(x):
    return jnp.maximum(x, 0.0) + jnp.log(1.0 + jnp.exp(-jnp.abs(x)))


def _gelu_tanh(x):
    # TODO(synk): reference PredictorLG uses exact erf GELU; tanh approx here.
    c = 0.7978845608028654  # sqrt(2/pi)
    return 0.5 * x * (1.0 + jnp.tanh(c * (x + 0.044715 * x * x * x)))


def _apply_act(y, activation):
    if activation == "gelu":
        return _gelu_tanh(y)
    if activation == "silu":
        return y * _sigmoid(y)
    return y


# ----------------------------------------------------------------------------
# Matmul (+bias, +activation) with fully resident weights; optional fused LN
# ----------------------------------------------------------------------------

def _matmul_kernel(x_ref, w_ref, b_ref, o_ref, *, activation):
    y = jnp.dot(x_ref[...], w_ref[...], preferred_element_type=jnp.float32)
    y = y + b_ref[...]
    o_ref[...] = _apply_act(y, activation).astype(o_ref.dtype)


def _matmul_ln_kernel(x_ref, g_ref, be_ref, w_ref, b_ref, o_ref, *, activation, eps):
    xf = x_ref[...].astype(jnp.float32)
    mu = jnp.mean(xf, axis=-1, keepdims=True)
    xc = xf - mu
    var = jnp.mean(xc * xc, axis=-1, keepdims=True)
    xn = (xc * lax.rsqrt(var + eps) * g_ref[...] + be_ref[...]).astype(w_ref.dtype)
    y = jnp.dot(xn, w_ref[...], preferred_element_type=jnp.float32) + b_ref[...]
    o_ref[...] = _apply_act(y, activation).astype(o_ref.dtype)


def matmul_bias(x, w, b=None, activation="none", ln=None,
                out_dtype=jnp.bfloat16, tm=None):
    """x:(M,K) @ w:(K,N) + b.  Weights stay VMEM-resident (full K, full N);
    grid over M rows only (single streaming pass over activations)."""
    tm = _TM_DEFAULT if tm is None else tm
    M, K = x.shape
    N = w.shape[1]
    if b is None:
        b = jnp.zeros((N,), jnp.float32)
    tm_, Mp = (M, M) if M <= tm else (tm, _round_up(M, tm))

    xb = _pad_rows(x.astype(jnp.bfloat16), Mp)
    wb = w.astype(jnp.bfloat16)
    bb = b.reshape(1, N).astype(jnp.float32)

    common = dict(
        out_shape=jax.ShapeDtypeStruct((Mp, N), out_dtype),
        grid=(Mp // tm_,),
        out_specs=pl.BlockSpec((tm_, N), lambda i: (i, 0)),
        compiler_params=pltpu.CompilerParams(
            dimension_semantics=("parallel",), vmem_limit_bytes=_VMEM_LIMIT),
    )
    if ln is None:
        out = pl.pallas_call(
            partial(_matmul_kernel, activation=activation),
            in_specs=[pl.BlockSpec((tm_, K), lambda i: (i, 0)),
                      pl.BlockSpec((K, N), lambda i: (0, 0)),
                      pl.BlockSpec((1, N), lambda i: (0, 0))],
            **common)(xb, wb, bb)
    else:
        g, be, eps = ln
        out = pl.pallas_call(
            partial(_matmul_ln_kernel, activation=activation, eps=eps),
            in_specs=[pl.BlockSpec((tm_, K), lambda i: (i, 0)),
                      pl.BlockSpec((1, K), lambda i: (0, 0)),
                      pl.BlockSpec((1, K), lambda i: (0, 0)),
                      pl.BlockSpec((K, N), lambda i: (0, 0)),
                      pl.BlockSpec((1, N), lambda i: (0, 0))],
            **common)(xb, g.reshape(1, K).astype(jnp.float32),
                      be.reshape(1, K).astype(jnp.float32), wb, bb)
    return out[:M] if Mp != M else out


# ----------------------------------------------------------------------------
# Fused LayerNorm + in_proj: masked x-branch and z-branch in one pass
# ----------------------------------------------------------------------------

def _in_proj_ln_kernel(x_ref, wx_ref, wz_ref, m_ref, g_ref, be_ref,
                       xo_ref, zo_ref, *, eps):
    xf = x_ref[...].astype(jnp.float32)
    mu = jnp.mean(xf, axis=-1, keepdims=True)
    xc = xf - mu
    var = jnp.mean(xc * xc, axis=-1, keepdims=True)
    xn = (xc * lax.rsqrt(var + eps) * g_ref[...] + be_ref[...]).astype(jnp.bfloat16)
    m = m_ref[...]
    xo = jnp.dot(xn, wx_ref[...], preferred_element_type=jnp.float32) * m
    zo = jnp.dot(xn, wz_ref[...], preferred_element_type=jnp.float32)
    xo_ref[...] = xo.astype(xo_ref.dtype)
    zo_ref[...] = zo.astype(zo_ref.dtype)


def in_proj_ln(x, w, g, b, mask, eps=1e-5, tm=None):
    """x:(M,D), w:(D,2*d_inner), mask:(M,1). Full-width resident weights, so LN
    is computed exactly once per row tile (no per-N-tile recompute)."""
    tm = _TM_DEFAULT if tm is None else tm
    M, K = x.shape
    N = w.shape[1] // 2
    wx, wz = w[:, :N].astype(jnp.bfloat16), w[:, N:].astype(jnp.bfloat16)
    tm_, Mp = (M, M) if M <= tm else (tm, _round_up(M, tm))
    xb = _pad_rows(x.astype(jnp.bfloat16), Mp)
    mb = _pad_rows(mask.astype(jnp.float32), Mp)
    xo, zo = pl.pallas_call(
        partial(_in_proj_ln_kernel, eps=eps),
        out_shape=(jax.ShapeDtypeStruct((Mp, N), jnp.bfloat16),
                   jax.ShapeDtypeStruct((Mp, N), jnp.bfloat16)),
        grid=(Mp // tm_,),
        in_specs=[pl.BlockSpec((tm_, K), lambda i: (i, 0)),
                  pl.BlockSpec((K, N), lambda i: (0, 0)),
                  pl.BlockSpec((K, N), lambda i: (0, 0)),
                  pl.BlockSpec((tm_, 1), lambda i: (i, 0)),
                  pl.BlockSpec((1, K), lambda i: (0, 0)),
                  pl.BlockSpec((1, K), lambda i: (0, 0))],
        out_specs=(pl.BlockSpec((tm_, N), lambda i: (i, 0)),
                   pl.BlockSpec((tm_, N), lambda i: (i, 0))),
        compiler_params=pltpu.CompilerParams(
            dimension_semantics=("parallel",), vmem_limit_bytes=_VMEM_LIMIT),
    )(xb, wx, wz, mb, g.reshape(1, K).astype(jnp.float32),
      b.reshape(1, K).astype(jnp.float32))
    return (xo[:M], zo[:M]) if Mp != M else (xo, zo)


# ----------------------------------------------------------------------------
# Fused x_proj + dt_proj + softplus -> (dt, packed B|C)
# ----------------------------------------------------------------------------

def _xproj_dt_kernel(xc_ref, wxp_ref, wdt_ref, bdt_ref, dt_ref, bc_ref, *, dt_rank):
    xdbl = jnp.dot(xc_ref[...], wxp_ref[...], preferred_element_type=jnp.float32)
    dt = jnp.dot(xdbl[:, :dt_rank], wdt_ref[...],
                 preferred_element_type=jnp.float32) + bdt_ref[...]
    dt_ref[...] = _softplus(dt).astype(dt_ref.dtype)      # softplus hoisted here
    bc_ref[...] = xdbl[:, dt_rank:].astype(bc_ref.dtype)  # B|C packed, one store


def xproj_dtproj(xc, w_xp, w_dt, b_dt, dt_rank, d_state, tm=None):
    tm = _TM_DEFAULT if tm is None else tm
    M, K = xc.shape                      # K = d_inner
    Nx = w_xp.shape[1]                   # dt_rank + 2*d_state
    d_inner = w_dt.shape[1]
    tm_, Mp = (M, M) if M <= tm else (tm, _round_up(M, tm))
    xb = _pad_rows(xc.astype(jnp.bfloat16), Mp)
    dt, bc = pl.pallas_call(
        partial(_xproj_dt_kernel, dt_rank=dt_rank),
        out_shape=(jax.ShapeDtypeStruct((Mp, d_inner), jnp.float32),
                   jax.ShapeDtypeStruct((Mp, 2 * d_state), jnp.float32)),
        grid=(Mp // tm_,),
        in_specs=[pl.BlockSpec((tm_, K), lambda i: (i, 0)),
                  pl.BlockSpec((K, Nx), lambda i: (0, 0)),
                  pl.BlockSpec((dt_rank, d_inner), lambda i: (0, 0)),
                  pl.BlockSpec((1, d_inner), lambda i: (0, 0))],
        out_specs=(pl.BlockSpec((tm_, d_inner), lambda i: (i, 0)),
                   pl.BlockSpec((tm_, 2 * d_state), lambda i: (i, 0))),
        compiler_params=pltpu.CompilerParams(
            dimension_semantics=("parallel",), vmem_limit_bytes=_VMEM_LIMIT),
    )(xb, w_xp.astype(jnp.bfloat16), w_dt.astype(jnp.float32),
      b_dt.reshape(1, d_inner).astype(jnp.float32))
    return (dt[:M], bc[:M]) if Mp != M else (dt, bc)


# ----------------------------------------------------------------------------
# Depthwise causal conv1d + SiLU (single load, pltpu.roll shifts, channel grid)
# ----------------------------------------------------------------------------

def _causal_conv_silu_kernel(xp_ref, w_ref, b_ref, o_ref, *, K, L):
    x = xp_ref[...].astype(jnp.float32)          # (Ltot, dc), single load
    wv = w_ref[...]                              # (K, dc)
    Ltot = x.shape[0]
    acc = x * wv[0:1, :]
    for k in range(1, K):                        # K tiny & static
        acc = acc + pltpu.roll(x, shift=Ltot - k, axis=0) * wv[k:k + 1, :]
    acc = acc[:L, :] + b_ref[...]
    o_ref[...] = (acc * _sigmoid(acc)).astype(o_ref.dtype)


def causal_conv_silu(x, w, b):
    """x:(B,L,d) bf16, w:(d,K), b:(d,). Grid = (batch, channel-block) so both
    v7x TensorCores have work even at batch 1-2."""
    Bsz, L, d = x.shape
    K = w.shape[1]
    dc = _channel_block(d)
    Ltot = _round_up(L + K - 1, 16)              # 16: bf16 sublane packing
    xpad = jnp.pad(x.astype(jnp.bfloat16),
                   ((0, 0), (K - 1, Ltot - (L + K - 1)), (0, 0)))
    return pl.pallas_call(
        partial(_causal_conv_silu_kernel, K=K, L=L),
        out_shape=jax.ShapeDtypeStruct((Bsz, L, d), jnp.bfloat16),
        grid=(Bsz, d // dc),
        in_specs=[pl.BlockSpec((None, Ltot, dc), lambda i, c: (i, 0, c)),
                  pl.BlockSpec((K, dc), lambda i, c: (0, c)),
                  pl.BlockSpec((1, dc), lambda i, c: (0, c))],
        out_specs=pl.BlockSpec((None, L, dc), lambda i, c: (i, 0, c)),
        compiler_params=pltpu.CompilerParams(
            dimension_semantics=("parallel", "parallel"),
            vmem_limit_bytes=_VMEM_LIMIT),
    )(xpad, w.T.astype(jnp.float32), b.reshape(1, d).astype(jnp.float32))


# ----------------------------------------------------------------------------
# Selective scan: full L in-kernel, fori_loop over sub-chunks, incremental y
# ----------------------------------------------------------------------------

def _selective_scan_kernel(u_ref, dt_ref, At_ref, bc_ref, D_ref, o_ref,
                           *, d_state, sub):
    L, tc = u_ref.shape
    At = At_ref[...]                             # (d_state, tc)
    Dv = D_ref[...]                              # (1, tc)
    nchunks = L // sub

    def chunk_body(c, h):
        base = pl.multiple_of(c * sub, sub)
        u = u_ref[pl.ds(base, sub), :].astype(jnp.float32)   # (sub, tc)
        dt = dt_ref[pl.ds(base, sub), :]                     # (sub, tc) softplus'd
        bc = bc_ref[pl.ds(base, sub), :]                     # (sub, 2*d_state)
        Bc = bc[:, :d_state][:, :, None]                     # (sub, d_state, 1)
        Cc = bc[:, d_state:][:, :, None]                     # (sub, d_state, 1)
        dA = jnp.exp(dt[:, None, :] * At[None, :, :])        # (sub, d_state, tc)
        dBu = Bc * (dt * u)[:, None, :]                      # (sub, d_state, tc)
        ys = []
        for t in range(sub):                                 # short static unroll
            h = dA[t] * h + dBu[t]
            ys.append(jnp.sum(Cc[t] * h, axis=0, keepdims=True))  # (1, tc)
        y = jnp.concatenate(ys, axis=0) + Dv * u             # (sub, tc)
        o_ref[pl.ds(base, sub), :] = y.astype(o_ref.dtype)
        return h

    h0 = jnp.zeros((d_state, tc), jnp.float32)
    lax.fori_loop(0, nchunks, chunk_body, h0)


def selective_scan(u, dt, A, bc, D, *, sub=8):
    """u:(B,L,d_in) bf16, dt:(B,L,d_in) f32 (softplus'd), A:(d_in,d_state),
    bc:(B,L,2*d_state) packed (B|C).  One kernel invocation per
    (batch, channel-block); y accumulated per timestep (no h-snapshot stack)."""
    Bsz, L, d_in = u.shape
    d_state = A.shape[1]
    tc = _channel_block(d_in)
    Lp = _round_up(L, sub)
    if Lp != L:
        padt = ((0, 0), (0, Lp - L), (0, 0))
        u, dt, bc = jnp.pad(u, padt), jnp.pad(dt, padt), jnp.pad(bc, padt)
    out = pl.pallas_call(
        partial(_selective_scan_kernel, d_state=d_state, sub=sub),
        out_shape=jax.ShapeDtypeStruct((Bsz, Lp, d_in), jnp.bfloat16),
        grid=(Bsz, d_in // tc),
        in_specs=[pl.BlockSpec((None, Lp, tc), lambda b, c: (b, 0, c)),
                  pl.BlockSpec((None, Lp, tc), lambda b, c: (b, 0, c)),
                  pl.BlockSpec((d_state, tc), lambda b, c: (0, c)),
                  pl.BlockSpec((None, Lp, 2 * d_state), lambda b, c: (b, 0, 0)),
                  pl.BlockSpec((1, tc), lambda b, c: (0, c))],
        out_specs=pl.BlockSpec((None, Lp, tc), lambda b, c: (b, 0, c)),
        compiler_params=pltpu.CompilerParams(
            dimension_semantics=("parallel", "parallel"),
            vmem_limit_bytes=_VMEM_LIMIT),
    )(u.astype(jnp.bfloat16), dt.astype(jnp.float32), A.T.astype(jnp.float32),
      bc.astype(jnp.float32), D.reshape(1, d_in).astype(jnp.float32))
    return out[:, :L] if Lp != L else out


# ----------------------------------------------------------------------------
# SiLU-gated out_proj, resident weight, mask folded into the epilogue
# ----------------------------------------------------------------------------

def _gated_out_proj_kernel(y_ref, z_ref, m_ref, w_ref, o_ref):
    y = y_ref[...].astype(jnp.float32)
    z = z_ref[...].astype(jnp.float32)
    g = (y * z * _sigmoid(z)).astype(jnp.bfloat16)        # gate computed once
    out = jnp.dot(g, w_ref[...], preferred_element_type=jnp.float32)
    o_ref[...] = (out * m_ref[...]).astype(o_ref.dtype)


def gated_out_proj(y, z, w, mask, tm=None):
    tm = _TM_DEFAULT if tm is None else tm
    M, K = y.shape
    N = w.shape[1]
    tm_, Mp = (M, M) if M <= tm else (tm, _round_up(M, tm))
    yb = _pad_rows(y.astype(jnp.bfloat16), Mp)
    zb = _pad_rows(z.astype(jnp.bfloat16), Mp)
    mb = _pad_rows(mask.astype(jnp.float32), Mp)
    out = pl.pallas_call(
        _gated_out_proj_kernel,
        out_shape=jax.ShapeDtypeStruct((Mp, N), jnp.bfloat16),
        grid=(Mp // tm_,),
        in_specs=[pl.BlockSpec((tm_, K), lambda i: (i, 0)),
                  pl.BlockSpec((tm_, K), lambda i: (i, 0)),
                  pl.BlockSpec((tm_, 1), lambda i: (i, 0)),
                  pl.BlockSpec((K, N), lambda i: (0, 0))],
        out_specs=pl.BlockSpec((tm_, N), lambda i: (i, 0)),
        compiler_params=pltpu.CompilerParams(
            dimension_semantics=("parallel",), vmem_limit_bytes=_VMEM_LIMIT),
    )(yb, zb, mb, w.astype(jnp.bfloat16))
    return out[:M] if Mp != M else out


# ----------------------------------------------------------------------------
# Row-tiled LayerNorm (final norm_f)
# ----------------------------------------------------------------------------

def _layernorm_kernel(x_ref, g_ref, b_ref, o_ref, *, eps):
    x = x_ref[...].astype(jnp.float32)
    mu = jnp.mean(x, axis=-1, keepdims=True)
    xc = x - mu
    var = jnp.mean(xc * xc, axis=-1, keepdims=True)
    o_ref[...] = (xc * lax.rsqrt(var + eps) * g_ref[...] + b_ref[...]).astype(o_ref.dtype)


def layernorm(x, g, b, eps=1e-5, out_dtype=jnp.float32, tm=None):
    tm = (2 * _TM_DEFAULT) if tm is None else tm
    M, D = x.shape
    tm_, Mp = (M, M) if M <= tm else (tm, _round_up(M, tm))
    xb = _pad_rows(x.astype(jnp.float32), Mp)
    out = pl.pallas_call(
        partial(_layernorm_kernel, eps=eps),
        out_shape=jax.ShapeDtypeStruct((Mp, D), out_dtype),
        grid=(Mp // tm_,),
        in_specs=[pl.BlockSpec((tm_, D), lambda i: (i, 0)),
                  pl.BlockSpec((1, D), lambda i: (0, 0)),
                  pl.BlockSpec((1, D), lambda i: (0, 0))],
        out_specs=pl.BlockSpec((tm_, D), lambda i: (i, 0)),
        compiler_params=pltpu.CompilerParams(
            dimension_semantics=("parallel",), vmem_limit_bytes=_VMEM_LIMIT),
    )(xb, g.reshape(1, D).astype(jnp.float32), b.reshape(1, D).astype(jnp.float32))
    return out[:M] if Mp != M else out


# ----------------------------------------------------------------------------
# Model glue (plain JAX; heavy compute in kernels above)
# ----------------------------------------------------------------------------

def predictor_forward(p, x, policy):
    """DynamicViT-style PredictorLG. x:(B,N,C), policy:(B,N,1) -> (B,N,2)."""
    B, N, C = x.shape
    h = matmul_bias(x.reshape(B * N, C), p["w1"], p["b1"], activation="gelu",
                    ln=(p["ln_g"], p["ln_b"], 1e-5)).reshape(B, N, C)
    local_x = h[:, :, :C // 2].astype(jnp.float32)
    hg = h[:, :, C // 2:].astype(jnp.float32)
    pol = policy.astype(jnp.float32)
    global_x = (jnp.sum(hg * pol, axis=1, keepdims=True)
                / jnp.sum(pol, axis=1, keepdims=True))
    h = jnp.concatenate([local_x, jnp.broadcast_to(global_x, (B, N, C // 2))], axis=-1)
    hf = h.reshape(B * N, C)
    hf = matmul_bias(hf, p["w2"], p["b2"], activation="gelu")
    hf = matmul_bias(hf, p["w3"], p["b3"], activation="gelu")
    # Tiny-N (=2) head + log_softmax in plain XLA (Pallas overhead > compute).
    logits = hf.astype(jnp.float32) @ p["w4"].astype(jnp.float32) + p["b4"]
    return jax.nn.log_softmax(logits, axis=-1).reshape(B, N, 2)


def mamba_mixer(p, x, norm_g, norm_b, mask):
    """LN fused into in_proj; mask applied in-kernel. x:(B,L,D), mask:(B,L,1)."""
    B, L, D = x.shape
    d_inner = p["out_proj_w"].shape[0]
    d_state = p["A_log"].shape[1]
    dt_rank = p["dt_proj_w"].shape[0]
    mflat = mask.reshape(B * L, 1)

    # TODO(synk): MambaMultiDynamic (multi-direction scans, exact dynamic-token
    # plumbing) is not in the provided source; single forward scan with pruned
    # tokens zeroed by the policy mask.
    xin, z = in_proj_ln(x.reshape(B * L, D), p["in_proj_w"], norm_g, norm_b, mflat)
    xc = causal_conv_silu(xin.reshape(B, L, d_inner), p["conv_w"], p["conv_b"])

    dt, bc = xproj_dtproj(xc.reshape(B * L, d_inner), p["x_proj_w"],
                          p["dt_proj_w"], p["dt_proj_b"], dt_rank, d_state)

    A = -jnp.exp(p["A_log"].astype(jnp.float32))            # (d_inner, d_state)
    y = selective_scan(xc, dt.reshape(B, L, d_inner), A,
                       bc.reshape(B, L, 2 * d_state), p["D"])

    out = gated_out_proj(y.reshape(B * L, d_inner), z, p["out_proj_w"], mflat)
    return out.reshape(B, L, D)


def block_forward(p, hidden, residual, mask):
    """Mamba Block: (add) -> LayerNorm (fused into in_proj) -> mixer."""
    residual = hidden if residual is None else hidden + residual
    h = mamba_mixer(p["mixer"], residual, p["norm_g"], p["norm_b"], mask)
    # TODO(synk): exact block_policy semantics of the dynamic block unavailable;
    # return the per-layer token policy.
    return h, residual, mask[..., 0]


def dyvm_forward(params, x, *, patch, pruning_loc, token_ratio):
    """Inference-mode DyVM.forward. Returns (logits, block_policy)."""
    B, C, H, W = x.shape
    D = params["patch_w"].shape[1]
    Hp, Wp = H // patch, W // patch
    M = Hp * Wp

    # Patch embed: conv(k=s=patch) == patchify + matmul kernel.
    xp = (x.reshape(B, C, Hp, patch, Wp, patch)
           .transpose(0, 2, 4, 1, 3, 5)
           .reshape(B * M, C * patch * patch))
    hidden = matmul_bias(xp, params["patch_w"], params["patch_b"]).reshape(B, M, D)

    residual = None
    token_policy = jnp.ones((B, M, 1), jnp.float32)
    block_policies = []
    pc = 0

    for li, lp in enumerate(params["layers"]):
        if li in pruning_loc:
            pred_in = hidden + residual
            pred_score = predictor_forward(params["predictors"][pc], pred_in, token_policy)
            score = pred_score[:, :, 0]
            score = jnp.where(token_policy[:, :, 0] == 1.0, score, -jnp.inf)
            num_keep = int(token_ratio[pc] * M)
            _, keep_idx = lax.top_k(score, num_keep)
            keep_mask = jnp.zeros((B, M), jnp.float32)
            keep_mask = keep_mask.at[jnp.arange(B)[:, None], keep_idx].set(1.0)
            token_policy = keep_mask[..., None]
            # TODO(synk): physically gathering kept tokens (static num_keep) would
            # further halve post-pruning work; mask-based form kept to preserve the
            # reference layer-call semantics (mask=token_policy on the full set).
            pc += 1
        hidden, residual, bp = block_forward(lp, hidden, residual, token_policy)
        block_policies.append(bp)

    # final add + norm (fused_add_norm=False branch; DropPath is identity at eval)
    residual = hidden if residual is None else residual + hidden
    hs = layernorm(residual.reshape(B * M, D),
                   params["norm_f_g"], params["norm_f_b"],
                   out_dtype=jnp.float32).reshape(B, M, D)

    block_policy = jnp.stack(block_policies, axis=0)         # (depth, B, M)
    cls_t = hs.mean(axis=1)                                   # mean-pool path
    # Tiny-N classifier head in plain XLA.
    logits = cls_t @ params["head_w"] + params["head_b"]
    return logits, block_policy


# ----------------------------------------------------------------------------
# Deterministic parameter init (projection weights pre-cast to bf16 once)
# ----------------------------------------------------------------------------

def init_params(key, *, in_chans, patch, embed_dim, depth, num_classes,
                d_state, d_conv, expand, dt_rank, n_predictors):
    kit = iter(jax.random.split(key, 128))

    def w(shape, std=0.02):
        return std * jax.random.normal(next(kit), shape, jnp.float32)

    d_inner = expand * embed_dim
    params = {
        "patch_w": w((in_chans * patch * patch, embed_dim)).astype(jnp.bfloat16),
        "patch_b": jnp.zeros((embed_dim,), jnp.float32),
        "norm_f_g": jnp.ones((embed_dim,), jnp.float32),
        "norm_f_b": jnp.zeros((embed_dim,), jnp.float32),
        "head_w": w((embed_dim, num_classes)),
        "head_b": jnp.zeros((num_classes,), jnp.float32),
        "layers": [],
        "predictors": [],
    }
    for _ in range(depth):
        params["layers"].append({
            "norm_g": jnp.ones((embed_dim,), jnp.float32),
            "norm_b": jnp.zeros((embed_dim,), jnp.float32),
            "mixer": {
                "in_proj_w": w((embed_dim, 2 * d_inner)).astype(jnp.bfloat16),
                "conv_w": w((d_inner, d_conv), std=0.1),
                "conv_b": jnp.zeros((d_inner,), jnp.float32),
                "x_proj_w": w((d_inner, dt_rank + 2 * d_state)).astype(jnp.bfloat16),
                "dt_proj_w": w((dt_rank, d_inner), std=0.1),
                "dt_proj_b": jnp.full((d_inner,), math.log(math.expm1(0.01)), jnp.float32),
                "A_log": jnp.log(jnp.broadcast_to(
                    jnp.arange(1, d_state + 1, dtype=jnp.float32),
                    (d_inner, d_state))),
                "D": jnp.ones((d_inner,), jnp.float32),
                "out_proj_w": w((d_inner, embed_dim)).astype(jnp.bfloat16),
            },
        })
    for _ in range(n_predictors):
        params["predictors"].append({
            "ln_g": jnp.ones((embed_dim,), jnp.float32),
            "ln_b": jnp.zeros((embed_dim,), jnp.float32),
            "w1": w((embed_dim, embed_dim)).astype(jnp.bfloat16),
            "b1": jnp.zeros((embed_dim,), jnp.float32),
            "w2": w((embed_dim, embed_dim // 2)).astype(jnp.bfloat16),
            "b2": jnp.zeros((embed_dim // 2,), jnp.float32),
            "w3": w((embed_dim // 2, embed_dim // 4)).astype(jnp.bfloat16),
            "b3": jnp.zeros((embed_dim // 4,), jnp.float32),
            "w4": w((embed_dim // 4, 2)),
            "b4": jnp.zeros((2,), jnp.float32),
        })
    return params


# ----------------------------------------------------------------------------

if __name__ == "__main__":
    B, C, H, W = 2, 3, 16, 16
    patch = 4
    embed_dim = 32
    depth = 2
    num_classes = 10
    d_state, d_conv, expand = 8, 4, 2
    dt_rank = math.ceil(embed_dim / 16)
    pruning_loc = (1,)
    token_ratio = (0.5,)

    params = init_params(jax.random.PRNGKey(0), in_chans=C, patch=patch,
                         embed_dim=embed_dim, depth=depth, num_classes=num_classes,
                         d_state=d_state, d_conv=d_conv, expand=expand,
                         dt_rank=dt_rank, n_predictors=len(pruning_loc))
    x = jax.random.normal(jax.random.PRNGKey(0), (B, C, H, W), jnp.float32)

    fwd = jax.jit(lambda p, xx: dyvm_forward(p, xx, patch=patch,
                                             pruning_loc=pruning_loc,
                                             token_ratio=token_ratio))
    logits, block_policy = fwd(params, x)
    jax.block_until_ready((logits, block_policy))
    assert logits.shape == (B, num_classes)
    assert block_policy.shape == (depth, B, (H // patch) * (W // patch))
    print("KERNEL_OK")
</pallas_src>

<mosaic_0001>
module attributes {stable_mosaic.version = 11 : i64} {
  func.func @_matmul_kernel(%arg0: i32, %arg1: memref<32x48xbf16, #tpu.memory_space<vmem>>, %arg2: memref<48x32xbf16, #tpu.memory_space<vmem>>, %arg3: memref<1x32xf32, #tpu.memory_space<vmem>>, %arg4: memref<32x32xbf16, #tpu.memory_space<vmem>>) attributes {dimension_semantics = [#tpu.dimension_semantics<parallel>], iteration_bounds = array<i64: 1>, scalar_prefetch = 0 : i64, scratch_operands = 0 : i64, tpu.core_type = #tpu.core_type<tc>, window_params = [{transform_indices = @transform_0, window_bounds = array<i64: 32, 48>}, {pipeline_mode = #tpu.pipeline_mode<synchronous>, transform_indices = @transform_1, window_bounds = array<i64: 48, 32>}, {pipeline_mode = #tpu.pipeline_mode<synchronous>, transform_indices = @transform_2, window_bounds = array<i64: 1, 32>}, {transform_indices = @transform_3, window_bounds = array<i64: 32, 32>}]} {
    %c0 = arith.constant 0 : index
    %c0_0 = arith.constant 0 : index
    %0 = vector.load %arg1[%c0, %c0_0] : memref<32x48xbf16, #tpu.memory_space<vmem>>, vector<32x48xbf16>
    %c0_1 = arith.constant 0 : index
    %c0_2 = arith.constant 0 : index
    %1 = vector.load %arg2[%c0_1, %c0_2] : memref<48x32xbf16, #tpu.memory_space<vmem>>, vector<48x32xbf16>
    %cst = arith.constant dense<0.000000e+00> : vector<32x32xf32>
    %2 = tpu.matmul %0, %1, %cst {dimension_numbers = #tpu.dot_dimension_numbers<[1], [0], [0], [1], [0, 0, 1, 1], [], []>} : vector<32x48xbf16>, vector<48x32xbf16>, vector<32x32xf32> -> vector<32x32xf32>
    %c0_3 = arith.constant 0 : index
    %c0_4 = arith.constant 0 : index
    %3 = vector.load %arg3[%c0_3, %c0_4] : memref<1x32xf32, #tpu.memory_space<vmem>>, vector<1x32xf32>
    %4 = vector.broadcast %3 : vector<1x32xf32> to vector<32x32xf32>
    %5 = arith.addf %2, %4 : vector<32x32xf32>
    %6 = arith.truncf %5 : vector<32x32xf32> to vector<32x32xbf16>
    %c0_5 = arith.constant 0 : index
    %c0_6 = arith.constant 0 : index
    %7 = vector.load %arg4[%c0_5, %c0_6] : memref<32x32xbf16, #tpu.memory_space<vmem>>, vector<32x32xbf16>
    tpu.vector_store %arg4[%c0_5, %c0_6], %6 {strides = array<i32>} : memref<32x32xbf16, #tpu.memory_space<vmem>>, vector<32x32xbf16>,
    return
  }
  func.func @transform_0(%arg0: i32) -> (i32, i32) {
    %c0_i32 = arith.constant 0 : i32
    %c0_i32_0 = arith.constant 0 : i32
    return %arg0, %c0_i32 : i32, i32
  }
  func.func @transform_1(%arg0: i32) -> (i32, i32) {
    %c0_i32 = arith.constant 0 : i32
    %c0_i32_0 = arith.constant 0 : i32
    %c0_i32_1 = arith.constant 0 : i32
    return %c0_i32, %c0_i32_0 : i32, i32
  }
  func.func @transform_2(%arg0: i32) -> (i32, i32) {
    %c0_i32 = arith.constant 0 : i32
    %c0_i32_0 = arith.constant 0 : i32
    %c0_i32_1 = arith.constant 0 : i32
    return %c0_i32, %c0_i32_0 : i32, i32
  }
  func.func @transform_3(%arg0: i32) -> (i32, i32) {
    %c0_i32 = arith.constant 0 : i32
    %c0_i32_0 = arith.constant 0 : i32
    return %arg0, %c0_i32 : i32, i32
  }
}

module attributes {stable_mosaic.version = 11 : i64} {
  func.func @_causal_conv_silu_kernel(%arg0: i32, %arg1: i32, %arg2: memref<1x32x64xbf16, #tpu.memory_space<vmem>>, %arg3: memref<4x64xf32, #tpu.memory_space<vmem>>, %arg4: memref<1x64xf32, #tpu.memory_space<vmem>>, %arg5: memref<1x16x64xbf16, #tpu.memory_space<vmem>>) attributes {dimension_semantics = [#tpu.dimension_semantics<parallel>, #tpu.dimension_semantics<parallel>], iteration_bounds = array<i64: 2, 1>, scalar_prefetch = 0 : i64, scratch_operands = 0 : i64, tpu.core_type = #tpu.core_type<tc>, window_params = [{transform_indices = @transform_0, window_bounds = array<i64: 1, 32, 64>}, {transform_indices = @transform_1, window_bounds = array<i64: 4, 64>}, {transform_indices = @transform_2, window_bounds = array<i64: 1, 64>}, {transform_indices = @transform_3, window_bounds = array<i64: 1, 16, 64>}]} {
    %c0 = arith.constant 0 : index
    %c0_0 = arith.constant 0 : index
    %c0_1 = arith.constant 0 : index
    %0 = vector.load %arg2[%c0, %c0_0, %c0_1] : memref<1x32x64xbf16, #tpu.memory_space<vmem>>, vector<1x32x64xbf16>
    %1 = vector.shape_cast %0 : vector<1x32x64xbf16> to vector<32x64xbf16>
    %2 = arith.extf %1 : vector<32x64xbf16> to vector<32x64xf32>
    %c0_2 = arith.constant 0 : index
    %c0_3 = arith.constant 0 : index
    %3 = vector.load %arg3[%c0_2, %c0_3] : memref<4x64xf32, #tpu.memory_space<vmem>>, vector<4x64xf32>
    %4 = vector.extract_strided_slice %3 {offsets = [0, 0], sizes = [1, 64], strides = [1, 1]} : vector<4x64xf32> to vector<1x64xf32>
    %5 = vector.broadcast %4 : vector<1x64xf32> to vector<32x64xf32>
    %6 = arith.mulf %2, %5 : vector<32x64xf32>
    %c31_i32 = arith.constant 31 : i32
    %7 = tpu.dynamic_rotate %2 by %c31_i32 dim 0 : vector<32x64xf32>, i32 -> vector<32x64xf32>
    %8 = vector.extract_strided_slice %3 {offsets = [1, 0], sizes = [1, 64], strides = [1, 1]} : vector<4x64xf32> to vector<1x64xf32>
    %9 = vector.broadcast %8 : vector<1x64xf32> to vector<32x64xf32>
    %10 = arith.mulf %7, %9 : vector<32x64xf32>
    %11 = arith.addf %6, %10 : vector<32x64xf32>
    %c30_i32 = arith.constant 30 : i32
    %12 = tpu.dynamic_rotate %2 by %c30_i32 dim 0 : vector<32x64xf32>, i32 -> vector<32x64xf32>
    %13 = vector.extract_strided_slice %3 {offsets = [2, 0], sizes = [1, 64], strides = [1, 1]} : vector<4x64xf32> to vector<1x64xf32>
    %14 = vector.broadcast %13 : vector<1x64xf32> to vector<32x64xf32>
    %15 = arith.mulf %12, %14 : vector<32x64xf32>
    %16 = arith.addf %11, %15 : vector<32x64xf32>
    %c29_i32 = arith.constant 29 : i32
    %17 = tpu.dynamic_rotate %2 by %c29_i32 dim 0 : vector<32x64xf32>, i32 -> vector<32x64xf32>
    %18 = vector.extract_strided_slice %3 {offsets = [3, 0], sizes = [1, 64], strides = [1, 1]} : vector<4x64xf32> to vector<1x64xf32>
    %19 = vector.broadcast %18 : vector<1x64xf32> to vector<32x64xf32>
    %20 = arith.mulf %17, %19 : vector<32x64xf32>
    %21 = arith.addf %16, %20 : vector<32x64xf32>
    %22 = vector.extract_strided_slice %21 {offsets = [0, 0], sizes = [16, 64], strides = [1, 1]} : vector<32x64xf32> to vector<16x64xf32>
    %c0_4 = arith.constant 0 : index
    %c0_5 = arith.constant 0 : index
    %23 = vector.load %arg4[%c0_4, %c0_5] : memref<1x64xf32, #tpu.memory_space<vmem>>, vector<1x64xf32>
    %24 = vector.broadcast %23 : vector<1x64xf32> to vector<16x64xf32>
    %25 = arith.addf %22, %24 : vector<16x64xf32>
    %cst = arith.constant 0.000000e+00 : f32
    %26 = vector.broadcast %cst : f32 to vector<16x64xf32>
    %27 = arith.subf %26, %25 : vector<16x64xf32>
    %28 = math.exp %27 : vector<16x64xf32>
    %cst_6 = arith.constant 1.000000e+00 : f32
    %29 = vector.broadcast %cst_6 : f32 to vector<16x64xf32>
    %30 = arith.addf %29, %28 : vector<16x64xf32>
    %cst_7 = arith.constant 1.000000e+00 : f32
    %31 = vector.broadcast %cst_7 : f32 to vector<16x64xf32>
    %32 = arith.divf %31, %30 : vector<16x64xf32>
    %33 = arith.mulf %25, %32 : vector<16x64xf32>
    %34 = arith.truncf %33 : vector<16x64xf32> to vector<16x64xbf16>
    %c0_8 = arith.constant 0 : index
    %c0_9 = arith.constant 0 : index
    %c0_10 = arith.constant 0 : index
    %35 = vector.load %arg5[%c0_8, %c0_9, %c0_10] : memref<1x16x64xbf16, #tpu.memory_space<vmem>>, vector<1x16x64xbf16>
    %36 = vector.shape_cast %35 : vector<1x16x64xbf16> to vector<16x64xbf16>
    %37 = vector.shape_cast %34 : vector<16x64xbf16> to vector<1x16x64xbf16>
    tpu.vector_store %arg5[%c0_8, %c0_9, %c0_10], %37 {strides = array<i32>} : memref<1x16x64xbf16, #tpu.memory_space<vmem>>, vector<1x16x64xbf16>,
    return
  }
  func.func @transform_0(%arg0: i32, %arg1: i32) -> (i32, i32, i32) {
    %c0_i32 = arith.constant 0 : i32
    %c0_i32_0 = arith.constant 0 : i32
    return %arg0, %c0_i32, %arg1 : i32, i32, i32
  }
  func.func @transform_1(%arg0: i32, %arg1: i32) -> (i32, i32) {
    %c0_i32 = arith.constant 0 : i32
    %c0_i32_0 = arith.constant 0 : i32
    return %c0_i32, %arg1 : i32, i32
  }
  func.func @transform_2(%arg0: i32, %arg1: i32) -> (i32, i32) {
    %c0_i32 = arith.constant 0 : i32
    %c0_i32_0 = arith.constant 0 : i32
    return %c0_i32, %arg1 : i32, i32
  }
  func.func @transform_3(%arg0: i32, %arg1: i32) -> (i32, i32, i32) {
    %c0_i32 = arith.constant 0 : i32
    %c0_i32_0 = arith.constant 0 : i32
    return %arg0, %c0_i32, %arg1 : i32, i32, i32
  }
}

module attributes {stable_mosaic.version = 11 : i64} {
  func.func @_in_proj_ln_kernel(%arg0: i32, %arg1: memref<32x32xbf16, #tpu.memory_space<vmem>>, %arg2: memref<32x64xbf16, #tpu.memory_space<vmem>>, %arg3: memref<32x64xbf16, #tpu.memory_space<vmem>>, %arg4: memref<32x1xf32, #tpu.memory_space<vmem>>, %arg5: memref<1x32xf32, #tpu.memory_space<vmem>>, %arg6: memref<1x32xf32, #tpu.memory_space<vmem>>, %arg7: memref<32x64xbf16, #tpu.memory_space<vmem>>, %arg8: memref<32x64xbf16, #tpu.memory_space<vmem>>) attributes {dimension_semantics = [#tpu.dimension_semantics<parallel>], iteration_bounds = array<i64: 1>, scalar_prefetch = 0 : i64, scratch_operands = 0 : i64, tpu.core_type = #tpu.core_type<tc>, window_params = [{transform_indices = @transform_0, window_bounds = array<i64: 32, 32>}, {pipeline_mode = #tpu.pipeline_mode<synchronous>, transform_indices = @transform_1, window_bounds = array<i64: 32, 64>}, {pipeline_mode = #tpu.pipeline_mode<synchronous>, transform_indices = @transform_2, window_bounds = array<i64: 32, 64>}, {transform_indices = @transform_3, window_bounds = array<i64: 32, 1>}, {pipeline_mode = #tpu.pipeline_mode<synchronous>, transform_indices = @transform_4, window_bounds = array<i64: 1, 32>}, {pipeline_mode = #tpu.pipeline_mode<synchronous>, transform_indices = @transform_5, window_bounds = array<i64: 1, 32>}, {transform_indices = @transform_6, window_bounds = array<i64: 32, 64>}, {transform_indices = @transform_7, window_bounds = array<i64: 32, 64>}]} {
    %c0 = arith.constant 0 : index
    %c0_0 = arith.constant 0 : index
    %0 = vector.load %arg1[%c0, %c0_0] : memref<32x32xbf16, #tpu.memory_space<vmem>>, vector<32x32xbf16>
    %1 = arith.extf %0 : vector<32x32xbf16> to vector<32x32xf32>
    %cst = arith.constant dense<0.000000e+00> : vector<32xf32>
    %2 = vector.multi_reduction <add>, %1, %cst [1] : vector<32x32xf32> to vector<32xf32>
    %3 = vector.shape_cast %2 : vector<32xf32> to vector<32x1xf32>
    %cst_1 = arith.constant 3.200000e+01 : f32
    %4 = vector.broadcast %cst_1 : f32 to vector<32x1xf32>
    %5 = arith.divf %3, %4 : vector<32x1xf32>
    %6 = vector.broadcast %5 : vector<32x1xf32> to vector<32x32xf32>
    %7 = arith.subf %1, %6 : vector<32x32xf32>
    %8 = arith.mulf %7, %7 : vector<32x32xf32>
    %cst_2 = arith.constant dense<0.000000e+00> : vector<32xf32>
    %9 = vector.multi_reduction <add>, %8, %cst_2 [1] : vector<32x32xf32> to vector<32xf32>
    %10 = vector.shape_cast %9 : vector<32xf32> to vector<32x1xf32>
    %cst_3 = arith.constant 3.200000e+01 : f32
    %11 = vector.broadcast %cst_3 : f32 to vector<32x1xf32>
    %12 = arith.divf %10, %11 : vector<32x1xf32>
    %cst_4 = arith.constant 9.99999974E-6 : f32
    %13 = vector.broadcast %cst_4 : f32 to vector<32x1xf32>
    %14 = arith.addf %12, %13 : vector<32x1xf32>
    %15 = math.rsqrt %14 : vector<32x1xf32>
    %16 = vector.broadcast %15 : vector<32x1xf32> to vector<32x32xf32>
    %17 = arith.mulf %7, %16 : vector<32x32xf32>
    %c0_5 = arith.constant 0 : index
    %c0_6 = arith.constant 0 : index
    %18 = vector.load %arg5[%c0_5, %c0_6] : memref<1x32xf32, #tpu.memory_space<vmem>>, vector<1x32xf32>
    %19 = vector.broadcast %18 : vector<1x32xf32> to vector<32x32xf32>
    %20 = arith.mulf %17, %19 : vector<32x32xf32>
    %c0_7 = arith.constant 0 : index
    %c0_8 = arith.constant 0 : index
    %21 = vector.load %arg6[%c0_7, %c0_8] : memref<1x32xf32, #tpu.memory_space<vmem>>, vector<1x32xf32>
    %22 = vector.broadcast %21 : vector<1x32xf32> to vector<32x32xf32>
    %23 = arith.addf %20, %22 : vector<32x32xf32>
    %24 = arith.truncf %23 : vector<32x32xf32> to vector<32x32xbf16>
    %c0_9 = arith.constant 0 : index
    %c0_10 = arith.constant 0 : index
    %25 = vector.load %arg4[%c0_9, %c0_10] : memref<32x1xf32, #tpu.memory_space<vmem>>, vector<32x1xf32>
    %c0_11 = arith.constant 0 : index
    %c0_12 = arith.constant 0 : index
    %26 = vector.load %arg2[%c0_11, %c0_12] : memref<32x64xbf16, #tpu.memory_space<vmem>>, vector<32x64xbf16>
    %cst_13 = arith.constant dense<0.000000e+00> : vector<32x64xf32>
    %27 = tpu.matmul %24, %26, %cst_13 {dimension_numbers = #tpu.dot_dimension_numbers<[1], [0], [0], [1], [0, 0, 1, 1], [], []>} : vector<32x32xbf16>, vector<32x64xbf16>, vector<32x64xf32> -> vector<32x64xf32>
    %28 = vector.broadcast %25 : vector<32x1xf32> to vector<32x64xf32>
    %29 = arith.mulf %27, %28 : vector<32x64xf32>
    %c0_14 = arith.constant 0 : index
    %c0_15 = arith.constant 0 : index
    %30 = vector.load %arg3[%c0_14, %c0_15] : memref<32x64xbf16, #tpu.memory_space<vmem>>, vector<32x64xbf16>
    %cst_16 = arith.constant dense<0.000000e+00> : vector<32x64xf32>
    %31 = tpu.matmul %24, %30, %cst_16 {dimension_numbers = #tpu.dot_dimension_numbers<[1], [0], [0], [1], [0, 0, 1, 1], [], []>} : vector<32x32xbf16>, vector<32x64xbf16>, vector<32x64xf32> -> vector<32x64xf32>
    %32 = arith.truncf %29 : vector<32x64xf32> to vector<32x64xbf16>
    %c0_17 = arith.constant 0 : index
    %c0_18 = arith.constant 0 : index
    %33 = vector.load %arg7[%c0_17, %c0_18] : memref<32x64xbf16, #tpu.memory_space<vmem>>, vector<32x64xbf16>
    tpu.vector_store %arg7[%c0_17, %c0_18], %32 {strides = array<i32>} : memref<32x64xbf16, #tpu.memory_space<vmem>>, vector<32x64xbf16>,
    %34 = arith.truncf %31 : vector<32x64xf32> to vector<32x64xbf16>
    %c0_19 = arith.constant 0 : index
    %c0_20 = arith.constant 0 : index
    %35 = vector.load %arg8[%c0_19, %c0_20] : memref<32x64xbf16, #tpu.memory_space<vmem>>, vector<32x64xbf16>
    tpu.vector_store %arg8[%c0_19, %c0_20], %34 {strides = array<i32>} : memref<32x64xbf16, #tpu.memory_space<vmem>>, vector<32x64xbf16>,
    return
  }
  func.func @transform_0(%arg0: i32) -> (i32, i32) {
    %c0_i32 = arith.constant 0 : i32
    %c0_i32_0 = arith.constant 0 : i32
    return %arg0, %c0_i32 : i32, i32
  }
  func.func @transform_1(%arg0: i32) -> (i32, i32) {
    %c0_i32 = arith.constant 0 : i32
    %c0_i32_0 = arith.constant 0 : i32
    %c0_i32_1 = arith.constant 0 : i32
    return %c0_i32, %c0_i32_0 : i32, i32
  }
  func.func @transform_2(%arg0: i32) -> (i32, i32) {
    %c0_i32 = arith.constant 0 : i32
    %c0_i32_0 = arith.constant 0 : i32
    %c0_i32_1 = arith.constant 0 : i32
    return %c0_i32, %c0_i32_0 : i32, i32
  }
  func.func @transform_3(%arg0: i32) -> (i32, i32) {
    %c0_i32 = arith.constant 0 : i32
    %c0_i32_0 = arith.constant 0 : i32
    return %arg0, %c0_i32 : i32, i32
  }
  func.func @transform_4(%arg0: i32) -> (i32, i32) {
    %c0_i32 = arith.constant 0 : i32
    %c0_i32_0 = arith.constant 0 : i32
    %c0_i32_1 = arith.constant 0 : i32
    return %c0_i32, %c0_i32_0 : i32, i32
  }
  func.func @transform_5(%arg0: i32) -> (i32, i32) {
    %c0_i32 = arith.constant 0 : i32
    %c0_i32_0 = arith.constant 0 : i32
    %c0_i32_1 = arith.constant 0 : i32
    return %c0_i32, %c0_i32_0 : i32, i32
  }
  func.func @transform_6(%arg0: i32) -> (i32, i32) {
    %c0_i32 = arith.constant 0 : i32
    %c0_i32_0 = arith.constant 0 : i32
    return %arg0, %c0_i32 : i32, i32
  }
  func.func @transform_7(%arg0: i32) -> (i32, i32) {
    %c0_i32 = arith.constant 0 : i32
    %c0_i32_0 = arith.constant 0 : i32
    return %arg0, %c0_i32 : i32, i32
  }
}

module attributes {stable_mosaic.version = 11 : i64} {
  func.func @_xproj_dt_kernel(%arg0: i32, %arg1: memref<32x64xbf16, #tpu.memory_space<vmem>>, %arg2: memref<64x18xbf16, #tpu.memory_space<vmem>>, %arg3: memref<2x64xf32, #tpu.memory_space<vmem>>, %arg4: memref<1x64xf32, #tpu.memory_space<vmem>>, %arg5: memref<32x64xf32, #tpu.memory_space<vmem>>, %arg6: memref<32x16xf32, #tpu.memory_space<vmem>>) attributes {dimension_semantics = [#tpu.dimension_semantics<parallel>], iteration_bounds = array<i64: 1>, scalar_prefetch = 0 : i64, scratch_operands = 0 : i64, tpu.core_type = #tpu.core_type<tc>, window_params = [{transform_indices = @transform_0, window_bounds = array<i64: 32, 64>}, {pipeline_mode = #tpu.pipeline_mode<synchronous>, transform_indices = @transform_1, window_bounds = array<i64: 64, 18>}, {pipeline_mode = #tpu.pipeline_mode<synchronous>, transform_indices = @transform_2, window_bounds = array<i64: 2, 64>}, {pipeline_mode = #tpu.pipeline_mode<synchronous>, transform_indices = @transform_3, window_bounds = array<i64: 1, 64>}, {transform_indices = @transform_4, window_bounds = array<i64: 32, 64>}, {transform_indices = @transform_5, window_bounds = array<i64: 32, 16>}]} {
    %c0 = arith.constant 0 : index
    %c0_0 = arith.constant 0 : index
    %0 = vector.load %arg1[%c0, %c0_0] : memref<32x64xbf16, #tpu.memory_space<vmem>>, vector<32x64xbf16>
    %c0_1 = arith.constant 0 : index
    %c0_2 = arith.constant 0 : index
    %1 = vector.load %arg2[%c0_1, %c0_2] : memref<64x18xbf16, #tpu.memory_space<vmem>>, vector<64x18xbf16>
    %cst = arith.constant dense<0.000000e+00> : vector<32x18xf32>
    %2 = tpu.matmul %0, %1, %cst {dimension_numbers = #tpu.dot_dimension_numbers<[1], [0], [0], [1], [0, 0, 1, 1], [], []>} : vector<32x64xbf16>, vector<64x18xbf16>, vector<32x18xf32> -> vector<32x18xf32>
    %3 = vector.extract_strided_slice %2 {offsets = [0, 0], sizes = [32, 2], strides = [1, 1]} : vector<32x18xf32> to vector<32x2xf32>
    %c0_3 = arith.constant 0 : index
    %c0_4 = arith.constant 0 : index
    %4 = vector.load %arg3[%c0_3, %c0_4] : memref<2x64xf32, #tpu.memory_space<vmem>>, vector<2x64xf32>
    %cst_5 = arith.constant dense<0.000000e+00> : vector<32x64xf32>
    %5 = tpu.matmul %3, %4, %cst_5 {dimension_numbers = #tpu.dot_dimension_numbers<[1], [0], [0], [1], [0, 0, 1, 1], [], []>} : vector<32x2xf32>, vector<2x64xf32>, vector<32x64xf32> -> vector<32x64xf32>
    %c0_6 = arith.constant 0 : index
    %c0_7 = arith.constant 0 : index
    %6 = vector.load %arg4[%c0_6, %c0_7] : memref<1x64xf32, #tpu.memory_space<vmem>>, vector<1x64xf32>
    %7 = vector.broadcast %6 : vector<1x64xf32> to vector<32x64xf32>
    %8 = arith.addf %5, %7 : vector<32x64xf32>
    %cst_8 = arith.constant 0.000000e+00 : f32
    %9 = vector.broadcast %cst_8 : f32 to vector<32x64xf32>
    %10 = arith.maximumf %8, %9 : vector<32x64xf32>
    %11 = math.absf %8 : vector<32x64xf32>
    %cst_9 = arith.constant 0.000000e+00 : f32
    %12 = vector.broadcast %cst_9 : f32 to vector<32x64xf32>
    %13 = arith.subf %12, %11 : vector<32x64xf32>
    %14 = math.exp %13 : vector<32x64xf32>
    %cst_10 = arith.constant 1.000000e+00 : f32
    %15 = vector.broadcast %cst_10 : f32 to vector<32x64xf32>
    %16 = arith.addf %15, %14 : vector<32x64xf32>
    %17 = math.log %16 : vector<32x64xf32>
    %18 = arith.addf %10, %17 : vector<32x64xf32>
    %c0_11 = arith.constant 0 : index
    %c0_12 = arith.constant 0 : index
    %19 = vector.load %arg5[%c0_11, %c0_12] : memref<32x64xf32, #tpu.memory_space<vmem>>, vector<32x64xf32>
    tpu.vector_store %arg5[%c0_11, %c0_12], %18 {strides = array<i32>} : memref<32x64xf32, #tpu.memory_space<vmem>>, vector<32x64xf32>,
    %20 = vector.extract_strided_slice %2 {offsets = [0, 2], sizes = [32, 16], strides = [1, 1]} : vector<32x18xf32> to vector<32x16xf32>
    %c0_13 = arith.constant 0 : index
    %c0_14 = arith.constant 0 : index
    %21 = vector.load %arg6[%c0_13, %c0_14] : memref<32x16xf32, #tpu.memory_space<vmem>>, vector<32x16xf32>
    tpu.vector_store %arg6[%c0_13, %c0_14], %20 {strides = array<i32>} : memref<32x16xf32, #tpu.memory_space<vmem>>, vector<32x16xf32>,
    return
  }
  func.func @transform_0(%arg0: i32) -> (i32, i32) {
    %c0_i32 = arith.constant 0 : i32
    %c0_i32_0 = arith.constant 0 : i32
    return %arg0, %c0_i32 : i32, i32
  }
  func.func @transform_1(%arg0: i32) -> (i32, i32) {
    %c0_i32 = arith.constant 0 : i32
    %c0_i32_0 = arith.constant 0 : i32
    %c0_i32_1 = arith.constant 0 : i32
    return %c0_i32, %c0_i32_0 : i32, i32
  }
  func.func @transform_2(%arg0: i32) -> (i32, i32) {
    %c0_i32 = arith.constant 0 : i32
    %c0_i32_0 = arith.constant 0 : i32
    %c0_i32_1 = arith.constant 0 : i32
    return %c0_i32, %c0_i32_0 : i32, i32
  }
  func.func @transform_3(%arg0: i32) -> (i32, i32) {
    %c0_i32 = arith.constant 0 : i32
    %c0_i32_0 = arith.constant 0 : i32
    %c0_i32_1 = arith.constant 0 : i32
    return %c0_i32, %c0_i32_0 : i32, i32
  }
  func.func @transform_4(%arg0: i32) -> (i32, i32) {
    %c0_i32 = arith.constant 0 : i32
    %c0_i32_0 = arith.constant 0 : i32
    return %arg0, %c0_i32 : i32, i32
  }
  func.func @transform_5(%arg0: i32) -> (i32, i32) {
    %c0_i32 = arith.constant 0 : i32
    %c0_i32_0 = arith.constant 0 : i32
    return %arg0, %c0_i32 : i32, i32
  }
}

module attributes {stable_mosaic.version = 11 : i64} {
  func.func @_gated_out_proj_kernel(%arg0: i32, %arg1: memref<32x64xbf16, #tpu.memory_space<vmem>>, %arg2: memref<32x64xbf16, #tpu.memory_space<vmem>>, %arg3: memref<32x1xf32, #tpu.memory_space<vmem>>, %arg4: memref<64x32xbf16, #tpu.memory_space<vmem>>, %arg5: memref<32x32xbf16, #tpu.memory_space<vmem>>) attributes {dimension_semantics = [#tpu.dimension_semantics<parallel>], iteration_bounds = array<i64: 1>, scalar_prefetch = 0 : i64, scratch_operands = 0 : i64, tpu.core_type = #tpu.core_type<tc>, window_params = [{transform_indices = @transform_0, window_bounds = array<i64: 32, 64>}, {transform_indices = @transform_1, window_bounds = array<i64: 32, 64>}, {transform_indices = @transform_2, window_bounds = array<i64: 32, 1>}, {pipeline_mode = #tpu.pipeline_mode<synchronous>, transform_indices = @transform_3, window_bounds = array<i64: 64, 32>}, {transform_indices = @transform_4, window_bounds = array<i64: 32, 32>}]} {
    %c0 = arith.constant 0 : index
    %c0_0 = arith.constant 0 : index
    %0 = vector.load %arg1[%c0, %c0_0] : memref<32x64xbf16, #tpu.memory_space<vmem>>, vector<32x64xbf16>
    %1 = arith.extf %0 : vector<32x64xbf16> to vector<32x64xf32>
    %c0_1 = arith.constant 0 : index
    %c0_2 = arith.constant 0 : index
    %2 = vector.load %arg2[%c0_1, %c0_2] : memref<32x64xbf16, #tpu.memory_space<vmem>>, vector<32x64xbf16>
    %3 = arith.extf %2 : vector<32x64xbf16> to vector<32x64xf32>
    %4 = arith.mulf %1, %3 : vector<32x64xf32>
    %cst = arith.constant 0.000000e+00 : f32
    %5 = vector.broadcast %cst : f32 to vector<32x64xf32>
    %6 = arith.subf %5, %3 : vector<32x64xf32>
    %7 = math.exp %6 : vector<32x64xf32>
    %cst_3 = arith.constant 1.000000e+00 : f32
    %8 = vector.broadcast %cst_3 : f32 to vector<32x64xf32>
    %9 = arith.addf %8, %7 : vector<32x64xf32>
    %cst_4 = arith.constant 1.000000e+00 : f32
    %10 = vector.broadcast %cst_4 : f32 to vector<32x64xf32>
    %11 = arith.divf %10, %9 : vector<32x64xf32>
    %12 = arith.mulf %4, %11 : vector<32x64xf32>
    %13 = arith.truncf %12 : vector<32x64xf32> to vector<32x64xbf16>
    %c0_5 = arith.constant 0 : index
    %c0_6 = arith.constant 0 : index
    %14 = vector.load %arg4[%c0_5, %c0_6] : memref<64x32xbf16, #tpu.memory_space<vmem>>, vector<64x32xbf16>
    %cst_7 = arith.constant dense<0.000000e+00> : vector<32x32xf32>
    %15 = tpu.matmul %13, %14, %cst_7 {dimension_numbers = #tpu.dot_dimension_numbers<[1], [0], [0], [1], [0, 0, 1, 1], [], []>} : vector<32x64xbf16>, vector<64x32xbf16>, vector<32x32xf32> -> vector<32x32xf32>
    %c0_8 = arith.constant 0 : index
    %c0_9 = arith.constant 0 : index
    %16 = vector.load %arg3[%c0_8, %c0_9] : memref<32x1xf32, #tpu.memory_space<vmem>>, vector<32x1xf32>
    %17 = vector.broadcast %16 : vector<32x1xf32> to vector<32x32xf32>
    %18 = arith.mulf %15, %17 : vector<32x32xf32>
    %19 = arith.truncf %18 : vector<32x32xf32> to vector<32x32xbf16>
    %c0_10 = arith.constant 0 : index
    %c0_11 = arith.constant 0 : index
    %20 = vector.load %arg5[%c0_10, %c0_11] : memref<32x32xbf16, #tpu.memory_space<vmem>>, vector<32x32xbf16>
    tpu.vector_store %arg5[%c0_10, %c0_11], %19 {strides = array<i32>} : memref<32x32xbf16, #tpu.memory_space<vmem>>, vector<32x32xbf16>,
    return
  }
  func.func @transform_0(%arg0: i32) -> (i32, i32) {
    %c0_i32 = arith.constant 0 : i32
    %c0_i32_0 = arith.constant 0 : i32
    return %arg0, %c0_i32 : i32, i32
  }
  func.func @transform_1(%arg0: i32) -> (i32, i32) {
    %c0_i32 = arith.constant 0 : i32
    %c0_i32_0 = arith.constant 0 : i32
    return %arg0, %c0_i32 : i32, i32
  }
  func.func @transform_2(%arg0: i32) -> (i32, i32) {
    %c0_i32 = arith.constant 0 : i32
    %c0_i32_0 = arith.constant 0 : i32
    return %arg0, %c0_i32 : i32, i32
  }
  func.func @transform_3(%arg0: i32) -> (i32, i32) {
    %c0_i32 = arith.constant 0 : i32
    %c0_i32_0 = arith.constant 0 : i32
    %c0_i32_1 = arith.constant 0 : i32
    return %c0_i32, %c0_i32_0 : i32, i32
  }
  func.func @transform_4(%arg0: i32) -> (i32, i32) {
    %c0_i32 = arith.constant 0 : i32
    %c0_i32_0 = arith.constant 0 : i32
    return %arg0, %c0_i32 : i32, i32
  }
}

module attributes {stable_mosaic.version = 11 : i64} {
  func.func @_selective_scan_kernel(%arg0: i32, %arg1: i32, %arg2: memref<1x16x64xbf16, #tpu.memory_space<vmem>>, %arg3: memref<1x16x64xf32, #tpu.memory_space<vmem>>, %arg4: memref<8x64xf32, #tpu.memory_space<vmem>>, %arg5: memref<1x16x16xf32, #tpu.memory_space<vmem>>, %arg6: memref<1x64xf32, #tpu.memory_space<vmem>>, %arg7: memref<1x16x64xbf16, #tpu.memory_space<vmem>>) attributes {dimension_semantics = [#tpu.dimension_semantics<parallel>, #tpu.dimension_semantics<parallel>], iteration_bounds = array<i64: 2, 1>, scalar_prefetch = 0 : i64, scratch_operands = 0 : i64, tpu.core_type = #tpu.core_type<tc>, window_params = [{transform_indices = @transform_0, window_bounds = array<i64: 1, 16, 64>}, {transform_indices = @transform_1, window_bounds = array<i64: 1, 16, 64>}, {transform_indices = @transform_2, window_bounds = array<i64: 8, 64>}, {transform_indices = @transform_3, window_bounds = array<i64: 1, 16, 16>}, {transform_indices = @transform_4, window_bounds = array<i64: 1, 64>}, {transform_indices = @transform_5, window_bounds = array<i64: 1, 16, 64>}]} {
    %c0 = arith.constant 0 : index
    %c0_0 = arith.constant 0 : index
    %0 = vector.load %arg4[%c0, %c0_0] : memref<8x64xf32, #tpu.memory_space<vmem>>, vector<8x64xf32>
    %c0_1 = arith.constant 0 : index
    %c0_2 = arith.constant 0 : index
    %1 = vector.load %arg6[%c0_1, %c0_2] : memref<1x64xf32, #tpu.memory_space<vmem>>, vector<1x64xf32>
    %cst = arith.constant 0.000000e+00 : f32
    %2 = vector.broadcast %cst : f32 to vector<8x64xf32>
    %c0_i32 = arith.constant 0 : i32
    %c2_i32 = arith.constant 2 : i32
    %3 = arith.addi %c0_i32, %c2_i32 : i32
    %c1_i32 = arith.constant 1 : i32
    %4 = scf.for %arg8 = %c0_i32 to %3 step %c1_i32 iter_args(%arg9 = %2) -> (vector<8x64xf32>)  : i32 {
      %c8_i32 = arith.constant 8 : i32
      %5 = arith.muli %arg8, %c8_i32 : i32
      %6 = tpu.assume_multiple %5, 8 : i32
      %c0_4 = arith.constant 0 : index
      %7 = arith.index_cast %6 : i32 to index
      %c0_5 = arith.constant 0 : index
      %8 = vector.load %arg2[%c0_4, %7, %c0_5] : memref<1x16x64xbf16, #tpu.memory_space<vmem>>, vector<1x8x64xbf16>
      %9 = vector.shape_cast %8 : vector<1x8x64xbf16> to vector<8x64xbf16>
      %10 = arith.extf %9 : vector<8x64xbf16> to vector<8x64xf32>
      %c0_6 = arith.constant 0 : index
      %11 = arith.index_cast %6 : i32 to index
      %c0_7 = arith.constant 0 : index
      %12 = vector.load %arg3[%c0_6, %11, %c0_7] : memref<1x16x64xf32, #tpu.memory_space<vmem>>, vector<1x8x64xf32>
      %13 = vector.shape_cast %12 : vector<1x8x64xf32> to vector<8x64xf32>
      %c0_8 = arith.constant 0 : index
      %14 = arith.index_cast %6 : i32 to index
      %c0_9 = arith.constant 0 : index
      %15 = vector.load %arg5[%c0_8, %14, %c0_9] : memref<1x16x16xf32, #tpu.memory_space<vmem>>, vector<1x8x16xf32>
      %16 = vector.shape_cast %15 : vector<1x8x16xf32> to vector<8x16xf32>
      %17 = vector.extract_strided_slice %16 {offsets = [0, 0], sizes = [8, 8], strides = [1, 1]} : vector<8x16xf32> to vector<8x8xf32>
      %18 = vector.shape_cast %17 : vector<8x8xf32> to vector<8x8x1xf32>
      %19 = vector.extract_strided_slice %16 {offsets = [0, 8], sizes = [8, 8], strides = [1, 1]} : vector<8x16xf32> to vector<8x8xf32>
      %20 = vector.shape_cast %19 : vector<8x8xf32> to vector<8x8x1xf32>
      %21 = vector.shape_cast %13 : vector<8x64xf32> to vector<8x1x64xf32>
      %22 = vector.shape_cast %0 : vector<8x64xf32> to vector<1x8x64xf32>
      %23 = vector.broadcast %21 : vector<8x1x64xf32> to vector<8x8x64xf32>
      %24 = vector.broadcast %22 : vector<1x8x64xf32> to vector<8x8x64xf32>
      %25 = arith.mulf %23, %24 : vector<8x8x64xf32>
      %26 = math.exp %25 : vector<8x8x64xf32>
      %27 = arith.mulf %13, %10 : vector<8x64xf32>
      %28 = vector.shape_cast %27 : vector<8x64xf32> to vector<8x1x64xf32>
      %29 = vector.broadcast %18 : vector<8x8x1xf32> to vector<8x8x64xf32>
      %30 = vector.broadcast %28 : vector<8x1x64xf32> to vector<8x8x64xf32>
      %31 = arith.mulf %29, %30 : vector<8x8x64xf32>
      %32 = vector.extract_strided_slice %26 {offsets = [0, 0, 0], sizes = [1, 8, 64], strides = [1, 1, 1]} : vector<8x8x64xf32> to vector<1x8x64xf32>
      %33 = vector.shape_cast %32 : vector<1x8x64xf32> to vector<8x64xf32>
      %34 = arith.mulf %33, %arg9 : vector<8x64xf32>
      %35 = vector.extract_strided_slice %31 {offsets = [0, 0, 0], sizes = [1, 8, 64], strides = [1, 1, 1]} : vector<8x8x64xf32> to vector<1x8x64xf32>
      %36 = vector.shape_cast %35 : vector<1x8x64xf32> to vector<8x64xf32>
      %37 = arith.addf %34, %36 : vector<8x64xf32>
      %38 = vector.extract_strided_slice %20 {offsets = [0, 0, 0], sizes = [1, 8, 1], strides = [1, 1, 1]} : vector<8x8x1xf32> to vector<1x8x1xf32>
      %39 = vector.shape_cast %38 : vector<1x8x1xf32> to vector<8x1xf32>
      %40 = vector.broadcast %39 : vector<8x1xf32> to vector<8x64xf32>
      %41 = arith.mulf %40, %37 : vector<8x64xf32>
      %cst_10 = arith.constant dense<0.000000e+00> : vector<64xf32>
      %42 = vector.multi_reduction <add>, %41, %cst_10 [0] : vector<8x64xf32> to vector<64xf32>
      %43 = vector.shape_cast %42 : vector<64xf32> to vector<1x64xf32>
      %44 = vector.extract_strided_slice %26 {offsets = [1, 0, 0], sizes = [1, 8, 64], strides = [1, 1, 1]} : vector<8x8x64xf32> to vector<1x8x64xf32>
      %45 = vector.shape_cast %44 : vector<1x8x64xf32> to vector<8x64xf32>
      %46 = arith.mulf %45, %37 : vector<8x64xf32>
      %47 = vector.extract_strided_slice %31 {offsets = [1, 0, 0], sizes = [1, 8, 64], strides = [1, 1, 1]} : vector<8x8x64xf32> to vector<1x8x64xf32>
      %48 = vector.shape_cast %47 : vector<1x8x64xf32> to vector<8x64xf32>
      %49 = arith.addf %46, %48 : vector<8x64xf32>
      %50 = vector.extract_strided_slice %20 {offsets = [1, 0, 0], sizes = [1, 8, 1], strides = [1, 1, 1]} : vector<8x8x1xf32> to vector<1x8x1xf32>
      %51 = vector.shape_cast %50 : vector<1x8x1xf32> to vector<8x1xf32>
      %52 = vector.broadcast %51 : vector<8x1xf32> to vector<8x64xf32>
      %53 = arith.mulf %52, %49 : vector<8x64xf32>
      %cst_11 = arith.constant dense<0.000000e+00> : vector<64xf32>
      %54 = vector.multi_reduction <add>, %53, %cst_11 [0] : vector<8x64xf32> to vector<64xf32>
      %55 = vector.shape_cast %54 : vector<64xf32> to vector<1x64xf32>
      %56 = vector.extract_strided_slice %26 {offsets = [2, 0, 0], sizes = [1, 8, 64], strides = [1, 1, 1]} : vector<8x8x64xf32> to vector<1x8x64xf32>
      %57 = vector.shape_cast %56 : vector<1x8x64xf32> to vector<8x64xf32>
      %58 = arith.mulf %57, %49 : vector<8x64xf32>
      %59 = vector.extract_strided_slice %31 {offsets = [2, 0, 0], sizes = [1, 8, 64], strides = [1, 1, 1]} : vector<8x8x64xf32> to vector<1x8x64xf32>
      %60 = vector.shape_cast %59 : vector<1x8x64xf32> to vector<8x64xf32>
      %61 = arith.addf %58, %60 : vector<8x64xf32>
      %62 = vector.extract_strided_slice %20 {offsets = [2, 0, 0], sizes = [1, 8, 1], strides = [1, 1, 1]} : vector<8x8x1xf32> to vector<1x8x1xf32>
      %63 = vector.shape_cast %62 : vector<1x8x1xf32> to vector<8x1xf32>
      %64 = vector.broadcast %63 : vector<8x1xf32> to vector<8x64xf32>
      %65 = arith.mulf %64, %61 : vector<8x64xf32>
      %cst_12 = arith.constant dense<0.000000e+00> : vector<64xf32>
      %66 = vector.multi_reduction <add>, %65, %cst_12 [0] : vector<8x64xf32> to vector<64xf32>
      %67 = vector.shape_cast %66 : vector<64xf32> to vector<1x64xf32>
      %68 = vector.extract_strided_slice %26 {offsets = [3, 0, 0], sizes = [1, 8, 64], strides = [1, 1, 1]} : vector<8x8x64xf32> to vector<1x8x64xf32>
      %69 = vector.shape_cast %68 : vector<1x8x64xf32> to vector<8x64xf32>
      %70 = arith.mulf %69, %61 : vector<8x64xf32>
      %71 = vector.extract_strided_slice %31 {offsets = [3, 0, 0], sizes = [1, 8, 64], strides = [1, 1, 1]} : vector<8x8x64xf32> to vector<1x8x64xf32>
      %72 = vector.shape_cast %71 : vector<1x8x64xf32> to vector<8x64xf32>
      %73 = arith.addf %70, %72 : vector<8x64xf32>
      %74 = vector.extract_strided_slice %20 {offsets = [3, 0, 0], sizes = [1, 8, 1], strides = [1, 1, 1]} : vector<8x8x1xf32> to vector<1x8x1xf32>
      %75 = vector.shape_cast %74 : vector<1x8x1xf32> to vector<8x1xf32>
      %76 = vector.broadcast %75 : vector<8x1xf32> to vector<8x64xf32>
      %77 = arith.mulf %76, %73 : vector<8x64xf32>
      %cst_13 = arith.constant dense<0.000000e+00> : vector<64xf32>
      %78 = vector.multi_reduction <add>, %77, %cst_13 [0] : vector<8x64xf32> to vector<64xf32>
      %79 = vector.shape_cast %78 : vector<64xf32> to vector<1x64xf32>
      %80 = vector.extract_strided_slice %26 {offsets = [4, 0, 0], sizes = [1, 8, 64], strides = [1, 1, 1]} : vector<8x8x64xf32> to vector<1x8x64xf32>
      %81 = vector.shape_cast %80 : vector<1x8x64xf32> to vector<8x64xf32>
      %82 = arith.mulf %81, %73 : vector<8x64xf32>
      %83 = vector.extract_strided_slice %31 {offsets = [4, 0, 0], sizes = [1, 8, 64], strides = [1, 1, 1]} : vector<8x8x64xf32> to vector<1x8x64xf32>
      %84 = vector.shape_cast %83 : vector<1x8x64xf32> to vector<8x64xf32>
      %85 = arith.addf %82, %84 : vector<8x64xf32>
      %86 = vector.extract_strided_slice %20 {offsets = [4, 0, 0], sizes = [1, 8, 1], strides = [1, 1, 1]} : vector<8x8x1xf32> to vector<1x8x1xf32>
      %87 = vector.shape_cast %86 : vector<1x8x1xf32> to vector<8x1xf32>
      %88 = vector.broadcast %87 : vector<8x1xf32> to vector<8x64xf32>
      %89 = arith.mulf %88, %85 : vector<8x64xf32>
      %cst_14 = arith.constant dense<0.000000e+00> : vector<64xf32>
      %90 = vector.multi_reduction <add>, %89, %cst_14 [0] : vector<8x64xf32> to vector<64xf32>
      %91 = vector.shape_cast %90 : vector<64xf32> to vector<1x64xf32>
      %92 = vector.extract_strided_slice %26 {offsets = [5, 0, 0], sizes = [1, 8, 64], strides = [1, 1, 1]} : vector<8x8x64xf32> to vector<1x8x64xf32>
      %93 = vector.shape_cast %92 : vector<1x8x64xf32> to vector<8x64xf32>
      %94 = arith.mulf %93, %85 : vector<8x64xf32>
      %95 = vector.extract_strided_slice %31 {offsets = [5, 0, 0], sizes = [1, 8, 64], strides = [1, 1, 1]} : vector<8x8x64xf32> to vector<1x8x64xf32>
      %96 = vector.shape_cast %95 : vector<1x8x64xf32> to vector<8x64xf32>
      %97 = arith.addf %94, %96 : vector<8x64xf32>
      %98 = vector.extract_strided_slice %20 {offsets = [5, 0, 0], sizes = [1, 8, 1], strides = [1, 1, 1]} : vector<8x8x1xf32> to vector<1x8x1xf32>
      %99 = vector.shape_cast %98 : vector<1x8x1xf32> to vector<8x1xf32>
      %100 = vector.broadcast %99 : vector<8x1xf32> to vector<8x64xf32>
      %101 = arith.mulf %100, %97 : vector<8x64xf32>
      %cst_15 = arith.constant dense<0.000000e+00> : vector<64xf32>
      %102 = vector.multi_reduction <add>, %101, %cst_15 [0] : vector<8x64xf32> to vector<64xf32>
      %103 = vector.shape_cast %102 : vector<64xf32> to vector<1x64xf32>
      %104 = vector.extract_strided_slice %26 {offsets = [6, 0, 0], sizes = [1, 8, 64], strides = [1, 1, 1]} : vector<8x8x64xf32> to vector<1x8x64xf32>
      %105 = vector.shape_cast %104 : vector<1x8x64xf32> to vector<8x64xf32>
      %106 = arith.mulf %105, %97 : vector<8x64xf32>
      %107 = vector.extract_strided_slice %31 {offsets = [6, 0, 0], sizes = [1, 8, 64], strides = [1, 1, 1]} : vector<8x8x64xf32> to vector<1x8x64xf32>
      %108 = vector.shape_cast %107 : vector<1x8x64xf32> to vector<8x64xf32>
      %109 = arith.addf %106, %108 : vector<8x64xf32>
      %110 = vector.extract_strided_slice %20 {offsets = [6, 0, 0], sizes = [1, 8, 1], strides = [1, 1, 1]} : vector<8x8x1xf32> to vector<1x8x1xf32>
      %111 = vector.shape_cast %110 : vector<1x8x1xf32> to vector<8x1xf32>
      %112 = vector.broadcast %111 : vector<8x1xf32> to vector<8x64xf32>
      %113 = arith.mulf %112, %109 : vector<8x64xf32>
      %cst_16 = arith.constant dense<0.000000e+00> : vector<64xf32>
      %114 = vector.multi_reduction <add>, %113, %cst_16 [0] : vector<8x64xf32> to vector<64xf32>
      %115 = vector.shape_cast %114 : vector<64xf32> to vector<1x64xf32>
      %116 = vector.extract_strided_slice %26 {offsets = [7, 0, 0], sizes = [1, 8, 64], strides = [1, 1, 1]} : vector<8x8x64xf32> to vector<1x8x64xf32>
      %117 = vector.shape_cast %116 : vector<1x8x64xf32> to vector<8x64xf32>
      %118 = arith.mulf %117, %109 : vector<8x64xf32>
      %119 = vector.extract_strided_slice %31 {offsets = [7, 0, 0], sizes = [1, 8, 64], strides = [1, 1, 1]} : vector<8x8x64xf32> to vector<1x8x64xf32>
      %120 = vector.shape_cast %119 : vector<1x8x64xf32> to vector<8x64xf32>
      %121 = arith.addf %118, %120 : vector<8x64xf32>
      %122 = vector.extract_strided_slice %20 {offsets = [7, 0, 0], sizes = [1, 8, 1], strides = [1, 1, 1]} : vector<8x8x1xf32> to vector<1x8x1xf32>
      %123 = vector.shape_cast %122 : vector<1x8x1xf32> to vector<8x1xf32>
      %124 = vector.broadcast %123 : vector<8x1xf32> to vector<8x64xf32>
      %125 = arith.mulf %124, %121 : vector<8x64xf32>
      %cst_17 = arith.constant dense<0.000000e+00> : vector<64xf32>
      %126 = vector.multi_reduction <add>, %125, %cst_17 [0] : vector<8x64xf32> to vector<64xf32>
      %127 = vector.shape_cast %126 : vector<64xf32> to vector<1x64xf32>
      %128 = tpu.concatenate %43, %55, %67, %79, %91, %103, %115, %127 in 0 : vector<1x64xf32>, vector<1x64xf32>, vector<1x64xf32>, vector<1x64xf32>, vector<1x64xf32>, vector<1x64xf32>, vector<1x64xf32>, vector<1x64xf32> -> vector<8x64xf32>
      %129 = vector.broadcast %1 : vector<1x64xf32> to vector<8x64xf32>
      %130 = arith.mulf %129, %10 : vector<8x64xf32>
      %131 = arith.addf %128, %130 : vector<8x64xf32>
      %132 = arith.truncf %131 : vector<8x64xf32> to vector<8x64xbf16>
      %c0_18 = arith.constant 0 : index
      %133 = arith.index_cast %6 : i32 to index
      %c0_19 = arith.constant 0 : index
      %134 = vector.load %arg7[%c0_18, %133, %c0_19] : memref<1x16x64xbf16, #tpu.memory_space<vmem>>, vector<1x8x64xbf16>
      %135 = vector.shape_cast %134 : vector<1x8x64xbf16> to vector<8x64xbf16>
      %136 = vector.shape_cast %132 : vector<8x64xbf16> to vector<1x8x64xbf16>
      tpu.vector_store %arg7[%c0_18, %133, %c0_19], %136 {strides = array<i32>} : memref<1x16x64xbf16, #tpu.memory_space<vmem>>, vector<1x8x64xbf16>,
      scf.yield %121 : vector<8x64xf32>
    }
    %c2_i32_3 = arith.constant 2 : i32
    return
  }
  func.func @transform_0(%arg0: i32, %arg1: i32) -> (i32, i32, i32) {
    %c0_i32 = arith.constant 0 : i32
    %c0_i32_0 = arith.constant 0 : i32
    return %arg0, %c0_i32, %arg1 : i32, i32, i32
  }
  func.func @transform_1(%arg0: i32, %arg1: i32) -> (i32, i32, i32) {
    %c0_i32 = arith.constant 0 : i32
    %c0_i32_0 = arith.constant 0 : i32
    return %arg0, %c0_i32, %arg1 : i32, i32, i32
  }
  func.func @transform_2(%arg0: i32, %arg1: i32) -> (i32, i32) {
    %c0_i32 = arith.constant 0 : i32
    %c0_i32_0 = arith.constant 0 : i32
    return %c0_i32, %arg1 : i32, i32
  }
  func.func @transform_3(%arg0: i32, %arg1: i32) -> (i32, i32, i32) {
    %c0_i32 = arith.constant 0 : i32
    %c0_i32_0 = arith.constant 0 : i32
    %c0_i32_1 = arith.constant 0 : i32
    return %arg0, %c0_i32, %c0_i32_0 : i32, i32, i32
  }
  func.func @transform_4(%arg0: i32, %arg1: i32) -> (i32, i32) {
    %c0_i32 = arith.constant 0 : i32
    %c0_i32_0 = arith.constant 0 : i32
    return %c0_i32, %arg1 : i32, i32
  }
  func.func @transform_5(%arg0: i32, %arg1: i32) -> (i32, i32, i32) {
    %c0_i32 = arith.constant 0 : i32
    %c0_i32_0 = arith.constant 0 : i32
    return %arg0, %c0_i32, %arg1 : i32, i32, i32
  }
}

module attributes {stable_mosaic.version = 11 : i64} {
  func.func @_matmul_ln_kernel(%arg0: i32, %arg1: memref<32x32xbf16, #tpu.memory_space<vmem>>, %arg2: memref<1x32xf32, #tpu.memory_space<vmem>>, %arg3: memref<1x32xf32, #tpu.memory_space<vmem>>, %arg4: memref<32x32xbf16, #tpu.memory_space<vmem>>, %arg5: memref<1x32xf32, #tpu.memory_space<vmem>>, %arg6: memref<32x32xbf16, #tpu.memory_space<vmem>>) attributes {dimension_semantics = [#tpu.dimension_semantics<parallel>], iteration_bounds = array<i64: 1>, scalar_prefetch = 0 : i64, scratch_operands = 0 : i64, tpu.core_type = #tpu.core_type<tc>, window_params = [{transform_indices = @transform_0, window_bounds = array<i64: 32, 32>}, {pipeline_mode = #tpu.pipeline_mode<synchronous>, transform_indices = @transform_1, window_bounds = array<i64: 1, 32>}, {pipeline_mode = #tpu.pipeline_mode<synchronous>, transform_indices = @transform_2, window_bounds = array<i64: 1, 32>}, {pipeline_mode = #tpu.pipeline_mode<synchronous>, transform_indices = @transform_3, window_bounds = array<i64: 32, 32>}, {pipeline_mode = #tpu.pipeline_mode<synchronous>, transform_indices = @transform_4, window_bounds = array<i64: 1, 32>}, {transform_indices = @transform_5, window_bounds = array<i64: 32, 32>}]} {
    %c0 = arith.constant 0 : index
    %c0_0 = arith.constant 0 : index
    %0 = vector.load %arg1[%c0, %c0_0] : memref<32x32xbf16, #tpu.memory_space<vmem>>, vector<32x32xbf16>
    %1 = arith.extf %0 : vector<32x32xbf16> to vector<32x32xf32>
    %cst = arith.constant dense<0.000000e+00> : vector<32xf32>
    %2 = vector.multi_reduction <add>, %1, %cst [1] : vector<32x32xf32> to vector<32xf32>
    %3 = vector.shape_cast %2 : vector<32xf32> to vector<32x1xf32>
    %cst_1 = arith.constant 3.200000e+01 : f32
    %4 = vector.broadcast %cst_1 : f32 to vector<32x1xf32>
    %5 = arith.divf %3, %4 : vector<32x1xf32>
    %6 = vector.broadcast %5 : vector<32x1xf32> to vector<32x32xf32>
    %7 = arith.subf %1, %6 : vector<32x32xf32>
    %8 = arith.mulf %7, %7 : vector<32x32xf32>
    %cst_2 = arith.constant dense<0.000000e+00> : vector<32xf32>
    %9 = vector.multi_reduction <add>, %8, %cst_2 [1] : vector<32x32xf32> to vector<32xf32>
    %10 = vector.shape_cast %9 : vector<32xf32> to vector<32x1xf32>
    %cst_3 = arith.constant 3.200000e+01 : f32
    %11 = vector.broadcast %cst_3 : f32 to vector<32x1xf32>
    %12 = arith.divf %10, %11 : vector<32x1xf32>
    %cst_4 = arith.constant 9.99999974E-6 : f32
    %13 = vector.broadcast %cst_4 : f32 to vector<32x1xf32>
    %14 = arith.addf %12, %13 : vector<32x1xf32>
    %15 = math.rsqrt %14 : vector<32x1xf32>
    %16 = vector.broadcast %15 : vector<32x1xf32> to vector<32x32xf32>
    %17 = arith.mulf %7, %16 : vector<32x32xf32>
    %c0_5 = arith.constant 0 : index
    %c0_6 = arith.constant 0 : index
    %18 = vector.load %arg2[%c0_5, %c0_6] : memref<1x32xf32, #tpu.memory_space<vmem>>, vector<1x32xf32>
    %19 = vector.broadcast %18 : vector<1x32xf32> to vector<32x32xf32>
    %20 = arith.mulf %17, %19 : vector<32x32xf32>
    %c0_7 = arith.constant 0 : index
    %c0_8 = arith.constant 0 : index
    %21 = vector.load %arg3[%c0_7, %c0_8] : memref<1x32xf32, #tpu.memory_space<vmem>>, vector<1x32xf32>
    %22 = vector.broadcast %21 : vector<1x32xf32> to vector<32x32xf32>
    %23 = arith.addf %20, %22 : vector<32x32xf32>
    %24 = arith.truncf %23 : vector<32x32xf32> to vector<32x32xbf16>
    %c0_9 = arith.constant 0 : index
    %c0_10 = arith.constant 0 : index
    %25 = vector.load %arg4[%c0_9, %c0_10] : memref<32x32xbf16, #tpu.memory_space<vmem>>, vector<32x32xbf16>
    %cst_11 = arith.constant dense<0.000000e+00> : vector<32x32xf32>
    %26 = tpu.matmul %24, %25, %cst_11 {dimension_numbers = #tpu.dot_dimension_numbers<[1], [0], [0], [1], [0, 0, 1, 1], [], []>} : vector<32x32xbf16>, vector<32x32xbf16>, vector<32x32xf32> -> vector<32x32xf32>
    %c0_12 = arith.constant 0 : index
    %c0_13 = arith.constant 0 : index
    %27 = vector.load %arg5[%c0_12, %c0_13] : memref<1x32xf32, #tpu.memory_space<vmem>>, vector<1x32xf32>
    %28 = vector.broadcast %27 : vector<1x32xf32> to vector<32x32xf32>
    %29 = arith.addf %26, %28 : vector<32x32xf32>
    %cst_14 = arith.constant 5.000000e-01 : f32
    %30 = vector.broadcast %cst_14 : f32 to vector<32x32xf32>
    %31 = arith.mulf %30, %29 : vector<32x32xf32>
    %cst_15 = arith.constant 4.471500e-02 : f32
    %32 = vector.broadcast %cst_15 : f32 to vector<32x32xf32>
    %33 = arith.mulf %32, %29 : vector<32x32xf32>
    %34 = arith.mulf %33, %29 : vector<32x32xf32>
    %35 = arith.mulf %34, %29 : vector<32x32xf32>
    %36 = arith.addf %29, %35 : vector<32x32xf32>
    %cst_16 = arith.constant 0.797884583 : f32
    %37 = vector.broadcast %cst_16 : f32 to vector<32x32xf32>
    %38 = arith.mulf %37, %36 : vector<32x32xf32>
    %39 = math.tanh %38 : vector<32x32xf32>
    %cst_17 = arith.constant 1.000000e+00 : f32
    %40 = vector.broadcast %cst_17 : f32 to vector<32x32xf32>
    %41 = arith.addf %40, %39 : vector<32x32xf32>
    %42 = arith.mulf %31, %41 : vector<32x32xf32>
    %43 = arith.truncf %42 : vector<32x32xf32> to vector<32x32xbf16>
    %c0_18 = arith.constant 0 : index
    %c0_19 = arith.constant 0 : index
    %44 = vector.load %arg6[%c0_18, %c0_19] : memref<32x32xbf16, #tpu.memory_space<vmem>>, vector<32x32xbf16>
    tpu.vector_store %arg6[%c0_18, %c0_19], %43 {strides = array<i32>} : memref<32x32xbf16, #tpu.memory_space<vmem>>, vector<32x32xbf16>,
    return
  }
  func.func @transform_0(%arg0: i32) -> (i32, i32) {
    %c0_i32 = arith.constant 0 : i32
    %c0_i32_0 = arith.constant 0 : i32
    return %arg0, %c0_i32 : i32, i32
  }
  func.func @transform_1(%arg0: i32) -> (i32, i32) {
    %c0_i32 = arith.constant 0 : i32
    %c0_i32_0 = arith.constant 0 : i32
    %c0_i32_1 = arith.constant 0 : i32
    return %c0_i32, %c0_i32_0 : i32, i32
  }
  func.func @transform_2(%arg0: i32) -> (i32, i32) {
    %c0_i32 = arith.constant 0 : i32
    %c0_i32_0 = arith.constant 0 : i32
    %c0_i32_1 = arith.constant 0 : i32
    return %c0_i32, %c0_i32_0 : i32, i32
  }
  func.func @transform_3(%arg0: i32) -> (i32, i32) {
    %c0_i32 = arith.constant 0 : i32
    %c0_i32_0 = arith.constant 0 : i32
    %c0_i32_1 = arith.constant 0 : i32
    return %c0_i32, %c0_i32_0 : i32, i32
  }
  func.func @transform_4(%arg0: i32) -> (i32, i32) {
    %c0_i32 = arith.constant 0 : i32
    %c0_i32_0 = arith.constant 0 : i32
    %c0_i32_1 = arith.constant 0 : i32
    return %c0_i32, %c0_i32_0 : i32, i32
  }
  func.func @transform_5(%arg0: i32) -> (i32, i32) {
    %c0_i32 = arith.constant 0 : i32
    %c0_i32_0 = arith.constant 0 : i32
    return %arg0, %c0_i32 : i32, i32
  }
}

module attributes {stable_mosaic.version = 11 : i64} {
  func.func @_matmul_kernel(%arg0: i32, %arg1: memref<32x32xbf16, #tpu.memory_space<vmem>>, %arg2: memref<32x16xbf16, #tpu.memory_space<vmem>>, %arg3: memref<1x16xf32, #tpu.memory_space<vmem>>, %arg4: memref<32x16xbf16, #tpu.memory_space<vmem>>) attributes {dimension_semantics = [#tpu.dimension_semantics<parallel>], iteration_bounds = array<i64: 1>, scalar_prefetch = 0 : i64, scratch_operands = 0 : i64, tpu.core_type = #tpu.core_type<tc>, window_params = [{transform_indices = @transform_0, window_bounds = array<i64: 32, 32>}, {pipeline_mode = #tpu.pipeline_mode<synchronous>, transform_indices = @transform_1, window_bounds = array<i64: 32, 16>}, {pipeline_mode = #tpu.pipeline_mode<synchronous>, transform_indices = @transform_2, window_bounds = array<i64: 1, 16>}, {transform_indices = @transform_3, window_bounds = array<i64: 32, 16>}]} {
    %c0 = arith.constant 0 : index
    %c0_0 = arith.constant 0 : index
    %0 = vector.load %arg1[%c0, %c0_0] : memref<32x32xbf16, #tpu.memory_space<vmem>>, vector<32x32xbf16>
    %c0_1 = arith.constant 0 : index
    %c0_2 = arith.constant 0 : index
    %1 = vector.load %arg2[%c0_1, %c0_2] : memref<32x16xbf16, #tpu.memory_space<vmem>>, vector<32x16xbf16>
    %cst = arith.constant dense<0.000000e+00> : vector<32x16xf32>
    %2 = tpu.matmul %0, %1, %cst {dimension_numbers = #tpu.dot_dimension_numbers<[1], [0], [0], [1], [0, 0, 1, 1], [], []>} : vector<32x32xbf16>, vector<32x16xbf16>, vector<32x16xf32> -> vector<32x16xf32>
    %c0_3 = arith.constant 0 : index
    %c0_4 = arith.constant 0 : index
    %3 = vector.load %arg3[%c0_3, %c0_4] : memref<1x16xf32, #tpu.memory_space<vmem>>, vector<1x16xf32>
    %4 = vector.broadcast %3 : vector<1x16xf32> to vector<32x16xf32>
    %5 = arith.addf %2, %4 : vector<32x16xf32>
    %cst_5 = arith.constant 5.000000e-01 : f32
    %6 = vector.broadcast %cst_5 : f32 to vector<32x16xf32>
    %7 = arith.mulf %6, %5 : vector<32x16xf32>
    %cst_6 = arith.constant 4.471500e-02 : f32
    %8 = vector.broadcast %cst_6 : f32 to vector<32x16xf32>
    %9 = arith.mulf %8, %5 : vector<32x16xf32>
    %10 = arith.mulf %9, %5 : vector<32x16xf32>
    %11 = arith.mulf %10, %5 : vector<32x16xf32>
    %12 = arith.addf %5, %11 : vector<32x16xf32>
    %cst_7 = arith.constant 0.797884583 : f32
    %13 = vector.broadcast %cst_7 : f32 to vector<32x16xf32>
    %14 = arith.mulf %13, %12 : vector<32x16xf32>
    %15 = math.tanh %14 : vector<32x16xf32>
    %cst_8 = arith.constant 1.000000e+00 : f32
    %16 = vector.broadcast %cst_8 : f32 to vector<32x16xf32>
    %17 = arith.addf %16, %15 : vector<32x16xf32>
    %18 = arith.mulf %7, %17 : vector<32x16xf32>
    %19 = arith.truncf %18 : vector<32x16xf32> to vector<32x16xbf16>
    %c0_9 = arith.constant 0 : index
    %c0_10 = arith.constant 0 : index
    %20 = vector.load %arg4[%c0_9, %c0_10] : memref<32x16xbf16, #tpu.memory_space<vmem>>, vector<32x16xbf16>
    tpu.vector_store %arg4[%c0_9, %c0_10], %19 {strides = array<i32>} : memref<32x16xbf16, #tpu.memory_space<vmem>>, vector<32x16xbf16>,
    return
  }
  func.func @transform_0(%arg0: i32) -> (i32, i32) {
    %c0_i32 = arith.constant 0 : i32
    %c0_i32_0 = arith.constant 0 : i32
    return %arg0, %c0_i32 : i32, i32
  }
  func.func @transform_1(%arg0: i32) -> (i32, i32) {
    %c0_i32 = arith.constant 0 : i32
    %c0_i32_0 = arith.constant 0 : i32
    %c0_i32_1 = arith.constant 0 : i32
    return %c0_i32, %c0_i32_0 : i32, i32
  }
  func.func @transform_2(%arg0: i32) -> (i32, i32) {
    %c0_i32 = arith.constant 0 : i32
    %c0_i32_0 = arith.constant 0 : i32
    %c0_i32_1 = arith.constant 0 : i32
    return %c0_i32, %c0_i32_0 : i32, i32
  }
  func.func @transform_3(%arg0: i32) -> (i32, i32) {
    %c0_i32 = arith.constant 0 : i32
    %c0_i32_0 = arith.constant 0 : i32
    return %arg0, %c0_i32 : i32, i32
  }
}

module attributes {stable_mosaic.version = 11 : i64} {
  func.func @_matmul_kernel(%arg0: i32, %arg1: memref<32x16xbf16, #tpu.memory_space<vmem>>, %arg2: memref<16x8xbf16, #tpu.memory_space<vmem>>, %arg3: memref<1x8xf32, #tpu.memory_space<vmem>>, %arg4: memref<32x8xbf16, #tpu.memory_space<vmem>>) attributes {dimension_semantics = [#tpu.dimension_semantics<parallel>], iteration_bounds = array<i64: 1>, scalar_prefetch = 0 : i64, scratch_operands = 0 : i64, tpu.core_type = #tpu.core_type<tc>, window_params = [{transform_indices = @transform_0, window_bounds = array<i64: 32, 16>}, {pipeline_mode = #tpu.pipeline_mode<synchronous>, transform_indices = @transform_1, window_bounds = array<i64: 16, 8>}, {pipeline_mode = #tpu.pipeline_mode<synchronous>, transform_indices = @transform_2, window_bounds = array<i64: 1, 8>}, {transform_indices = @transform_3, window_bounds = array<i64: 32, 8>}]} {
    %c0 = arith.constant 0 : index
    %c0_0 = arith.constant 0 : index
    %0 = vector.load %arg1[%c0, %c0_0] : memref<32x16xbf16, #tpu.memory_space<vmem>>, vector<32x16xbf16>
    %c0_1 = arith.constant 0 : index
    %c0_2 = arith.constant 0 : index
    %1 = vector.load %arg2[%c0_1, %c0_2] : memref<16x8xbf16, #tpu.memory_space<vmem>>, vector<16x8xbf16>
    %cst = arith.constant dense<0.000000e+00> : vector<32x8xf32>
    %2 = tpu.matmul %0, %1, %cst {dimension_numbers = #tpu.dot_dimension_numbers<[1], [0], [0], [1], [0, 0, 1, 1], [], []>} : vector<32x16xbf16>, vector<16x8xbf16>, vector<32x8xf32> -> vector<32x8xf32>
    %c0_3 = arith.constant 0 : index
    %c0_4 = arith.constant 0 : index
    %3 = vector.load %arg3[%c0_3, %c0_4] : memref<1x8xf32, #tpu.memory_space<vmem>>, vector<1x8xf32>
    %4 = vector.broadcast %3 : vector<1x8xf32> to vector<32x8xf32>
    %5 = arith.addf %2, %4 : vector<32x8xf32>
    %cst_5 = arith.constant 5.000000e-01 : f32
    %6 = vector.broadcast %cst_5 : f32 to vector<32x8xf32>
    %7 = arith.mulf %6, %5 : vector<32x8xf32>
    %cst_6 = arith.constant 4.471500e-02 : f32
    %8 = vector.broadcast %cst_6 : f32 to vector<32x8xf32>
    %9 = arith.mulf %8, %5 : vector<32x8xf32>
    %10 = arith.mulf %9, %5 : vector<32x8xf32>
    %11 = arith.mulf %10, %5 : vector<32x8xf32>
    %12 = arith.addf %5, %11 : vector<32x8xf32>
    %cst_7 = arith.constant 0.797884583 : f32
    %13 = vector.broadcast %cst_7 : f32 to vector<32x8xf32>
    %14 = arith.mulf %13, %12 : vector<32x8xf32>
    %15 = math.tanh %14 : vector<32x8xf32>
    %cst_8 = arith.constant 1.000000e+00 : f32
    %16 = vector.broadcast %cst_8 : f32 to vector<32x8xf32>
    %17 = arith.addf %16, %15 : vector<32x8xf32>
    %18 = arith.mulf %7, %17 : vector<32x8xf32>
    %19 = arith.truncf %18 : vector<32x8xf32> to vector<32x8xbf16>
    %c0_9 = arith.constant 0 : index
    %c0_10 = arith.constant 0 : index
    %20 = vector.load %arg4[%c0_9, %c0_10] : memref<32x8xbf16, #tpu.memory_space<vmem>>, vector<32x8xbf16>
    tpu.vector_store %arg4[%c0_9, %c0_10], %19 {strides = array<i32>} : memref<32x8xbf16, #tpu.memory_space<vmem>>, vector<32x8xbf16>,
    return
  }
  func.func @transform_0(%arg0: i32) -> (i32, i32) {
    %c0_i32 = arith.constant 0 : i32
    %c0_i32_0 = arith.constant 0 : i32
    return %arg0, %c0_i32 : i32, i32
  }
  func.func @transform_1(%arg0: i32) -> (i32, i32) {
    %c0_i32 = arith.constant 0 : i32
    %c0_i32_0 = arith.constant 0 : i32
    %c0_i32_1 = arith.constant 0 : i32
    return %c0_i32, %c0_i32_0 : i32, i32
  }
  func.func @transform_2(%arg0: i32) -> (i32, i32) {
    %c0_i32 = arith.constant 0 : i32
    %c0_i32_0 = arith.constant 0 : i32
    %c0_i32_1 = arith.constant 0 : i32
    return %c0_i32, %c0_i32_0 : i32, i32
  }
  func.func @transform_3(%arg0: i32) -> (i32, i32) {
    %c0_i32 = arith.constant 0 : i32
    %c0_i32_0 = arith.constant 0 : i32
    return %arg0, %c0_i32 : i32, i32
  }
}

module attributes {stable_mosaic.version = 11 : i64} {
  func.func @_layernorm_kernel(%arg0: i32, %arg1: memref<32x32xf32, #tpu.memory_space<vmem>>, %arg2: memref<1x32xf32, #tpu.memory_space<vmem>>, %arg3: memref<1x32xf32, #tpu.memory_space<vmem>>, %arg4: memref<32x32xf32, #tpu.memory_space<vmem>>) attributes {dimension_semantics = [#tpu.dimension_semantics<parallel>], iteration_bounds = array<i64: 1>, scalar_prefetch = 0 : i64, scratch_operands = 0 : i64, tpu.core_type = #tpu.core_type<tc>, window_params = [{transform_indices = @transform_0, window_bounds = array<i64: 32, 32>}, {pipeline_mode = #tpu.pipeline_mode<synchronous>, transform_indices = @transform_1, window_bounds = array<i64: 1, 32>}, {pipeline_mode = #tpu.pipeline_mode<synchronous>, transform_indices = @transform_2, window_bounds = array<i64: 1, 32>}, {transform_indices = @transform_3, window_bounds = array<i64: 32, 32>}]} {
    %c0 = arith.constant 0 : index
    %c0_0 = arith.constant 0 : index
    %0 = vector.load %arg1[%c0, %c0_0] : memref<32x32xf32, #tpu.memory_space<vmem>>, vector<32x32xf32>
    %cst = arith.constant dense<0.000000e+00> : vector<32xf32>
    %1 = vector.multi_reduction <add>, %0, %cst [1] : vector<32x32xf32> to vector<32xf32>
    %2 = vector.shape_cast %1 : vector<32xf32> to vector<32x1xf32>
    %cst_1 = arith.constant 3.200000e+01 : f32
    %3 = vector.broadcast %cst_1 : f32 to vector<32x1xf32>
    %4 = arith.divf %2, %3 : vector<32x1xf32>
    %5 = vector.broadcast %4 : vector<32x1xf32> to vector<32x32xf32>
    %6 = arith.subf %0, %5 : vector<32x32xf32>
    %7 = arith.mulf %6, %6 : vector<32x32xf32>
    %cst_2 = arith.constant dense<0.000000e+00> : vector<32xf32>
    %8 = vector.multi_reduction <add>, %7, %cst_2 [1] : vector<32x32xf32> to vector<32xf32>
    %9 = vector.shape_cast %8 : vector<32xf32> to vector<32x1xf32>
    %cst_3 = arith.constant 3.200000e+01 : f32
    %10 = vector.broadcast %cst_3 : f32 to vector<32x1xf32>
    %11 = arith.divf %9, %10 : vector<32x1xf32>
    %cst_4 = arith.constant 9.99999974E-6 : f32
    %12 = vector.broadcast %cst_4 : f32 to vector<32x1xf32>
    %13 = arith.addf %11, %12 : vector<32x1xf32>
    %14 = math.rsqrt %13 : vector<32x1xf32>
    %15 = vector.broadcast %14 : vector<32x1xf32> to vector<32x32xf32>
    %16 = arith.mulf %6, %15 : vector<32x32xf32>
    %c0_5 = arith.constant 0 : index
    %c0_6 = arith.constant 0 : index
    %17 = vector.load %arg2[%c0_5, %c0_6] : memref<1x32xf32, #tpu.memory_space<vmem>>, vector<1x32xf32>
    %18 = vector.broadcast %17 : vector<1x32xf32> to vector<32x32xf32>
    %19 = arith.mulf %16, %18 : vector<32x32xf32>
    %c0_7 = arith.constant 0 : index
    %c0_8 = arith.constant 0 : index
    %20 = vector.load %arg3[%c0_7, %c0_8] : memref<1x32xf32, #tpu.memory_space<vmem>>, vector<1x32xf32>
    %21 = vector.broadcast %20 : vector<1x32xf32> to vector<32x32xf32>
    %22 = arith.addf %19, %21 : vector<32x32xf32>
    %c0_9 = arith.constant 0 : index
    %c0_10 = arith.constant 0 : index
    %23 = vector.load %arg4[%c0_9, %c0_10] : memref<32x32xf32, #tpu.memory_space<vmem>>, vector<32x32xf32>
    tpu.vector_store %arg4[%c0_9, %c0_10], %22 {strides = array<i32>} : memref<32x32xf32, #tpu.memory_space<vmem>>, vector<32x32xf32>,
    return
  }
  func.func @transform_0(%arg0: i32) -> (i32, i32) {
    %c0_i32 = arith.constant 0 : i32
    %c0_i32_0 = arith.constant 0 : i32
    return %arg0, %c0_i32 : i32, i32
  }
  func.func @transform_1(%arg0: i32) -> (i32, i32) {
    %c0_i32 = arith.constant 0 : i32
    %c0_i32_0 = arith.constant 0 : i32
    %c0_i32_1 = arith.constant 0 : i32
    return %c0_i32, %c0_i32_0 : i32, i32
  }
  func.func @transform_2(%arg0: i32) -> (i32, i32) {
    %c0_i32 = arith.constant 0 : i32
    %c0_i32_0 = arith.constant 0 : i32
    %c0_i32_1 = arith.constant 0 : i32
    return %c0_i32, %c0_i32_0 : i32, i32
  }
  func.func @transform_3(%arg0: i32) -> (i32, i32) {
    %c0_i32 = arith.constant 0 : i32
    %c0_i32_0 = arith.constant 0 : i32
    return %arg0, %c0_i32 : i32, i32
  }
}

</mosaic_0001>

<bundles_post_ra>
// kernel: _lambda_.15
= control target key start
LH: loop header
LB: loop body
LE: loop exit
PB: predicated region body
PF: predicated region fallthrough
CT: control target
= control target key end

     0   :  { %vm57_vm0 = vcmask 392192   ;;  %vm87_vm1 = vcmask 257024   ;;  %s177_s1 = inlined_call_operand.vmem [shape: bf16[48,32], index: 1, kind: input, shape index: {}]   ;;  %s178_s2 = inlined_call_operand.vmem [shape: f32[1,32], index: 2, kind: input, shape index: {}]   ;;  %s179_s0 = inlined_call_operand.vmem [shape: bf16[32,48], index: 0, kind: input, shape index: {}]   ;;  %s180_s3 = inlined_call_operand.vmem [shape: bf16[32,32], index: 3, kind: output, shape index: {}]  }
   0x1   :  { %v122_v0 = vld [vmem:[%s177_s1 + $0x10] sm:$0xff]  ;;  %v121_v1 = vld [vmem:[%s177_s1 + $0x8] sm:$0xff]  ;;  %v120_v2 = vld [vmem:[%s177_s1] sm:$0xff] }
   0x2   :  { %69 = vmatpush.bf16.msra.mxu0 %v122_v0  ;;  %123 = vmatpush.bf16.msra.mxu1 %v122_v0  ;;  %v118_v3 = vld [vmem:[%s179_s0] sm:$0xff]  ;;  %v119_v4 = vld [vmem:[%s179_s0 + $0x8] sm:$0xff] }
   0x3   :  { %v126_v5 = vld [vmem:[%s178_s2] ss:$0 sm:$0xff] }
   0x6   :  { %70 = vmatpush.bf16.msra.mxu0 %v121_v1  ;;  %124 = vmatpush.bf16.msra.mxu1 %v121_v1 }
   0xa   :  { %71 = vmatpush.bf16.msra.mxu0 %v120_v2  ;;  %125 = vmatpush.bf16.msra.mxu1 %v120_v2 }
   0xd   :  { %116 = vmatmul.msk.bf16.vlgmr.msra.gmra.mxu0 %vm57_vm0, %v118_v3  ;;  %117 = vmatmul.msk.bf16.vlgmr.msra.gmra.mxu1 %vm57_vm0, %v119_v4 }
  0x8a   :  { %v73_v6 = vpop.f32.mrf.mxu0  ;;  %v78_v7 = vpop.f32.mrf.mxu1 }
  0x8b   :  { %v74_v8 = vadd.f32 %v126_v5, %v73_v6  ;;  %v79_v9 = vadd.f32 %v126_v5, %v78_v7 }
  0x8d   :  { %v83_v10 = vpack.c.bf16 %v74_v8, %v74_v8  ;;  %v85_v11 = vpack.c.bf16 %v79_v9, %v79_v9 }
  0x8f   :  { %88 = vst.msk [vmem:[%s180_s3] sm:$0xf] %vm87_vm1, %v83_v10 }
  0x90   :  { %90 = vst.msk [vmem:[%s180_s3 + $0x8] sm:$0xf] %vm87_vm1, %v85_v11 }
  0x92   :  { %v75_v12 = vpop.f32.mrf.mxu0  ;;  %v80_v13 = vpop.f32.mrf.mxu1 }
  0x93   :  { %v76_v14 = vadd.f32 %v126_v5, %v75_v12  ;;  %v81_v15 = vadd.f32 %v126_v5, %v80_v13 }
  0x95   :  { %v84_v16 = vpack.c.bf16 %v76_v14, %v76_v14  ;;  %v86_v17 = vpack.c.bf16 %v81_v15, %v81_v15 }
  0x97   :  { %89 = vst.msk [vmem:[%s180_s3 + $0x4] sm:$0xf] %vm87_vm1, %v84_v16 }
  0x98   :  { %91 = vst.msk [vmem:[%s180_s3 + $0xc] sm:$0xf] %vm87_vm1, %v86_v17 }

// kernel: _lambda_.17
= control target key start
LH: loop header
LB: loop body
LE: loop exit
PB: predicated region body
PF: predicated region fallthrough
CT: control target
= control target key end

     0   :  { %s536_s12 = smov 0   ;;  %s538_s13 = smov 0   ;;  %s585_s0 = inlined_call_operand.vmem [shape: bf16[2,32,64], index: 0, kind: input, shape index: {}]   ;;  %s586_s1 = inlined_call_operand.vmem [shape: f32[4,64], index: 1, kind: input, shape index: {}]   ;;  %s587_s2 = inlined_call_operand.vmem [shape: f32[1,64], index: 2, kind: input, shape index: {}]   ;;  %s588_s3 = inlined_call_operand.vmem [shape: bf16[2,16,64], index: 3, kind: output, shape index: {}]  }
   0x1   :  { %s540_s14 = smov 0  }
   0x2 LB: > { %s25_s15 = sadd.s32 1, %s510_s13  ;;  %p446_p0 = scmp.ge.s32.totalorder %s514_s14, 1  ;;  %s514_s14 = sphi %s540_s14, %s13_s14   ;;  %s510_s13 = sphi %s538_s13, %s590_s13   ;;  %s506_s12 = sphi %s536_s12, %s589_s12  }
   0x3   : > { %p27_p1 = scmp.ge.s32.totalorder %s25_s15, 2  ;;  %p173_p2 = scmp.lt.s32.totalorder %s514_s14, 3 }
   0x5   : > { %s592_s15 = smov (%p27_p1, %s25_s15), 0  ;;  %p174_p3 = pnand %p446_p0, %p173_p2 }
   0x6   : > { %p210_p4 = scmp.lt.s32.totalorder (!%p174_p3), %s506_s12, 1 }
   0x7   : > { %177 = sbr.rel (%p174_p3) target bundleno = 67 (0x43), region = 32 }
   0xc   : > { %v246_v0 = vlaneseq  ;;  %s594_s12 = smov (!%p210_p4, %s506_s12), 1  ;;  %v239_v1 = vld [vmem:[%s586_s1] sm:$0xf]  ;;  %vm326_vm11 = vcmask 519168  }
   0xd   : > { %s453_s18 = sshll.u32 %s594_s12, 4  ;;  %v240_v3 = vperm.slane %v239_v1, 0  ;;  %v251_v6 = vperm.slane %v239_v1, 1  ;;  %v262_v10 = vperm.slane %v239_v1, 2  ;;  %v273_v11 = vperm.slane %v239_v1, 3  ;;  %s454_s24 = sshll.u32 %s594_s12, 3 }
   0xe   : > { %v247_v2 = vshrl.u32 %v246_v0, 7  ;;  %s217_s21 = scalar_lea.vmem %s585_s0, %s453_s18  ;;  %v483_v38 = vld [vmem:[%s587_s2] ss:$0 sm:$0xff]  ;;  %s232_s27 = scalar_lea.vmem %s588_s3, %s454_s24 }
   0xf   : > { %v456_v4 = vld [vmem:[%s217_s21] sm:$0xff]   ;;  %v235_v5 = vld [vmem:[%s217_s21 + $0x8] sm:$0xf] }
  0x10   : > { %v457_v7 = vunpack.c.l.bf16 %v456_v4  ;;  %v458_v8 = vunpack.c.h.bf16 %v456_v4  ;;  %v238_v9 = vunpack.c.l.bf16 %v235_v5  ;;  %vm248_vm0 = vcmp.lt.s32.totalorder %v247_v2, 7 }
  0x11   : > { %vm259_vm1 = vcmp.lt.s32.totalorder %v247_v2, 6  ;;  %vm270_vm2 = vcmp.lt.s32.totalorder %v247_v2, 5 }
  0x12   : > { %v241_v12 = vmul.f32 %v457_v7, %v240_v3  ;;  %v243_v13 = vrot.slane %v457_v7, 1  ;;  %v244_v14 = vrot.slane %v458_v8, 1  ;;  %v245_v15 = vrot.slane %v238_v9, 1 }
  0x13   : > { %v256_v16 = vrot.slane %v457_v7, 2  ;;  %v257_v17 = vrot.slane %v458_v8, 2  ;;  %v258_v18 = vrot.slane %v238_v9, 2  ;;  %v267_v19 = vrot.slane %v457_v7, 3 }
  0x14   : > { %v250_v20 = vsel %vm248_vm0, %v243_v13, %v244_v14  ;;  %v268_v21 = vrot.slane %v458_v8, 3  ;;  %v269_v22 = vrot.slane %v238_v9, 3  ;;  %v242_v23 = vmul.f32 %v458_v8, %v240_v3 }
  0x15   : > { %v252_v24 = vmul.f32 %v251_v6, %v250_v20  ;;  %v261_v25 = vsel %vm259_vm1, %v256_v16, %v257_v17  ;;  %v249_v26 = vsel %vm248_vm0, %v244_v14, %v245_v15  ;;  %v260_v27 = vsel %vm259_vm1, %v257_v17, %v258_v18 }
  0x16   : > { %v263_v28 = vmul.f32 %v262_v10, %v261_v25  ;;  %v272_v29 = vsel %vm270_vm2, %v267_v19, %v268_v21  ;;  %v253_v30 = vmul.f32 %v251_v6, %v249_v26  ;;  %v264_v31 = vmul.f32 %v262_v10, %v260_v27 }
  0x17   : > { %v254_v32 = vadd.f32 %v252_v24, %v241_v12  ;;  %v274_v33 = vmul.f32 %v273_v11, %v272_v29  ;;  %v271_v34 = vsel %vm270_vm2, %v268_v21, %v269_v22 }
  0x18   : > { %v255_v35 = vadd.f32 %v253_v30, %v242_v23  ;;  %v275_v36 = vmul.f32 %v273_v11, %v271_v34 }
  0x19   : > { %v265_v37 = vadd.f32 %v263_v28, %v254_v32 }
  0x1a   : > { %v266_v39 = vadd.f32 %v264_v31, %v255_v35 }
  0x1b   : > { %v276_v40 = vadd.f32 %v274_v33, %v265_v37 }
  0x1c   : > { %v277_v41 = vadd.f32 %v275_v36, %v266_v39 }
  0x1d   : > { %v282_v42 = vadd.f32 %v483_v38, %v276_v40 }
  0x1e   : > { %v283_v43 = vadd.f32 %v483_v38, %v277_v41 }
  0x1f   : > { %v284_v44 = vsub.f32 0.0, %v282_v42 }
  0x20   : > { %v285_v45 = vsub.f32 0.0, %v283_v43 }
  0x21   : > { %v286_v46 = vmul.f32 1.442695, %v284_v44 }
  0x22   : > { %v288_v47 = vmul.f32 1.442695, %v285_v45 }
  0x23   : > { %484 = vpow2.f32 %v286_v46 }
  0x24   : > { %486 = vpow2.f32 %v288_v47 }
  0x29   : > { %v485_v48 = vpop.eup %484 }
  0x2a   : > { %v487_v49 = vpop.eup %486  ;;  %v290_v50 = vadd.f32 1.0, %v485_v48 }
  0x2b   : > { %v291_v51 = vadd.f32 1.0, %v487_v49 }
  0x2c   : > { %488 = vrcp.f32 %v290_v50  ;;  %vm297_vm3 = vweird.f32 %v290_v50  ;;  %v303_v55 = vand.u32 2147483648, %v290_v50  ;;  %v301_v58 = vand.u32 2147483647, %v290_v50 }
  0x2d   : > { %490 = vrcp.f32 %v291_v51  ;;  %v318_v59 = vand.u32 2147483648, %v291_v51  ;;  %vm312_vm5 = vweird.f32 %v291_v51  ;;  %v316_v61 = vand.u32 2147483647, %v291_v51 }
  0x2e   : > { %v304_v63 = vor.u32 1.1754944e-38, %v303_v55  ;;  %vm302_vm8 = vcmp.eq.f32.partialorder %v301_v58, 8.507059e+37 }
  0x2f   : > { %v319_v2 = vor.u32 1.1754944e-38, %v318_v59  ;;  %vm317_vm10 = vcmp.eq.f32.partialorder %v316_v61, 8.507059e+37 }
  0x32   : > { %v489_v52 = vpop.eup %488 }
  0x33   : > { %v491_v53 = vpop.eup %490  ;;  %v293_v54 = vmul.f32 %v489_v52, %v290_v50  ;;  %vm298_vm4 = vweird.f32 %v489_v52 }
  0x34   : > { %v308_v56 = vmul.f32 %v491_v53, %v291_v51  ;;  %vm313_vm6 = vweird.f32 %v491_v53  ;;  %vm299_vm7 = vmor %vm297_vm3, %vm298_vm4 }
  0x35   : > { %v294_v57 = vsub.f32 1.0, %v293_v54  ;;  %vm314_vm9 = vmor %vm312_vm5, %vm313_vm6 }
  0x36   : > { %v309_v60 = vsub.f32 1.0, %v308_v56 }
  0x37   : > { %v295_v62 = vmul.f32 %v489_v52, %v294_v57 }
  0x38   : > { %v310_v0 = vmul.f32 %v491_v53, %v309_v60 }
  0x39   : > { %v296_v1 = vadd.f32 %v489_v52, %v295_v62 }
  0x3a   : > { %v311_v3 = vadd.f32 %v491_v53, %v310_v0 }
  0x3b   : > { %v300_v4 = vsel %vm299_vm7, %v489_v52, %v296_v1 }
  0x3c   : > { %v305_v5 = vsel %vm302_vm8, %v304_v63, %v300_v4  ;;  %v315_v6 = vsel %vm314_vm9, %v491_v53, %v311_v3 }
  0x3d   : > { %v322_v7 = vmul.f32 %v305_v5, %v282_v42  ;;  %v320_v8 = vsel %vm317_vm10, %v319_v2, %v315_v6 }
  0x3e   : > { %v323_v9 = vmul.f32 %v320_v8, %v283_v43 }
  0x3f   : > { %v324_v10 = vpack.c.bf16 %v322_v7, %v322_v7 }
  0x40   : > { %v325_v11 = vpack.c.bf16 %v323_v9, %v323_v9 }
  0x41   : > { %327 = vst.msk [vmem:[%s232_s27] sm:$0xf] %vm326_vm11, %v324_v10 }
  0x42   : > { %328 = vst.msk [vmem:[%s232_s27 + $0x4] sm:$0xf] %vm326_vm11, %v325_v11 }
  0x43 PF: > { %s13_s14 = sadd.s32 1, %s514_s14   ;;  %s589_s12 = smov %s510_s13 }
  0x44   : > { %p10_p5 = scmp.ge.s32.totalorder %s13_s14, 4   ;;  %s590_s13 = smov %s592_s15 }
  0x46   :  { %12 = sbr.rel (!%p10_p5) target bundleno = 2 (0x2), region = 68 }

// kernel: _lambda_.16
= control target key start
LH: loop header
LB: loop body
LE: loop exit
PB: predicated region body
PF: predicated region fallthrough
CT: control target
= control target key end

     0   :  { %vm34_vm0 = vcmask 261120   ;;  %v331_v10 = vmov 32.0   ;;  %v332_v53 = vmov 0   ;;  %vm256_vm14 = vcmask 519168   ;;  %s473_s0 = inlined_call_operand.vmem [shape: bf16[32,32], index: 0, kind: input, shape index: {}]   ;;  %s474_s4 = inlined_call_operand.vmem [shape: f32[1,32], index: 4, kind: input, shape index: {}]   ;;  %s475_s5 = inlined_call_operand.vmem [shape: f32[1,32], index: 5, kind: input, shape index: {}]   ;;  %s476_s1 = inlined_call_operand.vmem [shape: bf16[32,64], index: 1, kind: input, shape index: {}]   ;;  %s477_s2 = inlined_call_operand.vmem [shape: bf16[32,64], index: 2, kind: input, shape index: {}]   ;;  %s478_s3 = inlined_call_operand.vmem [shape: f32[32,1], index: 3, kind: input, shape index: {}]   ;;  %s479_s7 = inlined_call_operand.vmem [shape: bf16[32,64], index: 7, kind: output, shape index: {1}]   ;;  %s480_s6 = inlined_call_operand.vmem [shape: bf16[32,64], index: 6, kind: output, shape index: {0}]  }
   0x1   :  { %v309_v0 = vld [vmem:[%s473_s0 + $0x8] sm:$0xff]   ;;  %v302_v1 = vld [vmem:[%s473_s0] sm:$0xff]   ;;  %321 = vrcp.f32 %v331_v10  ;;  %v150_v49 = vld [vmem:[%s478_s3 + $0x10] sm:$0xff]  ;;  %318 = vset.pattern.permute.xlu1 %v332_v53  ;;  %317 = vset.pattern.permute.xlu0 %v332_v53 }
   0x2   :  { %v307_v2 = vunpack.c.l.bf16 %v309_v0  ;;  %v303_v3 = vunpack.c.l.bf16 %v302_v1  ;;  %v308_v6 = vunpack.c.h.bf16 %v309_v0  ;;  %v304_v7 = vunpack.c.h.bf16 %v302_v1  ;;  %v298_v37 = vld [vmem:[%s476_s1 + $0x8] sm:$0xff]  ;;  %v297_v43 = vld [vmem:[%s476_s1] sm:$0xff]  ;;  %316 = vset.pattern.permute.xlu2 %v332_v53  ;;  %v151_v1 = vld [vmem:[%s478_s3 + $0x18] sm:$0xff] }
   0x3   :  { %v300_v38 = vld [vmem:[%s477_s2 + $0x8] sm:$0xff]  ;;  %180 = vmatpush.bf16.msra.mxu0 %v298_v37  ;;  %310 = vmatpush.bf16.msra.mxu2 %v298_v37  ;;  %v299_v44 = vld [vmem:[%s477_s2] sm:$0xff] }
   0x4   :  { %v41_v4 = vsel %vm34_vm0, %v307_v2, 0.0  ;;  %v35_v5 = vsel %vm34_vm0, %v303_v3, 0.0  ;;  %v44_v8 = vsel %vm34_vm0, %v308_v6, 0.0  ;;  %v38_v9 = vsel %vm34_vm0, %v304_v7, 0.0  ;;  %239 = vmatpush.bf16.msra.mxu1 %v300_v38  ;;  %312 = vmatpush.bf16.msra.mxu3 %v300_v38  ;;  %v149_v50 = vld [vmem:[%s478_s3 + $0x8] sm:$0xff]  ;;  %v148_v54 = vld [vmem:[%s478_s3] sm:$0xff] }
   0x5   :  { %42 = vadd.xlane.f32.xlu0 %v41_v4  ;;  %36 = vadd.xlane.f32.xlu1 %v35_v5 }
   0x7   :  { %v322_v11 = vpop.eup %321  ;;  %181 = vmatpush.bf16.msra.mxu0 %v297_v43  ;;  %311 = vmatpush.bf16.msra.mxu2 %v297_v43 }
   0x8   :  { %v48_v12 = vmul.f32 32.0, %v322_v11  ;;  %vm52_vm1 = vweird.f32 %v322_v11  ;;  %240 = vmatpush.bf16.msra.mxu1 %v299_v44  ;;  %313 = vmatpush.bf16.msra.mxu3 %v299_v44 }
   0xa   :  { %v49_v13 = vsub.f32 1.0, %v48_v12 }
   0xc   :  { %v50_v14 = vmul.f32 %v322_v11, %v49_v13 }
   0xd   :  { %45 = vadd.xlane.f32.xlu0 %v44_v8  ;;  %39 = vadd.xlane.f32.xlu1 %v38_v9 }
   0xe   :  { %v51_v15 = vadd.f32 %v322_v11, %v50_v14 }
  0x10   :  { %v53_v16 = vsel %vm52_vm1, %v322_v11, %v51_v15 }
  0x78   :  { %v43_v17 = vpop.xlane.xlu0 %42  ;;  %v37_v18 = vpop.xlane.xlu1 %36 }
  0x79   :  { %v56_v19 = vmul.f32 %v53_v16, %v43_v17  ;;  %v54_v20 = vmul.f32 %v53_v16, %v37_v18 }
  0x7b   :  { %v383_v21 = vsub.f32 %v307_v2, %v56_v19  ;;  %v385_v22 = vsub.f32 %v303_v3, %v54_v20  ;;  %v319_v19 = vld [vmem:[%s474_s4] ss:$0 sm:$0xff] }
  0x7d   :  { %v64_v23 = vmul.f32 %v383_v21, %v383_v21  ;;  %v62_v24 = vmul.f32 %v385_v22, %v385_v22 }
  0x7f   :  { %v72_v25 = vsel %vm34_vm0, %v64_v23, 0.0  ;;  %v66_v26 = vsel %vm34_vm0, %v62_v24, 0.0 }
  0x80   :  { %73 = vadd.xlane.f32.xlu2 %v72_v25  ;;  %v46_v27 = vpop.xlane.xlu0 %45  ;;  %67 = vadd.xlane.f32.xlu0 %v66_v26  ;;  %v40_v28 = vpop.xlane.xlu1 %39 }
  0x81   :  { %v57_v29 = vmul.f32 %v53_v16, %v46_v27  ;;  %v55_v30 = vmul.f32 %v53_v16, %v40_v28 }
  0x83   :  { %v393_v31 = vsub.f32 %v308_v6, %v57_v29  ;;  %v395_v32 = vsub.f32 %v304_v7, %v55_v30 }
  0x85   :  { %v65_v33 = vmul.f32 %v393_v31, %v393_v31  ;;  %v63_v34 = vmul.f32 %v395_v32, %v395_v32 }
  0x87   :  { %v75_v35 = vsel %vm34_vm0, %v65_v33, 0.0  ;;  %v69_v36 = vsel %vm34_vm0, %v63_v34, 0.0 }
  0x88   :  { %76 = vadd.xlane.f32.xlu2 %v75_v35  ;;  %70 = vadd.xlane.f32.xlu1 %v69_v36 }
  0x94   :  { %200 = vperm.xlu0 %317, %v149_v50  }
  0xa0   :  { %195 = vperm.xlu2 %316, %v148_v54  }
  0xa1   :  { %205 = vperm.xlu1 %318, %v150_v49  }
  0xa8   :  { %210 = vperm.xlu2 %316, %v151_v1  }
  0xf3   :  { %v74_v39 = vpop.xlane.xlu2 %73  ;;  %v68_v40 = vpop.xlane.xlu0 %67 }
  0xf4   :  { %v80_v41 = vmul.f32 %v74_v39, %v53_v16  ;;  %v78_v42 = vmul.f32 %v68_v40, %v53_v16 }
  0xf6   :  { %v84_v45 = vadd.f32 1e-05, %v80_v41  ;;  %v82_v46 = vadd.f32 1e-05, %v78_v42 }
  0xf8   :  { %323 = vrsqrt.f32 %v84_v45  ;;  %vm92_vm3 = vweird.f32 %v82_v46  ;;  %vm112_vm5 = vweird.f32 %v84_v45 }
  0xf9   :  { %325 = vrsqrt.f32 %v82_v46 }
  0xfb   :  { %v77_v47 = vpop.xlane.xlu2 %76  ;;  %v71_v48 = vpop.xlane.xlu1 %70 }
  0xfc   :  { %v81_v51 = vmul.f32 %v77_v47, %v53_v16  ;;  %v79_v52 = vmul.f32 %v71_v48, %v53_v16 }
  0xfe   :  { %v324_v55 = vpop.eup %323  ;;  %v85_v56 = vadd.f32 1e-05, %v81_v51  ;;  %v83_v57 = vadd.f32 1e-05, %v79_v52 }
  0xff   :  { %v326_v58 = vpop.eup %325  ;;  %v107_v59 = vmul.f32 %v324_v55, %v84_v45  ;;  %vm113_vm2 = vweird.f32 %v324_v55 }
 0x100   :  { %v87_v60 = vmul.f32 %v326_v58, %v82_v46  ;;  %327 = vrsqrt.f32 %v85_v56  ;;  %vm93_vm4 = vweird.f32 %v326_v58  ;;  %vm114_vm6 = vmor %vm112_vm5, %vm113_vm2  ;;  %vm102_vm9 = vweird.f32 %v83_v57 }
 0x101   :  { %v108_v61 = vmul.f32 %v324_v55, %v107_v59  ;;  %329 = vrsqrt.f32 %v83_v57  ;;  %vm94_vm7 = vmor %vm92_vm3, %vm93_vm4  ;;  %vm122_vm11 = vweird.f32 %v85_v56 }
 0x102   :  { %v88_v62 = vmul.f32 %v326_v58, %v87_v60 }
 0x103   :  { %v109_v63 = vmul.f32 0.5, %v108_v61 }
 0x104   :  { %v89_v0 = vmul.f32 0.5, %v88_v62 }
 0x105   :  { %v110_v2 = vsub.f32 1.5, %v109_v63 }
 0x106   :  { %v328_v3 = vpop.eup %327  ;;  %v90_v4 = vsub.f32 1.5, %v89_v0  ;;  %v201_v49 = vpop.permute.xlu0 %200 }
 0x107   :  { %v330_v5 = vpop.eup %329  ;;  %v111_v6 = vmul.f32 %v324_v55, %v110_v2  ;;  %v117_v7 = vmul.f32 %v328_v3, %v85_v56  ;;  %vm123_vm8 = vweird.f32 %v328_v3 }
 0x108   :  { %v91_v8 = vmul.f32 %v326_v58, %v90_v4  ;;  %v97_v9 = vmul.f32 %v330_v5, %v83_v57  ;;  %vm103_vm10 = vweird.f32 %v330_v5  ;;  %vm124_vm12 = vmor %vm122_vm11, %vm123_vm8 }
 0x109   :  { %v118_v10 = vmul.f32 %v328_v3, %v117_v7  ;;  %v115_v12 = vsel %vm114_vm6, %v324_v55, %v111_v6  ;;  %vm104_vm13 = vmor %vm102_vm9, %vm103_vm10 }
 0x10a   :  { %v98_v11 = vmul.f32 %v330_v5, %v97_v9  ;;  %v95_v14 = vsel %vm94_vm7, %v326_v58, %v91_v8  ;;  %v128_v17 = vmul.f32 %v115_v12, %v383_v21  ;;  %v320_v21 = vld [vmem:[%s475_s5] ss:$0 sm:$0xff] }
 0x10b   :  { %v119_v13 = vmul.f32 0.5, %v118_v10  ;;  %v126_v20 = vmul.f32 %v95_v14, %v385_v22 }
 0x10c   :  { %v99_v15 = vmul.f32 0.5, %v98_v11  ;;  %v136_v28 = vmul.f32 %v319_v19, %v128_v17 }
 0x10d   :  { %v120_v16 = vsub.f32 1.5, %v119_v13  ;;  %v134_v30 = vmul.f32 %v319_v19, %v126_v20 }
 0x10e   :  { %v100_v18 = vsub.f32 1.5, %v99_v15  ;;  %v144_v22 = vadd.f32 %v320_v21, %v136_v28 }
 0x10f   :  { %v121_v23 = vmul.f32 %v328_v3, %v120_v16  ;;  %v142_v36 = vadd.f32 %v320_v21, %v134_v30 }
 0x110   :  { %v101_v24 = vmul.f32 %v330_v5, %v100_v18 }
 0x111   :  { %v125_v25 = vsel %vm124_vm12, %v328_v3, %v121_v23 }
 0x112   :  { %v129_v26 = vmul.f32 %v125_v25, %v393_v31  ;;  %v105_v27 = vsel %vm104_vm13, %v330_v5, %v101_v24  ;;  %v196_v31 = vpop.permute.xlu2 %195 }
 0x113   :  { %v127_v29 = vmul.f32 %v105_v27, %v395_v32  ;;  %v206_v44 = vpop.permute.xlu1 %205 }
 0x114   :  { %v137_v33 = vmul.f32 %v319_v19, %v129_v26 }
 0x115   :  { %v135_v34 = vmul.f32 %v319_v19, %v127_v29 }
 0x116   :  { %v145_v35 = vadd.f32 %v320_v21, %v137_v33 }
 0x117   :  { %v143_v37 = vadd.f32 %v320_v21, %v135_v34 }
 0x118   :  { %v147_v38 = vpack.c.bf16 %v145_v35, %v144_v22 }
 0x119   :  { %v146_v39 = vpack.c.bf16 %v143_v37, %v142_v36 }
 0x11a   :  { %286 = vmatmul.msk.bf16.vlgmr.msra.gmra.mxu2 %vm34_vm0, %v147_v38  ;;  %296 = vmatmul.msk.bf16.vlgmr.msra.gmra.mxu3 %vm34_vm0, %v147_v38  ;;  %v211_v56 = vpop.permute.xlu2 %210 }
 0x11b   :  { %285 = vmatmul.msk.bf16.vlgmr.msra.gmra.mxu0 %vm34_vm0, %v146_v39  ;;  %295 = vmatmul.msk.bf16.vlgmr.msra.gmra.mxu1 %vm34_vm0, %v146_v39 }
 0x198   :  { %v183_v40 = vpop.f32.mrf.mxu0  ;;  %v242_v32 = vpop.f32.mrf.mxu1 }
 0x199   :  { %v213_v41 = vmul.f32 %v196_v31, %v183_v40  ;;  %v261_v42 = vpack.c.bf16 %v242_v32, %v242_v32 }
 0x19b   :  { %v252_v43 = vpack.c.bf16 %v213_v41, %v213_v41  ;;  %265 = vst.msk [vmem:[%s479_s7] sm:$0xf] %vm256_vm14, %v261_v42 }
 0x19d   :  { %257 = vst.msk [vmem:[%s480_s6] sm:$0xf] %vm256_vm14, %v252_v43  ;;  %v188_v45 = vpop.f32.mrf.mxu2  ;;  %v247_v46 = vpop.f32.mrf.mxu3 }
 0x19e   :  { %v263_v47 = vpack.c.bf16 %v247_v46, %v247_v46  ;;  %v215_v48 = vmul.f32 %v206_v44, %v188_v45 }
 0x1a0   :  { %267 = vst.msk [vmem:[%s479_s7 + $0x8] sm:$0xf] %vm256_vm14, %v263_v47  ;;  %v254_v50 = vpack.c.bf16 %v215_v48, %v215_v48  ;;  %v185_v51 = vpop.f32.mrf.mxu0  ;;  %v244_v52 = vpop.f32.mrf.mxu1 }
 0x1a1   :  { %v214_v53 = vmul.f32 %v201_v49, %v185_v51  ;;  %v262_v54 = vpack.c.bf16 %v244_v52, %v244_v52 }
 0x1a2   :  { %259 = vst.msk [vmem:[%s480_s6 + $0x8] sm:$0xf] %vm256_vm14, %v254_v50 }
 0x1a3   :  { %v253_v55 = vpack.c.bf16 %v214_v53, %v214_v53  ;;  %266 = vst.msk [vmem:[%s479_s7 + $0x4] sm:$0xf] %vm256_vm14, %v262_v54 }
 0x1a5   :  { %258 = vst.msk [vmem:[%s480_s6 + $0x4] sm:$0xf] %vm256_vm14, %v253_v55  ;;  %v190_v57 = vpop.f32.mrf.mxu2  ;;  %v249_v58 = vpop.f32.mrf.mxu3 }
 0x1a6   :  { %v216_v59 = vmul.f32 %v211_v56, %v190_v57  ;;  %v264_v60 = vpack.c.bf16 %v249_v58, %v249_v58 }
 0x1a8   :  { %v255_v61 = vpack.c.bf16 %v216_v59, %v216_v59  ;;  %268 = vst.msk [vmem:[%s479_s7 + $0xc] sm:$0xf] %vm256_vm14, %v264_v60 }
 0x1aa   :  { %260 = vst.msk [vmem:[%s480_s6 + $0xc] sm:$0xf] %vm256_vm14, %v255_v61 }

// kernel: _lambda_.18
= control target key start
LH: loop header
LB: loop body
LE: loop exit
PB: predicated region body
PF: predicated region fallthrough
CT: control target
= control target key end

     0   :  { %vm66_vm0 = vcmask 523264   ;;  %vm110_vm1 = vcmask 1041408   ;;  %vm97_vm2 = vcmask 15360   ;;  %vm195_vm3 = vcmask 130048   ;;  %s353_s1 = inlined_call_operand.vmem [shape: bf16[64,18], index: 1, kind: input, shape index: {}]   ;;  %s354_s0 = inlined_call_operand.vmem [shape: bf16[32,64], index: 0, kind: input, shape index: {}]   ;;  %s355_s2 = inlined_call_operand.vmem [shape: f32[2,64], index: 2, kind: input, shape index: {}]   ;;  %s356_s3 = inlined_call_operand.vmem [shape: f32[1,64], index: 3, kind: input, shape index: {}]   ;;  %s357_s5 = inlined_call_operand.vmem [shape: f32[32,16], index: 5, kind: output, shape index: {1}]   ;;  %s358_s4 = inlined_call_operand.vmem [shape: f32[32,64], index: 4, kind: output, shape index: {0}]  }
   0x1   :  { %v244_v0 = vld [vmem:[%s353_s1 + $0x18] sm:$0xff]  ;;  %v243_v1 = vld [vmem:[%s353_s1 + $0x10] sm:$0xff]  ;;  %v242_v2 = vld [vmem:[%s353_s1 + $0x8] sm:$0xff] }
   0x2   :  { %77 = vmatpush.bf16.msra.mxu0 %v244_v0  ;;  %245 = vmatpush.bf16.msra.mxu2 %v244_v0  ;;  %v241_v3 = vld [vmem:[%s353_s1] sm:$0xff]  ;;  %v240_v5 = vld [vmem:[%s354_s0 + $0x8] sm:$0xff]  ;;  %s268_s1 = smov 126  }
   0x3   :  { %v239_v4 = vld [vmem:[%s354_s0] sm:$0xff] }
   0x4   :  { %v92_v6 = vld [vmem:[%s355_s2] sm:$0x3] }
   0x5   :  { %234 = vmatpush.msk.msra.mxu1 %vm110_vm1, %v92_v6  ;;  %249 = vmatpush.msk.msra.mxu3 %vm110_vm1, %v92_v6  ;;  %v251_v14 = vld [vmem:[%s356_s3] ss:$0 sm:$0xff] }
   0x6   :  { %78 = vmatpush.bf16.msra.mxu0 %v243_v1  ;;  %246 = vmatpush.bf16.msra.mxu2 %v243_v1 }
   0xa   :  { %79 = vmatpush.bf16.msra.mxu0 %v242_v2  ;;  %247 = vmatpush.bf16.msra.mxu2 %v242_v2 }
   0xe   :  { %80 = vmatpush.bf16.msra.mxu0 %v241_v3  ;;  %248 = vmatpush.bf16.msra.mxu2 %v241_v3 }
  0x11   :  { %232 = vmatmul.msk.bf16.vlgmr.msra.gmra.mxu0 %vm66_vm0, %v239_v4  ;;  %233 = vmatmul.msk.bf16.vlgmr.msra.gmra.mxu2 %vm66_vm0, %v240_v5 }
  0x8e   :  { %v82_v7 = vpop.f32.mrf.mxu0 }
  0x8f   :  { %183 = vrot.lane.b32.xlu0 %v82_v7, %s268_s1  ;;  %235 = vmatmul.msk.f32.vlgmr.msra.gmra.mxu1 %vm97_vm2, %v82_v7 }
  0x94   :  { %v87_v8 = vpop.f32.mrf.mxu2 }
  0x95   :  { %187 = vrot.lane.b32.xlu1 %v87_v8, %s268_s1 }
  0x96   :  { %v84_v9 = vpop.f32.mrf.mxu0 }
  0x97   :  { %185 = vrot.lane.b32.xlu0 %v84_v9, %s268_s1  ;;  %236 = vmatmul.msk.f32.vlgmr.msra.gmra.mxu3 %vm97_vm2, %v84_v9 }
  0x9c   :  { %v89_v10 = vpop.f32.mrf.mxu2 }
  0x9d   :  { %189 = vrot.lane.b32.xlu1 %v89_v10, %s268_s1 }
  0x9f   :  { %237 = vmatmul.msk.f32.gmra.mxu3 %vm97_vm2, %v87_v8 }
  0xa7   :  { %238 = vmatmul.msk.f32.gmra.mxu3 %vm97_vm2, %v89_v10 }
 0x101   :  { %v184_v11 = vpop.permute.xlu0 %183 }
 0x102   :  { %196 = vst.msk [vmem:[%s357_s5] sm:$0xff] %vm195_vm3, %v184_v11 }
 0x107   :  { %v188_v12 = vpop.permute.xlu1 %187 }
 0x108   :  { %198 = vst.msk [vmem:[%s357_s5 + $0x10] sm:$0xff] %vm195_vm3, %v188_v12 }
 0x109   :  { %v186_v13 = vpop.permute.xlu0 %185 }
 0x10a   :  { %197 = vst.msk [vmem:[%s357_s5 + $0x8] sm:$0xff] %vm195_vm3, %v186_v13 }
 0x10c   :  { %v131_v15 = vpop.f32.mrf.mxu1 }
 0x10d   :  { %v132_v16 = vadd.f32 %v251_v14, %v131_v15 }
 0x10f   :  { %v147_v17 = vand.u32 2147483647, %v132_v16  ;;  %v190_v18 = vpop.permute.xlu1 %189  ;;  %v143_v31 = vmax.f32 %v132_v16, 0.0 }
 0x110   :  { %199 = vst.msk [vmem:[%s357_s5 + $0x18] sm:$0xff] %vm195_vm3, %v190_v18 }
 0x111   :  { %v151_v19 = vsub.f32 0.0, %v147_v17 }
 0x113   :  { %v155_v20 = vmul.f32 1.442695, %v151_v19 }
 0x115   :  { %252 = vpow2.f32 %v155_v20 }
 0x11a   :  { %v134_v21 = vpop.f32.mrf.mxu3 }
 0x11b   :  { %v253_v22 = vpop.eup %252  ;;  %v135_v23 = vadd.f32 %v251_v14, %v134_v21 }
 0x11c   :  { %v163_v24 = vadd.f32 1.0, %v253_v22 }
 0x11d   :  { %v148_v25 = vand.u32 2147483647, %v135_v23  ;;  %v144_v47 = vmax.f32 %v135_v23, 0.0 }
 0x11e   :  { %254 = vlog2.f32 %v163_v24 }
 0x11f   :  { %v152_v26 = vsub.f32 0.0, %v148_v25 }
 0x121   :  { %v157_v27 = vmul.f32 1.442695, %v152_v26 }
 0x122   :  { %v137_v28 = vpop.f32.mrf.mxu3 }
 0x123   :  { %256 = vpow2.f32 %v157_v27  ;;  %v138_v29 = vadd.f32 %v251_v14, %v137_v28 }
 0x124   :  { %v255_v30 = vpop.eup %254 }
 0x125   :  { %v168_v32 = vmul.f32 0.6931472, %v255_v30  ;;  %v149_v33 = vand.u32 2147483647, %v138_v29  ;;  %v145_v53 = vmax.f32 %v138_v29, 0.0 }
 0x127   :  { %v175_v34 = vadd.f32 %v168_v32, %v143_v31  ;;  %v153_v35 = vsub.f32 0.0, %v149_v33 }
 0x129   :  { %v257_v36 = vpop.eup %256  ;;  %179 = vst.msk [vmem:[%s358_s4] sm:$0xff] %vm66_vm0, %v175_v34  ;;  %v159_v37 = vmul.f32 1.442695, %v153_v35 }
 0x12a   :  { %v164_v38 = vadd.f32 1.0, %v257_v36  ;;  %v140_v39 = vpop.f32.mrf.mxu3 }
 0x12b   :  { %258 = vpow2.f32 %v159_v37  ;;  %v141_v40 = vadd.f32 %v251_v14, %v140_v39 }
 0x12c   :  { %260 = vlog2.f32 %v164_v38 }
 0x12d   :  { %v150_v41 = vand.u32 2147483647, %v141_v40  ;;  %v146_v57 = vmax.f32 %v141_v40, 0.0 }
 0x12f   :  { %v154_v42 = vsub.f32 0.0, %v150_v41 }
 0x131   :  { %v259_v43 = vpop.eup %258  ;;  %v161_v44 = vmul.f32 1.442695, %v154_v42 }
 0x132   :  { %v261_v45 = vpop.eup %260  ;;  %v165_v46 = vadd.f32 1.0, %v259_v43 }
 0x133   :  { %v170_v48 = vmul.f32 0.6931472, %v261_v45  ;;  %262 = vpow2.f32 %v161_v44 }
 0x134   :  { %264 = vlog2.f32 %v165_v46 }
 0x135   :  { %v176_v49 = vadd.f32 %v170_v48, %v144_v47 }
 0x137   :  { %180 = vst.msk [vmem:[%s358_s4 + $0x8] sm:$0xff] %vm66_vm0, %v176_v49 }
 0x139   :  { %v263_v50 = vpop.eup %262 }
 0x13a   :  { %v265_v51 = vpop.eup %264  ;;  %v166_v52 = vadd.f32 1.0, %v263_v50 }
 0x13b   :  { %v172_v54 = vmul.f32 0.6931472, %v265_v51 }
 0x13c   :  { %266 = vlog2.f32 %v166_v52 }
 0x13d   :  { %v177_v55 = vadd.f32 %v172_v54, %v145_v53 }
 0x13f   :  { %181 = vst.msk [vmem:[%s358_s4 + $0x10] sm:$0xff] %vm66_vm0, %v177_v55 }
 0x142   :  { %v267_v56 = vpop.eup %266 }
 0x143   :  { %v174_v58 = vmul.f32 0.6931472, %v267_v56 }
 0x145   :  { %v178_v59 = vadd.f32 %v174_v58, %v146_v57 }
 0x147   :  { %182 = vst.msk [vmem:[%s358_s4 + $0x18] sm:$0xff] %vm66_vm0, %v178_v59 }

// kernel: _lambda_.20
= control target key start
LH: loop header
LB: loop body
LE: loop exit
PB: predicated region body
PF: predicated region fallthrough
CT: control target
= control target key end

     0   :  { %v282_v20 = vmov 0   ;;  %s432_s3 = inlined_call_operand.vmem [shape: bf16[64,32], index: 3, kind: input, shape index: {}]   ;;  %s433_s1 = inlined_call_operand.vmem [shape: bf16[32,64], index: 1, kind: input, shape index: {}]   ;;  %s434_s2 = inlined_call_operand.vmem [shape: f32[32,1], index: 2, kind: input, shape index: {}]   ;;  %s435_s0 = inlined_call_operand.vmem [shape: bf16[32,64], index: 0, kind: input, shape index: {}]   ;;  %s436_s4 = inlined_call_operand.vmem [shape: bf16[32,32], index: 4, kind: output, shape index: {}]  }
   0x1   :  { %v240_v0 = vld [vmem:[%s432_s3 + $0x18] sm:$0xff]  ;;  %v314_v1 = vld [vmem:[%s433_s1] sm:$0xff]   ;;  %v239_v2 = vld [vmem:[%s432_s3 + $0x10] sm:$0xff]  ;;  %265 = vset.pattern.permute.xlu1 %v282_v20  ;;  %264 = vset.pattern.permute.xlu0 %v282_v20 }
   0x2   :  { %163 = vmatpush.bf16.msra.mxu0 %v240_v0  ;;  %259 = vmatpush.bf16.msra.mxu1 %v240_v0  ;;  %v251_v3 = vunpack.c.l.bf16 %v314_v1  ;;  %v252_v4 = vunpack.c.h.bf16 %v314_v1  ;;  %v324_v5 = vld [vmem:[%s433_s1 + $0x8] sm:$0xff]   ;;  %v237_v17 = vld [vmem:[%s432_s3] sm:$0xff]  ;;  %v180_v18 = vld [vmem:[%s434_s2 + $0x10] sm:$0xff] }
   0x3   :  { %v255_v6 = vunpack.c.l.bf16 %v324_v5  ;;  %v256_v7 = vunpack.c.h.bf16 %v324_v5  ;;  %v238_v11 = vld [vmem:[%s432_s3 + $0x8] sm:$0xff]  ;;  %v178_v19 = vld [vmem:[%s434_s2] sm:$0xff]  ;;  %194 = vperm.xlu1 %265, %v180_v18   ;;  %v181_v28 = vld [vmem:[%s434_s2 + $0x18] sm:$0xff] }
   0x4   :  { %v38_v8 = vsub.f32 0.0, %v251_v3  ;;  %v39_v9 = vsub.f32 0.0, %v252_v4  ;;  %184 = vperm.xlu0 %264, %v178_v19   ;;  %v242_v27 = vld [vmem:[%s435_s0] sm:$0xff]   ;;  %v179_v29 = vld [vmem:[%s434_s2 + $0x8] sm:$0xff] }
   0x5   :  { %v40_v10 = vsub.f32 0.0, %v255_v6  ;;  %v41_v14 = vsub.f32 0.0, %v256_v7  ;;  %v243_v32 = vunpack.c.l.bf16 %v242_v27  ;;  %v244_v33 = vunpack.c.h.bf16 %v242_v27  ;;  %v360_v34 = vld [vmem:[%s435_s0 + $0x8] sm:$0xff]  }
   0x6   :  { %164 = vmatpush.bf16.msra.mxu0 %v239_v2  ;;  %260 = vmatpush.bf16.msra.mxu1 %v239_v2  ;;  %v42_v12 = vmul.f32 1.442695, %v38_v8  ;;  %v44_v13 = vmul.f32 1.442695, %v39_v9  ;;  %v247_v43 = vunpack.c.l.bf16 %v360_v34  ;;  %v248_v44 = vunpack.c.h.bf16 %v360_v34 }
   0x7   :  { %v46_v15 = vmul.f32 1.442695, %v40_v10  ;;  %v48_v16 = vmul.f32 1.442695, %v41_v14  ;;  %v34_v41 = vmul.f32 %v251_v3, %v243_v32  ;;  %v35_v45 = vmul.f32 %v252_v4, %v244_v33 }
   0x8   :  { %266 = vpow2.f32 %v42_v12  ;;  %v36_v9 = vmul.f32 %v255_v6, %v247_v43 }
   0x9   :  { %268 = vpow2.f32 %v44_v13 }
   0xa   :  { %165 = vmatpush.bf16.msra.mxu0 %v238_v11  ;;  %261 = vmatpush.bf16.msra.mxu1 %v238_v11  ;;  %270 = vpow2.f32 %v46_v15 }
   0xb   :  { %272 = vpow2.f32 %v48_v16  ;;  %199 = vperm.xlu1 %265, %v181_v28  }
   0xc   :  { %189 = vperm.xlu0 %264, %v179_v29  }
   0xe   :  { %v267_v21 = vpop.eup %266  ;;  %166 = vmatpush.bf16.msra.mxu0 %v237_v17  ;;  %262 = vmatpush.bf16.msra.mxu1 %v237_v17 }
   0xf   :  { %v269_v22 = vpop.eup %268  ;;  %v50_v23 = vadd.f32 1.0, %v267_v21  ;;  %v37_v21 = vmul.f32 %v256_v7, %v248_v44 }
  0x10   :  { %v271_v24 = vpop.eup %270  ;;  %v51_v25 = vadd.f32 1.0, %v269_v22 }
  0x11   :  { %v273_v26 = vpop.eup %272  ;;  %274 = vrcp.f32 %v50_v23  ;;  %v52_v30 = vadd.f32 1.0, %v271_v24  ;;  %v63_v35 = vand.u32 2147483647, %v50_v23  ;;  %v65_v36 = vand.u32 2147483648, %v50_v23 }
  0x12   :  { %276 = vrcp.f32 %v51_v25  ;;  %v355_v31 = vadd.f32 1.0, %v273_v26  ;;  %v78_v38 = vand.u32 2147483647, %v51_v25  ;;  %v80_v39 = vand.u32 2147483648, %v51_v25 }
  0x13   :  { %278 = vrcp.f32 %v52_v30  ;;  %vm59_vm0 = vweird.f32 %v50_v23  ;;  %vm74_vm1 = vweird.f32 %v51_v25  ;;  %vm367_vm3 = vcmp.eq.f32.partialorder %v63_v35, 8.507059e+37 }
  0x14   :  { %280 = vrcp.f32 %v355_v31  ;;  %v66_v49 = vor.u32 1.1754944e-38, %v65_v36  ;;  %vm371_vm5 = vcmp.eq.f32.partialorder %v78_v38, 8.507059e+37  ;;  %v81_v53 = vor.u32 1.1754944e-38, %v80_v39 }
  0x15   :  { %vm89_vm6 = vweird.f32 %v52_v30  ;;  %v93_v57 = vand.u32 2147483647, %v52_v30  ;;  %v95_v60 = vand.u32 2147483648, %v52_v30  ;;  %vm104_vm8 = vweird.f32 %v355_v31 }
  0x16   :  { %v110_v1 = vand.u32 2147483648, %v355_v31  ;;  %v108_v4 = vand.u32 2147483647, %v355_v31 }
  0x17   :  { %v275_v37 = vpop.eup %274  ;;  %vm393_vm12 = vcmp.eq.f32.partialorder %v93_v57, 8.507059e+37  ;;  %v96_v15 = vor.u32 1.1754944e-38, %v95_v60 }
  0x18   :  { %v277_v40 = vpop.eup %276  ;;  %v55_v42 = vmul.f32 %v275_v37, %v50_v23  ;;  %vm60_vm2 = vweird.f32 %v275_v37  ;;  %v111_v19 = vor.u32 1.1754944e-38, %v110_v1  ;;  %vm109_vm15 = vcmp.eq.f32.partialorder %v108_v4, 8.507059e+37 }
  0x19   :  { %v70_v46 = vmul.f32 %v277_v40, %v51_v25  ;;  %v279_v50 = vpop.eup %278  ;;  %vm75_vm4 = vweird.f32 %v277_v40  ;;  %vm376_vm7 = vmor %vm59_vm0, %vm60_vm2  ;;  %vm152_vm0 = vcmask 523264  }
  0x1a   :  { %v56_v47 = vsub.f32 1.0, %v55_v42  ;;  %v281_v54 = vpop.eup %280  ;;  %v85_v56 = vmul.f32 %v279_v50, %v52_v30  ;;  %vm383_vm9 = vmor %vm74_vm1, %vm75_vm4  ;;  %vm90_vm10 = vweird.f32 %v279_v50  ;;  %vm210_vm1 = vcmask 257024  }
  0x1b   :  { %v71_v51 = vsub.f32 1.0, %v70_v46  ;;  %v100_v61 = vmul.f32 %v281_v54, %v355_v31  ;;  %vm105_vm11 = vweird.f32 %v281_v54  ;;  %vm402_vm13 = vmor %vm89_vm6, %vm90_vm10 }
  0x1c   :  { %v57_v55 = vmul.f32 %v275_v37, %v56_v47  ;;  %v86_v0 = vsub.f32 1.0, %v85_v56  ;;  %vm106_vm14 = vmor %vm104_vm8, %vm105_vm11 }
  0x1d   :  { %v72_v59 = vmul.f32 %v277_v40, %v71_v51  ;;  %v101_v3 = vsub.f32 1.0, %v100_v61 }
  0x1e   :  { %v58_v62 = vadd.f32 %v275_v37, %v57_v55  ;;  %v87_v10 = vmul.f32 %v279_v50, %v86_v0 }
  0x1f   :  { %v73_v2 = vadd.f32 %v277_v40, %v72_v59  ;;  %v102_v16 = vmul.f32 %v281_v54, %v101_v3 }
  0x20   :  { %v62_v8 = vsel %vm376_vm7, %v275_v37, %v58_v62  ;;  %v88_v18 = vadd.f32 %v279_v50, %v87_v10 }
  0x21   :  { %v67_v12 = vsel %vm367_vm3, %v66_v49, %v62_v8  ;;  %v77_v13 = vsel %vm383_vm9, %v277_v40, %v73_v2  ;;  %v103_v22 = vadd.f32 %v281_v54, %v102_v16 }
  0x22   :  { %v82_v6 = vsel %vm371_vm5, %v81_v53, %v77_v13  ;;  %v114_v17 = vmul.f32 %v67_v12, %v34_v41  ;;  %v92_v23 = vsel %vm402_vm13, %v279_v50, %v88_v18 }
  0x23   :  { %v115_v20 = vmul.f32 %v82_v6, %v35_v45  ;;  %v97_v25 = vsel %vm393_vm12, %v96_v15, %v92_v23  ;;  %v107_v26 = vsel %vm106_vm14, %v281_v54, %v103_v22 }
  0x24   :  { %v112_v27 = vsel %vm109_vm15, %v111_v19, %v107_v26  ;;  %v116_v28 = vmul.f32 %v97_v25, %v36_v9 }
  0x25   :  { %v118_v24 = vpack.c.bf16 %v115_v20, %v114_v17  ;;  %v117_v29 = vmul.f32 %v112_v27, %v37_v21 }
  0x27   :  { %235 = vmatmul.msk.bf16.vlgmr.msra.gmra.mxu0 %vm152_vm0, %v118_v24  ;;  %v119_v30 = vpack.c.bf16 %v117_v29, %v116_v28 }
  0x29   :  { %236 = vmatmul.msk.bf16.vlgmr.msra.gmra.mxu1 %vm152_vm0, %v119_v30 }
  0x75   :  { %v195_v32 = vpop.permute.xlu1 %194 }
  0x76   :  { %v185_v31 = vpop.permute.xlu0 %184 }
  0x7d   :  { %v200_v41 = vpop.permute.xlu1 %199 }
  0x7e   :  { %v190_v37 = vpop.permute.xlu0 %189 }
  0xa4   :  { %v168_v5 = vpop.f32.mrf.mxu0 }
  0xa5   :  { %v202_v7 = vmul.f32 %v185_v31, %v168_v5 }
  0xa6   :  { %v173_v34 = vpop.f32.mrf.mxu1 }
  0xa7   :  { %v206_v33 = vpack.c.bf16 %v202_v7, %v202_v7  ;;  %v204_v35 = vmul.f32 %v195_v32, %v173_v34 }
  0xa9   :  { %211 = vst.msk [vmem:[%s436_s4] sm:$0xf] %vm210_vm1, %v206_v33  ;;  %v208_v36 = vpack.c.bf16 %v204_v35, %v204_v35 }
  0xab   :  { %213 = vst.msk [vmem:[%s436_s4 + $0x8] sm:$0xf] %vm210_vm1, %v208_v36 }
  0xac   :  { %v170_v38 = vpop.f32.mrf.mxu0 }
  0xad   :  { %v203_v39 = vmul.f32 %v190_v37, %v170_v38 }
  0xae   :  { %v175_v42 = vpop.f32.mrf.mxu1 }
  0xaf   :  { %v207_v40 = vpack.c.bf16 %v203_v39, %v203_v39  ;;  %v205_v43 = vmul.f32 %v200_v41, %v175_v42 }
  0xb1   :  { %212 = vst.msk [vmem:[%s436_s4 + $0x4] sm:$0xf] %vm210_vm1, %v207_v40  ;;  %v209_v44 = vpack.c.bf16 %v205_v43, %v205_v43 }
  0xb3   :  { %214 = vst.msk [vmem:[%s436_s4 + $0xc] sm:$0xf] %vm210_vm1, %v209_v44 }

// kernel: _lambda_.21
= control target key start
LH: loop header
LB: loop body
LE: loop exit
PB: predicated region body
PF: predicated region fallthrough
CT: control target
= control target key end

     0   :  { %vm29_vm0 = vcmask 261120   ;;  %v282_v10 = vmov 32.0   ;;  %vm228_vm14 = vcmask 257024   ;;  %s380_s0 = inlined_call_operand.vmem [shape: bf16[32,32], index: 0, kind: input, shape index: {}]   ;;  %s381_s1 = inlined_call_operand.vmem [shape: f32[1,32], index: 1, kind: input, shape index: {}]   ;;  %s382_s2 = inlined_call_operand.vmem [shape: f32[1,32], index: 2, kind: input, shape index: {}]   ;;  %s383_s4 = inlined_call_operand.vmem [shape: f32[1,32], index: 4, kind: input, shape index: {}]   ;;  %s384_s3 = inlined_call_operand.vmem [shape: bf16[32,32], index: 3, kind: input, shape index: {}]   ;;  %s385_s5 = inlined_call_operand.vmem [shape: bf16[32,32], index: 5, kind: output, shape index: {}]  }
   0x1   :  { %v257_v0 = vld [vmem:[%s380_s0 + $0x8] sm:$0xff]   ;;  %v250_v1 = vld [vmem:[%s380_s0] sm:$0xff]   ;;  %264 = vrcp.f32 %v282_v10 }
   0x2   :  { %v255_v2 = vunpack.c.l.bf16 %v257_v0  ;;  %v251_v3 = vunpack.c.l.bf16 %v250_v1  ;;  %v256_v6 = vunpack.c.h.bf16 %v257_v0  ;;  %v252_v7 = vunpack.c.h.bf16 %v250_v1  ;;  %v248_v37 = vld [vmem:[%s384_s3 + $0x8] sm:$0xff]  ;;  %v247_v42 = vld [vmem:[%s384_s3] sm:$0xff] }
   0x3   :  { %175 = vmatpush.bf16.msra.mxu0 %v248_v37  ;;  %258 = vmatpush.bf16.msra.mxu1 %v248_v37 }
   0x4   :  { %v36_v4 = vsel %vm29_vm0, %v255_v2, 0.0  ;;  %v30_v5 = vsel %vm29_vm0, %v251_v3, 0.0  ;;  %v39_v8 = vsel %vm29_vm0, %v256_v6, 0.0  ;;  %v33_v9 = vsel %vm29_vm0, %v252_v7, 0.0 }
   0x5   :  { %37 = vadd.xlane.f32.xlu1 %v36_v4  ;;  %31 = vadd.xlane.f32.xlu0 %v30_v5 }
   0x7   :  { %v265_v11 = vpop.eup %264  ;;  %176 = vmatpush.bf16.msra.mxu0 %v247_v42  ;;  %259 = vmatpush.bf16.msra.mxu1 %v247_v42 }
   0x8   :  { %v43_v12 = vmul.f32 32.0, %v265_v11  ;;  %vm47_vm1 = vweird.f32 %v265_v11 }
   0xa   :  { %v44_v13 = vsub.f32 1.0, %v43_v12  ;;  %v261_v12 = vld [vmem:[%s381_s1] ss:$0 sm:$0xff] }
   0xc   :  { %v45_v14 = vmul.f32 %v265_v11, %v44_v13 }
   0xd   :  { %40 = vadd.xlane.f32.xlu1 %v39_v8  ;;  %34 = vadd.xlane.f32.xlu0 %v33_v9 }
   0xe   :  { %v46_v15 = vadd.f32 %v265_v11, %v45_v14 }
  0x10   :  { %v48_v16 = vsel %vm47_vm1, %v265_v11, %v46_v15 }
  0x78   :  { %v38_v17 = vpop.xlane.xlu1 %37  ;;  %v32_v18 = vpop.xlane.xlu0 %31 }
  0x79   :  { %v51_v19 = vmul.f32 %v48_v16, %v38_v17  ;;  %v49_v20 = vmul.f32 %v48_v16, %v32_v18 }
  0x7b   :  { %v323_v21 = vsub.f32 %v255_v2, %v51_v19  ;;  %v325_v22 = vsub.f32 %v251_v3, %v49_v20  ;;  %v262_v19 = vld [vmem:[%s382_s2] ss:$0 sm:$0xff] }
  0x7d   :  { %v59_v23 = vmul.f32 %v323_v21, %v323_v21  ;;  %v57_v24 = vmul.f32 %v325_v22, %v325_v22 }
  0x7f   :  { %v67_v25 = vsel %vm29_vm0, %v59_v23, 0.0  ;;  %v61_v26 = vsel %vm29_vm0, %v57_v24, 0.0 }
  0x80   :  { %v41_v27 = vpop.xlane.xlu1 %40  ;;  %68 = vadd.xlane.f32.xlu0 %v67_v25  ;;  %62 = vadd.xlane.f32.xlu2 %v61_v26  ;;  %v35_v28 = vpop.xlane.xlu0 %34 }
  0x81   :  { %v52_v29 = vmul.f32 %v48_v16, %v41_v27  ;;  %v50_v30 = vmul.f32 %v48_v16, %v35_v28 }
  0x83   :  { %v333_v31 = vsub.f32 %v256_v6, %v52_v29  ;;  %v335_v32 = vsub.f32 %v252_v7, %v50_v30 }
  0x85   :  { %v60_v33 = vmul.f32 %v333_v31, %v333_v31  ;;  %v58_v34 = vmul.f32 %v335_v32, %v335_v32 }
  0x87   :  { %v70_v35 = vsel %vm29_vm0, %v60_v33, 0.0  ;;  %v64_v36 = vsel %vm29_vm0, %v58_v34, 0.0 }
  0x88   :  { %71 = vadd.xlane.f32.xlu1 %v70_v35  ;;  %65 = vadd.xlane.f32.xlu2 %v64_v36 }
  0xf3   :  { %v63_v38 = vpop.xlane.xlu2 %62  ;;  %v69_v39 = vpop.xlane.xlu0 %68 }
  0xf4   :  { %v73_v40 = vmul.f32 %v63_v38, %v48_v16  ;;  %v75_v41 = vmul.f32 %v69_v39, %v48_v16 }
  0xf6   :  { %v77_v43 = vadd.f32 1e-05, %v73_v40  ;;  %v79_v44 = vadd.f32 1e-05, %v75_v41 }
  0xf8   :  { %266 = vrsqrt.f32 %v77_v43  ;;  %vm107_vm4 = vweird.f32 %v79_v44  ;;  %vm87_vm5 = vweird.f32 %v77_v43 }
  0xf9   :  { %268 = vrsqrt.f32 %v79_v44 }
  0xfb   :  { %v72_v45 = vpop.xlane.xlu1 %71  ;;  %v66_v46 = vpop.xlane.xlu2 %65 }
  0xfc   :  { %v76_v47 = vmul.f32 %v72_v45, %v48_v16  ;;  %v74_v48 = vmul.f32 %v66_v46, %v48_v16 }
  0xfe   :  { %v267_v49 = vpop.eup %266  ;;  %v80_v50 = vadd.f32 1e-05, %v76_v47  ;;  %v78_v51 = vadd.f32 1e-05, %v74_v48 }
  0xff   :  { %v269_v52 = vpop.eup %268  ;;  %v82_v53 = vmul.f32 %v267_v49, %v77_v43  ;;  %vm88_vm3 = vweird.f32 %v267_v49 }
 0x100   :  { %v102_v54 = vmul.f32 %v269_v52, %v79_v44  ;;  %270 = vrsqrt.f32 %v80_v50  ;;  %vm108_vm2 = vweird.f32 %v269_v52  ;;  %vm89_vm7 = vmor %vm87_vm5, %vm88_vm3  ;;  %vm117_vm10 = vweird.f32 %v80_v50 }
 0x101   :  { %v83_v55 = vmul.f32 %v267_v49, %v82_v53  ;;  %272 = vrsqrt.f32 %v78_v51  ;;  %vm109_vm6 = vmor %vm107_vm4, %vm108_vm2  ;;  %vm97_vm12 = vweird.f32 %v78_v51 }
 0x102   :  { %v103_v56 = vmul.f32 %v269_v52, %v102_v54 }
 0x103   :  { %v84_v57 = vmul.f32 0.5, %v83_v55 }
 0x104   :  { %v104_v58 = vmul.f32 0.5, %v103_v56 }
 0x105   :  { %v85_v59 = vsub.f32 1.5, %v84_v57 }
 0x106   :  { %v271_v60 = vpop.eup %270  ;;  %v105_v61 = vsub.f32 1.5, %v104_v58 }
 0x107   :  { %v273_v62 = vpop.eup %272  ;;  %v112_v63 = vmul.f32 %v271_v60, %v80_v50  ;;  %v86_v0 = vmul.f32 %v267_v49, %v85_v59  ;;  %vm118_vm8 = vweird.f32 %v271_v60 }
 0x108   :  { %v106_v1 = vmul.f32 %v269_v52, %v105_v61  ;;  %v92_v2 = vmul.f32 %v273_v62, %v78_v51  ;;  %vm98_vm9 = vweird.f32 %v273_v62  ;;  %vm119_vm11 = vmor %vm117_vm10, %vm118_vm8 }
 0x109   :  { %v113_v3 = vmul.f32 %v271_v60, %v112_v63  ;;  %v90_v7 = vsel %vm89_vm7, %v267_v49, %v86_v0  ;;  %vm99_vm13 = vmor %vm97_vm12, %vm98_vm9 }
 0x10a   :  { %v93_v4 = vmul.f32 %v273_v62, %v92_v2  ;;  %v110_v5 = vsel %vm109_vm6, %v269_v52, %v106_v1  ;;  %v121_v13 = vmul.f32 %v90_v7, %v325_v22 }
 0x10b   :  { %v114_v6 = vmul.f32 0.5, %v113_v3  ;;  %v123_v10 = vmul.f32 %v110_v5, %v323_v21 }
 0x10c   :  { %v94_v8 = vmul.f32 0.5, %v93_v4  ;;  %v129_v23 = vmul.f32 %v261_v12, %v121_v13 }
 0x10d   :  { %v115_v9 = vsub.f32 1.5, %v114_v6  ;;  %v131_v20 = vmul.f32 %v261_v12, %v123_v10 }
 0x10e   :  { %v95_v11 = vsub.f32 1.5, %v94_v8  ;;  %v137_v27 = vadd.f32 %v262_v19, %v129_v23 }
 0x10f   :  { %v116_v14 = vmul.f32 %v271_v60, %v115_v9  ;;  %v139_v25 = vadd.f32 %v262_v19, %v131_v20 }
 0x110   :  { %v96_v15 = vmul.f32 %v273_v62, %v95_v11 }
 0x111   :  { %v120_v16 = vsel %vm119_vm11, %v271_v60, %v116_v14 }
 0x112   :  { %v124_v17 = vmul.f32 %v120_v16, %v333_v31  ;;  %v100_v18 = vsel %vm99_vm13, %v273_v62, %v96_v15  ;;  %v263_v31 = vld [vmem:[%s383_s4] ss:$0 sm:$0xff] }
 0x113   :  { %v122_v21 = vmul.f32 %v100_v18, %v335_v32 }
 0x114   :  { %v132_v24 = vmul.f32 %v261_v12, %v124_v17 }
 0x115   :  { %v130_v22 = vmul.f32 %v261_v12, %v122_v21 }
 0x116   :  { %v140_v26 = vadd.f32 %v262_v19, %v132_v24 }
 0x117   :  { %v138_v28 = vadd.f32 %v262_v19, %v130_v22 }
 0x118   :  { %v142_v29 = vpack.c.bf16 %v140_v26, %v139_v25 }
 0x119   :  { %v141_v30 = vpack.c.bf16 %v138_v28, %v137_v27 }
 0x11a   :  { %246 = vmatmul.msk.bf16.vlgmr.msra.gmra.mxu1 %vm29_vm0, %v142_v29 }
 0x11b   :  { %245 = vmatmul.msk.bf16.vlgmr.msra.gmra.mxu0 %vm29_vm0, %v141_v30 }
 0x197   :  { %v183_v33 = vpop.f32.mrf.mxu1 }
 0x198   :  { %v178_v34 = vpop.f32.mrf.mxu0  ;;  %v184_v32 = vadd.f32 %v263_v31, %v183_v33 }
 0x199   :  { %v179_v35 = vadd.f32 %v263_v31, %v178_v34 }
 0x19a   :  { %v194_v36 = vmul.f32 0.044715, %v184_v32  ;;  %v190_v61 = vmul.f32 0.5, %v184_v32 }
 0x19b   :  { %v192_v37 = vmul.f32 0.044715, %v179_v35  ;;  %v188_v0 = vmul.f32 0.5, %v179_v35 }
 0x19c   :  { %v198_v38 = vmul.f32 %v194_v36, %v184_v32 }
 0x19d   :  { %v196_v39 = vmul.f32 %v192_v37, %v179_v35 }
 0x19e   :  { %v202_v40 = vmul.f32 %v198_v38, %v184_v32 }
 0x19f   :  { %v200_v41 = vmul.f32 %v196_v39, %v179_v35  ;;  %v185_v42 = vpop.f32.mrf.mxu1 }
 0x1a0   :  { %v206_v43 = vadd.f32 %v202_v40, %v184_v32  ;;  %v180_v44 = vpop.f32.mrf.mxu0  ;;  %v186_v45 = vadd.f32 %v263_v31, %v185_v42 }
 0x1a1   :  { %v204_v46 = vadd.f32 %v200_v41, %v179_v35  ;;  %v181_v47 = vadd.f32 %v263_v31, %v180_v44 }
 0x1a2   :  { %v210_v48 = vmul.f32 0.7978846, %v206_v43  ;;  %v195_v49 = vmul.f32 0.044715, %v186_v45  ;;  %v191_v8 = vmul.f32 0.5, %v186_v45 }
 0x1a3   :  { %v208_v50 = vmul.f32 0.7978846, %v204_v46  ;;  %v193_v51 = vmul.f32 0.044715, %v181_v47  ;;  %v189_v10 = vmul.f32 0.5, %v181_v47 }
 0x1a4   :  { %274 = vtanh.f32 %v210_v48  ;;  %v199_v52 = vmul.f32 %v195_v49, %v186_v45 }
 0x1a5   :  { %276 = vtanh.f32 %v208_v50  ;;  %v197_v53 = vmul.f32 %v193_v51, %v181_v47 }
 0x1a6   :  { %v203_v54 = vmul.f32 %v199_v52, %v186_v45 }
 0x1a7   :  { %v201_v55 = vmul.f32 %v197_v53, %v181_v47 }
 0x1a8   :  { %v207_v56 = vadd.f32 %v203_v54, %v186_v45 }
 0x1a9   :  { %v205_v57 = vadd.f32 %v201_v55, %v181_v47 }
 0x1aa   :  { %v275_v58 = vpop.eup %274  ;;  %v211_v59 = vmul.f32 0.7978846, %v207_v56 }
 0x1ab   :  { %v277_v60 = vpop.eup %276  ;;  %v218_v62 = vadd.f32 1.0, %v275_v58  ;;  %v209_v63 = vmul.f32 0.7978846, %v205_v57 }
 0x1ac   :  { %v216_v1 = vadd.f32 1.0, %v277_v60  ;;  %278 = vtanh.f32 %v211_v59 }
 0x1ad   :  { %v222_v2 = vmul.f32 %v218_v62, %v190_v61  ;;  %280 = vtanh.f32 %v209_v63 }
 0x1ae   :  { %v220_v3 = vmul.f32 %v216_v1, %v188_v0 }
 0x1af   :  { %v226_v4 = vpack.c.bf16 %v222_v2, %v222_v2 }
 0x1b0   :  { %v224_v5 = vpack.c.bf16 %v220_v3, %v220_v3 }
 0x1b1   :  { %231 = vst.msk [vmem:[%s385_s5 + $0x8] sm:$0xf] %vm228_vm14, %v226_v4 }
 0x1b2   :  { %v279_v6 = vpop.eup %278  ;;  %229 = vst.msk [vmem:[%s385_s5] sm:$0xf] %vm228_vm14, %v224_v5 }
 0x1b3   :  { %v281_v7 = vpop.eup %280  ;;  %v219_v9 = vadd.f32 1.0, %v279_v6 }
 0x1b4   :  { %v217_v11 = vadd.f32 1.0, %v281_v7 }
 0x1b5   :  { %v223_v12 = vmul.f32 %v219_v9, %v191_v8 }
 0x1b6   :  { %v221_v13 = vmul.f32 %v217_v11, %v189_v10 }
 0x1b7   :  { %v227_v14 = vpack.c.bf16 %v223_v12, %v223_v12 }
 0x1b8   :  { %v225_v15 = vpack.c.bf16 %v221_v13, %v221_v13 }
 0x1b9   :  { %232 = vst.msk [vmem:[%s385_s5 + $0xc] sm:$0xf] %vm228_vm14, %v227_v14 }
 0x1ba   :  { %230 = vst.msk [vmem:[%s385_s5 + $0x4] sm:$0xf] %vm228_vm14, %v225_v15 }

// kernel: _lambda_.19
= control target key start
LH: loop header
LB: loop body
LE: loop exit
PB: predicated region body
PF: predicated region fallthrough
CT: control target
= control target key end

     0   :  { %s963_s18 = smov 0   ;;  %s965_s19 = smov 0   ;;  %s1095_s0 = inlined_call_operand.vmem [shape: bf16[2,16,64], index: 0, kind: input, shape index: {}]   ;;  %s1096_s1 = inlined_call_operand.vmem [shape: f32[2,16,64], index: 1, kind: input, shape index: {}]   ;;  %s1097_s2 = inlined_call_operand.vmem [shape: f32[8,64], index: 2, kind: input, shape index: {}]   ;;  %s1098_s3 = inlined_call_operand.vmem [shape: f32[2,16,16], index: 3, kind: input, shape index: {}]   ;;  %s1099_s4 = inlined_call_operand.vmem [shape: f32[1,64], index: 4, kind: input, shape index: {}]   ;;  %s1100_s5 = inlined_call_operand.vmem [shape: bf16[2,16,64], index: 5, kind: output, shape index: {}]  }
   0x1   :  { %s967_s20 = smov 0  }
   0x2 LB: > { %s27_s21 = sadd.s32 1, %s919_s19  ;;  %p811_p0 = scmp.ge.s32.totalorder %s923_s20, 1  ;;  %s923_s20 = sphi %s967_s20, %s15_s20   ;;  %s919_s19 = sphi %s965_s19, %s1102_s19   ;;  %s915_s18 = sphi %s963_s18, %s1101_s18  }
   0x3   : > { %p29_p1 = scmp.ge.s32.totalorder %s27_s21, 2  ;;  %p248_p2 = scmp.lt.s32.totalorder %s923_s20, 3 }
   0x5   : > { %s1104_s21 = smov (%p29_p1, %s27_s21), 0  ;;  %p249_p3 = pnand %p811_p0, %p248_p2 }
   0x6   : > { %p302_p4 = scmp.lt.s32.totalorder (!%p249_p3), %s915_s18, 1  ;;  %s1013_s15 = smov (!%p249_p3), 0  }
   0x7   : > { %252 = sbr.rel (%p249_p3) target bundleno = 228 (0xe4), region = 40 }
   0xc   : > { %v984_v0 = vld [vmem:[%s1097_s2] sm:$0xff]  ;;  %s1106_s18 = smov (!%p302_p4, %s915_s18), 1  ;;  %v1011_v2 = vmov 0.0  }
   0xd   : > { %v989_v1 = vld [vmem:[%s1099_s4] sm:$0x1]  ;;  %s825_s26 = sshll.u32 %s1106_s18, 3  ;;  %s826_s27 = sshll.u32 %s1106_s18, 4 }
   0xe   : > { %s994_s30 = scalar_lea.vmem %s1095_s0, %s825_s26  ;;  %s999_s8 = scalar_lea.vmem %s1096_s1, %s826_s27 }
   0xf   : > { %s1004_s11 = scalar_lea.vmem %s1098_s3, %s826_s27  ;;  %s1009_s14 = scalar_lea.vmem %s1100_s5, %s825_s26 }
  0x10 LB: >> { %v359_v3 = vlaneseq  ;;  %s1022_s16 = sshll.u32 %s931_s15, 3  ;;  %vm546_vm0 = vcmask 523264   ;;  %vm624_vm1 = vcmask 1040384   ;;  %vm626_vm2 = vcmask 1041408   ;;  %s345_s15 = sadd.s32 1, %s931_s15   ;;  %s931_s15 = sphi %s1013_s15, %s345_s15   ;;  %v927_v2 = vphi %v1011_v2, %v615_v2  }
  0x11   : >> { %s356_s17 = scalar_lea.vmem %s1004_s11, %s1022_s16  ;;  %s354_s18 = scalar_lea.vmem %s999_s8, %s1022_s16  ;;  %vm628_vm3 = vcmask 1042432   ;;  %vm630_vm4 = vcmask 1043456   ;;  %vm632_vm5 = vcmask 1044480   ;;  %vm634_vm6 = vcmask 1045504  }
  0x12   : >> { %v360_v4 = vshrl.u32 %v359_v3, 7  ;;  %v357_v5 = vld [vmem:[%s356_s17] sm:$0xff]  ;;  %s348_s22 = sshra.s32 %s1022_s16, 3  ;;  %vm636_vm7 = vcmask 1046528   ;;  %vm646_vm8 = vcmask 519168   ;;  %p342_p5 = scmp.ge.s32.totalorder %s345_s15, 2  }
  0x13   : >> { %v372_v6 = vperm.slane %v357_v5, 2  ;;  %v358_v7 = vperm.slane %v357_v5, 0  ;;  %v386_v8 = vperm.slane %v357_v5, 4  ;;  %v379_v9 = vperm.slane %v357_v5, 3  ;;  %v1028_v15 = vld [vmem:[%s354_s18] sm:$0xff]  ;;  %s1032_s23 = sshll.u32 %s348_s22, 2 }
  0x14   : >> { %870 = vset.pattern.permute.xlu1 %v360_v4  ;;  %869 = vset.pattern.permute.xlu0 %v360_v4  ;;  %v365_v10 = vperm.slane %v357_v5, 1  ;;  %v393_v11 = vperm.slane %v357_v5, 5  ;;  %v416_v12 = vadd.s32 8, %v360_v4  ;;  %v400_v13 = vperm.slane %v357_v5, 6  ;;  %s351_s24 = scalar_lea.vmem %s994_s30, %s1032_s23  ;;  %s645_s25 = scalar_lea.vmem %s1009_s14, %s1032_s23 }
  0x15   : >> { %871 = vset.pattern.permute.xlu2 %v360_v4  ;;  %v407_v14 = vperm.slane %v357_v5, 7  ;;  %v470_v16 = vperm.slane %v1028_v15, 0  ;;  %v463_v18 = vrot.slane %v1028_v15, 1  ;;  %v1038_v21 = vld [vmem:[%s351_s24] sm:$0xf]  ;;  %v464_v22 = vrot.slane %v1028_v15, 2 }
  0x16   : >> { %v353_v24 = vunpack.c.l.bf16 %v1038_v21  ;;  %v465_v28 = vrot.slane %v1028_v15, 3  ;;  %v466_v39 = vrot.slane %v1028_v15, 4  ;;  %v467_v55 = vrot.slane %v1028_v15, 5 }
  0x17   : >> { %v486_v17 = vmul.f32 %v470_v16, %v984_v0  ;;  %v471_v20 = vperm.slane %v463_v18, 0  ;;  %v472_v25 = vperm.slane %v464_v22, 0  ;;  %v468_v5 = vrot.slane %v1028_v15, 6 }
  0x18   : >> { %v1046_v27 = vmul.f32 %v1028_v15, %v353_v24  ;;  %v473_v33 = vperm.slane %v465_v28, 0  ;;  %v474_v46 = vperm.slane %v466_v39, 0  ;;  %v475_v61 = vperm.slane %v467_v55, 0 }
  0x19   : >> { %v494_v19 = vmul.f32 1.442695, %v486_v17  ;;  %v487_v23 = vmul.f32 %v471_v20, %v984_v0  ;;  %v488_v30 = vmul.f32 %v472_v25, %v984_v0 }
  0x1a   : >> { %v519_v31 = vperm.slane %v1046_v27, 0  ;;  %v512_v37 = vrot.slane %v1046_v27, 1  ;;  %v489_v40 = vmul.f32 %v473_v33, %v984_v0  ;;  %v513_v44 = vrot.slane %v1046_v27, 2 }
  0x1b   : >> { %877 = vpow2.f32 %v494_v19  ;;  %v496_v26 = vmul.f32 1.442695, %v487_v23  ;;  %v498_v35 = vmul.f32 1.442695, %v488_v30  ;;  %v490_v54 = vmul.f32 %v474_v46, %v984_v0 }
  0x1c   : >> { %377 = vperm.xlu1 %870, %v372_v6   ;;  %363 = vperm.xlu0 %869, %v358_v7   ;;  %v520_v43 = vperm.slane %v512_v37, 0  ;;  %v500_v47 = vmul.f32 1.442695, %v489_v40  ;;  %v521_v52 = vperm.slane %v513_v44, 0  ;;  %v514_v59 = vrot.slane %v1046_v27, 3 }
  0x1d   : >> { %391 = vperm.xlu2 %871, %v386_v8   ;;  %879 = vpow2.f32 %v496_v26  ;;  %v502_v60 = vmul.f32 1.442695, %v490_v54  ;;  %v516_v20 = vrot.slane %v1046_v27, 5 }
  0x1e   : >> { %881 = vpow2.f32 %v498_v35  ;;  %v517_v35 = vrot.slane %v1046_v27, 6 }
  0x1f   : >> { %883 = vpow2.f32 %v500_v47  ;;  %v524_v26 = vperm.slane %v516_v20, 0 }
  0x20   : >> { %885 = vpow2.f32 %v502_v60 }
  0x21   : >> { %v878_v29 = vpop.eup %877 }
  0x22   : >> { %v543_v32 = vmul.f32 %v927_v2, %v878_v29  ;;  %v522_v2 = vperm.slane %v514_v59, 0 }
  0x23   : >> { %v880_v41 = vpop.eup %879 }
  0x24   : >> { %384 = vperm.xlu1 %870, %v379_v9   ;;  %370 = vperm.xlu0 %869, %v365_v10   ;;  %v882_v51 = vpop.eup %881 }
  0x25   : >> { %398 = vperm.xlu2 %871, %v393_v11   ;;  %v884_v63 = vpop.eup %883 }
  0x2c   : >> { %872 = vset.pattern.permute.xlu1 %v416_v12  ;;  %405 = vperm.xlu0 %869, %v400_v13  }
  0x2d   : >> { %873 = vset.pattern.permute.xlu2 %v416_v12 }
  0x34   : >> { %418 = vperm.xlu1 %872, %v358_v7   ;;  %874 = vset.pattern.permute.xlu0 %v416_v12 }
  0x35   : >> { %424 = vperm.xlu2 %873, %v365_v10   ;;  %v476_v10 = vperm.slane %v468_v5, 0 }
  0x37   : >> { %v492_v17 = vmul.f32 %v476_v10, %v984_v0 }
  0x39   : >> { %v506_v22 = vmul.f32 1.442695, %v492_v17 }
  0x3c   : >> { %875 = vset.pattern.permute.xlu1 %v360_v4  ;;  %430 = vperm.xlu0 %874, %v372_v6   ;;  %v491_v4 = vmul.f32 %v475_v61, %v984_v0  ;;  %v515_v6 = vrot.slane %v1046_v27, 4 }
  0x3d   : >> { %436 = vperm.xlu2 %873, %v379_v9  }
  0x3e   : >> { %v504_v9 = vmul.f32 1.442695, %v491_v4 }
  0x40   : >> { %887 = vpow2.f32 %v504_v9 }
  0x41   : >> { %889 = vpow2.f32 %v506_v22 }
  0x44   : >> { %412 = vperm.xlu1 %875, %v407_v14   ;;  %454 = vperm.xlu0 %874, %v400_v13  }
  0x45   : >> { %448 = vperm.xlu2 %873, %v393_v11   ;;  %v523_v11 = vperm.slane %v515_v6, 0 }
  0x4c   : >> { %876 = vset.pattern.permute.xlu1 %v416_v12 }
  0x54   : >> { %442 = vperm.xlu1 %876, %v386_v8  }
  0x5c   : >> { %460 = vperm.xlu1 %876, %v407_v14   ;;  %v886_v14 = vpop.eup %885 }
  0x5d   : >> { %v888_v25 = vpop.eup %887 }
  0x77   : >> { %v392_v42 = vpop.permute.xlu2 %391 }
  0x78   : >> { %v539_v18 = vmul.f32 %v523_v11, %v392_v42 }
  0x7f   : >> { %v399_v58 = vpop.permute.xlu2 %398 }
  0x8e   : >> { %v364_v34 = vpop.permute.xlu0 %363  ;;  %v378_v49 = vpop.permute.xlu1 %377 }
  0x8f   : >> { %v535_v36 = vmul.f32 %v519_v31, %v364_v34  ;;  %v537_v57 = vmul.f32 %v521_v52, %v378_v49  ;;  %v425_v12 = vpop.permute.xlu2 %424  ;;  %v540_v34 = vmul.f32 %v524_v26, %v399_v58 }
  0x91   : >> { %v544_v38 = vadd.f32 %v543_v32, %v535_v36  ;;  %v469_v32 = vrot.slane %v1028_v15, 7 }
  0x93   : >> { %v554_v45 = vmul.f32 %v880_v41, %v544_v38  ;;  %v477_v40 = vperm.slane %v469_v32, 0  ;;  %v890_v41 = vpop.eup %889 }
  0x96   : >> { %v371_v48 = vpop.permute.xlu0 %370  ;;  %v385_v3 = vpop.permute.xlu1 %384 }
  0x97   : >> { %v536_v50 = vmul.f32 %v520_v43, %v371_v48  ;;  %v538_v8 = vmul.f32 %v522_v2, %v385_v3  ;;  %v437_v28 = vpop.permute.xlu2 %436  ;;  %v525_v43 = vperm.slane %v517_v35, 0  ;;  %v493_v48 = vmul.f32 %v477_v40, %v984_v0 }
  0x98   : >> { %v518_v2 = vrot.slane %v1046_v27, 7 }
  0x99   : >> { %v555_v53 = vadd.f32 %v554_v45, %v536_v50  ;;  %v508_v58 = vmul.f32 1.442695, %v493_v48 }
  0x9a   : >> { %v526_v9 = vperm.slane %v518_v2, 0 }
  0x9b   : >> { %v564_v56 = vmul.f32 %v882_v51, %v555_v53  ;;  %v556_v37 = vmul.f32 %v555_v53, %v425_v12  ;;  %891 = vpow2.f32 %v508_v58 }
  0x9d   : >> { %v565_v62 = vadd.f32 %v564_v56, %v537_v57  ;;  %v557_v45 = vsel %vm546_vm0, %v556_v37, 0.0 }
  0x9e   : >> { %v406_v16 = vpop.permute.xlu0 %405  ;;  %v558_v50 = vrot.slane %v557_v45, 4 }
  0x9f   : >> { %v574_v7 = vmul.f32 %v884_v63, %v565_v62  ;;  %v449_v15 = vpop.permute.xlu2 %448  ;;  %v541_v51 = vmul.f32 %v525_v43, %v406_v16 }
  0xa0   : >> { %v559_v60 = vadd.f32 %v558_v50, %v557_v45 }
  0xa1   : >> { %v575_v13 = vadd.f32 %v574_v7, %v538_v8  ;;  %v892_v16 = vpop.eup %891 }
  0xa2   : >> { %v560_v5 = vrot.slane %v559_v60, 2 }
  0xa3   : >> { %v584_v19 = vmul.f32 %v886_v14, %v575_v13  ;;  %v576_v46 = vmul.f32 %v575_v13, %v437_v28 }
  0xa4   : >> { %v561_v17 = vadd.f32 %v560_v5, %v559_v60 }
  0xa5   : >> { %v585_v23 = vadd.f32 %v584_v19, %v539_v18  ;;  %v577_v52 = vsel %vm546_vm0, %v576_v46, 0.0 }
  0xa6   : >> { %v419_v29 = vpop.permute.xlu1 %418  ;;  %v578_v61 = vrot.slane %v577_v52, 4 }
  0xa7   : >> { %v594_v31 = vmul.f32 %v888_v25, %v585_v23  ;;  %v545_v33 = vmul.f32 %v544_v38, %v419_v29 }
  0xa8   : >> { %v579_v6 = vadd.f32 %v578_v61, %v577_v52 }
  0xa9   : >> { %v595_v39 = vadd.f32 %v594_v31, %v540_v34  ;;  %v547_v42 = vsel %vm546_vm0, %v545_v33, 0.0 }
  0xaa   : >> { %v548_v47 = vrot.slane %v547_v42, 4  ;;  %v580_v18 = vrot.slane %v579_v6, 2 }
  0xab   : >> { %v604_v38 = vmul.f32 %v890_v41, %v595_v39  ;;  %v596_v53 = vmul.f32 %v595_v39, %v449_v15 }
  0xac   : >> { %v549_v55 = vadd.f32 %v548_v47, %v547_v42  ;;  %v581_v31 = vadd.f32 %v580_v18, %v579_v6 }
  0xad   : >> { %v605_v57 = vadd.f32 %v604_v38, %v541_v51  ;;  %v597_v63 = vsel %vm546_vm0, %v596_v53, 0.0 }
  0xae   : >> { %v431_v30 = vpop.permute.xlu0 %430  ;;  %v550_v3 = vrot.slane %v549_v55, 2  ;;  %v598_v7 = vrot.slane %v597_v63, 4  ;;  %v582_v41 = vrot.slane %v581_v31, 1 }
  0xaf   : >> { %v566_v36 = vmul.f32 %v565_v62, %v431_v30  ;;  %v614_v29 = vmul.f32 %v892_v16, %v605_v57  ;;  %v562_v30 = vrot.slane %v561_v17, 1 }
  0xb0   : >> { %v551_v10 = vadd.f32 %v550_v3, %v549_v55  ;;  %v599_v19 = vadd.f32 %v598_v7, %v597_v63  ;;  %v583_v48 = vadd.f32 %v582_v41, %v581_v31 }
  0xb1   : >> { %v567_v44 = vsel %vm546_vm0, %v566_v36, 0.0  ;;  %v563_v40 = vadd.f32 %v562_v30, %v561_v17 }
  0xb2   : >> { %v568_v49 = vrot.slane %v567_v44, 4  ;;  %v552_v22 = vrot.slane %v551_v10, 1  ;;  %v600_v32 = vrot.slane %v599_v19, 2 }
  0xb4   : >> { %v569_v59 = vadd.f32 %v568_v49, %v567_v44  ;;  %v553_v34 = vadd.f32 %v552_v22, %v551_v10  ;;  %v601_v42 = vadd.f32 %v600_v32, %v599_v19 }
  0xb6   : >> { %v455_v54 = vpop.permute.xlu0 %454  ;;  %v413_v56 = vpop.permute.xlu1 %412  ;;  %v570_v4 = vrot.slane %v569_v59, 2  ;;  %v625_v45 = vsel %vm624_vm1, %v553_v34, %v563_v40  ;;  %v602_v49 = vrot.slane %v601_v42, 1 }
  0xb7   : >> { %v606_v62 = vmul.f32 %v605_v57, %v455_v54  ;;  %v542_v20 = vmul.f32 %v526_v9, %v413_v56  ;;  %v639_v56 = vperm.slane %v989_v1, 0 }
  0xb8   : >> { %v571_v12 = vadd.f32 %v570_v4, %v569_v59  ;;  %v603_v57 = vadd.f32 %v602_v49, %v601_v42 }
  0xb9   : >> { %v607_v8 = vsel %vm546_vm0, %v606_v62, 0.0  ;;  %v615_v2 = vadd.f32 %v614_v29, %v542_v20   ;;  %v641_v62 = vmul.f32 %v639_v56, %v353_v24 }
  0xba   : >> { %v608_v13 = vrot.slane %v607_v8, 4  ;;  %v572_v26 = vrot.slane %v571_v12, 1 }
  0xbc   : >> { %v609_v28 = vadd.f32 %v608_v13, %v607_v8  ;;  %v573_v36 = vadd.f32 %v572_v26, %v571_v12 }
  0xbe   : >> { %v610_v37 = vrot.slane %v609_v28, 2  ;;  %v627_v15 = vsel %vm626_vm2, %v625_v45, %v573_v36 }
  0xbf   : >> { %v629_v52 = vsel %vm628_vm3, %v627_v15, %v583_v48 }
  0xc0   : >> { %v611_v38 = vadd.f32 %v610_v37, %v609_v28 }
  0xc2   : >> { %v612_v54 = vrot.slane %v611_v38, 1 }
  0xc4   : >> { %v613_v61 = vadd.f32 %v612_v54, %v611_v38 }
  0xc6   : >> { %v443_v11 = vpop.permute.xlu1 %442 }
  0xc7   : >> { %v586_v14 = vmul.f32 %v585_v23, %v443_v11 }
  0xc9   : >> { %v587_v27 = vsel %vm546_vm0, %v586_v14, 0.0 }
  0xca   : >> { %v588_v25 = vrot.slane %v587_v27, 4 }
  0xcc   : >> { %v589_v33 = vadd.f32 %v588_v25, %v587_v27 }
  0xce   : >> { %v590_v23 = vrot.slane %v589_v33, 2  ;;  %v461_v35 = vpop.permute.xlu1 %460 }
  0xcf   : >> { %v616_v39 = vmul.f32 %v615_v2, %v461_v35 }
  0xd0   : >> { %v591_v43 = vadd.f32 %v590_v23, %v589_v33 }
  0xd1   : >> { %v617_v44 = vsel %vm546_vm0, %v616_v39, 0.0 }
  0xd2   : >> { %v592_v46 = vrot.slane %v591_v43, 1  ;;  %v618_v47 = vrot.slane %v617_v44, 4 }
  0xd4   : >> { %v593_v50 = vadd.f32 %v592_v46, %v591_v43  ;;  %v619_v51 = vadd.f32 %v618_v47, %v617_v44 }
  0xd6   : >> { %v620_v53 = vrot.slane %v619_v51, 2  ;;  %v631_v55 = vsel %vm630_vm4, %v629_v52, %v593_v50 }
  0xd7   : >> { %v633_v59 = vsel %vm632_vm5, %v631_v55, %v603_v57 }
  0xd8   : >> { %v621_v58 = vadd.f32 %v620_v53, %v619_v51  ;;  %v635_v3 = vsel %vm634_vm6, %v633_v59, %v613_v61 }
  0xda   : >> { %v622_v60 = vrot.slane %v621_v58, 1 }
  0xdc   : >> { %v623_v63 = vadd.f32 %v622_v60, %v621_v58 }
  0xde   : >> { %v637_v4 = vsel %vm636_vm7, %v635_v3, %v623_v63 }
  0xdf   : >> { %v642_v5 = vadd.f32 %v641_v62, %v637_v4  ;;  %344 = sbr.rel (!%p342_p5) target bundleno = 16 (0x10), region = 93 }
  0xe1   : >> { %v643_v6 = vpack.c.bf16 %v642_v5, %v642_v5 }
  0xe3   : >> { %647 = vst.msk [vmem:[%s645_s25] sm:$0xf] %vm646_vm8, %v643_v6 }
  0xe4 PF: > { %s15_s20 = sadd.s32 1, %s923_s20   ;;  %s1101_s18 = smov %s919_s19 }
  0xe5   : > { %p12_p6 = scmp.ge.s32.totalorder %s15_s20, 4   ;;  %s1102_s19 = smov %s1104_s21 }
  0xe7   :  { %14 = sbr.rel (!%p12_p6) target bundleno = 2 (0x2), region = 104 }

// kernel: _lambda_.22
= control target key start
LH: loop header
LB: loop body
LE: loop exit
PB: predicated region body
PF: predicated region fallthrough
CT: control target
= control target key end

     0   :  { %vm49_vm0 = vcmask 261120   ;;  %vm115_vm1 = vcmask 125952   ;;  %s208_s1 = inlined_call_operand.vmem [shape: bf16[32,16], index: 1, kind: input, shape index: {}]   ;;  %s209_s2 = inlined_call_operand.vmem [shape: f32[1,16], index: 2, kind: input, shape index: {}]   ;;  %s210_s0 = inlined_call_operand.vmem [shape: bf16[32,32], index: 0, kind: input, shape index: {}]   ;;  %s211_s3 = inlined_call_operand.vmem [shape: bf16[32,16], index: 3, kind: output, shape index: {}]  }
   0x1   :  { %v145_v0 = vld [vmem:[%s208_s1 + $0x8] sm:$0xff]  ;;  %v144_v1 = vld [vmem:[%s208_s1] sm:$0xff] }
   0x2   :  { %62 = vmatpush.bf16.msra.mxu0 %v145_v0  ;;  %146 = vmatpush.bf16.msra.mxu1 %v145_v0  ;;  %v142_v2 = vld [vmem:[%s210_s0] sm:$0xff]  ;;  %v143_v3 = vld [vmem:[%s210_s0 + $0x8] sm:$0xff] }
   0x3   :  { %v148_v4 = vld [vmem:[%s209_s2] ss:$0 sm:$0xff] }
   0x6   :  { %63 = vmatpush.bf16.msra.mxu0 %v144_v1  ;;  %147 = vmatpush.bf16.msra.mxu1 %v144_v1 }
   0x9   :  { %140 = vmatmul.msk.bf16.vlgmr.msra.gmra.mxu0 %vm49_vm0, %v142_v2  ;;  %141 = vmatmul.msk.bf16.vlgmr.msra.gmra.mxu1 %vm49_vm0, %v143_v3 }
  0x86   :  { %v65_v5 = vpop.f32.mrf.mxu0  ;;  %v70_v6 = vpop.f32.mrf.mxu1 }
  0x87   :  { %v66_v7 = vadd.f32 %v148_v4, %v65_v5  ;;  %v71_v8 = vadd.f32 %v148_v4, %v70_v6 }
  0x89   :  { %v79_v9 = vmul.f32 0.044715, %v66_v7  ;;  %v81_v10 = vmul.f32 0.044715, %v71_v8  ;;  %v75_v33 = vmul.f32 0.5, %v66_v7  ;;  %v77_v37 = vmul.f32 0.5, %v71_v8 }
  0x8b   :  { %v83_v11 = vmul.f32 %v79_v9, %v66_v7  ;;  %v85_v12 = vmul.f32 %v81_v10, %v71_v8 }
  0x8d   :  { %v87_v13 = vmul.f32 %v83_v11, %v66_v7  ;;  %v89_v14 = vmul.f32 %v85_v12, %v71_v8 }
  0x8e   :  { %v67_v15 = vpop.f32.mrf.mxu0  ;;  %v72_v16 = vpop.f32.mrf.mxu1 }
  0x8f   :  { %v91_v17 = vadd.f32 %v87_v13, %v66_v7  ;;  %v93_v18 = vadd.f32 %v89_v14, %v71_v8  ;;  %v68_v19 = vadd.f32 %v148_v4, %v67_v15  ;;  %v73_v20 = vadd.f32 %v148_v4, %v72_v16 }
  0x91   :  { %v95_v21 = vmul.f32 0.7978846, %v91_v17  ;;  %v97_v22 = vmul.f32 0.7978846, %v93_v18  ;;  %v80_v23 = vmul.f32 0.044715, %v68_v19 }
  0x92   :  { %v82_v24 = vmul.f32 0.044715, %v73_v20  ;;  %v76_v45 = vmul.f32 0.5, %v68_v19  ;;  %v78_v47 = vmul.f32 0.5, %v73_v20 }
  0x93   :  { %149 = vtanh.f32 %v95_v21  ;;  %v84_v25 = vmul.f32 %v80_v23, %v68_v19 }
  0x94   :  { %151 = vtanh.f32 %v97_v22  ;;  %v86_v26 = vmul.f32 %v82_v24, %v73_v20 }
  0x95   :  { %v88_v27 = vmul.f32 %v84_v25, %v68_v19 }
  0x96   :  { %v90_v28 = vmul.f32 %v86_v26, %v73_v20 }
  0x97   :  { %v92_v29 = vadd.f32 %v88_v27, %v68_v19 }
  0x98   :  { %v94_v30 = vadd.f32 %v90_v28, %v73_v20 }
  0x99   :  { %v150_v31 = vpop.eup %149  ;;  %v96_v35 = vmul.f32 0.7978846, %v92_v29 }
  0x9a   :  { %v152_v32 = vpop.eup %151  ;;  %v103_v34 = vadd.f32 1.0, %v150_v31  ;;  %v98_v36 = vmul.f32 0.7978846, %v94_v30 }
  0x9b   :  { %v105_v38 = vadd.f32 1.0, %v152_v32  ;;  %153 = vtanh.f32 %v96_v35 }
  0x9c   :  { %v107_v39 = vmul.f32 %v103_v34, %v75_v33  ;;  %155 = vtanh.f32 %v98_v36 }
  0x9d   :  { %v109_v40 = vmul.f32 %v105_v38, %v77_v37 }
  0x9e   :  { %v111_v41 = vpack.c.bf16 %v107_v39, %v107_v39 }
  0x9f   :  { %v113_v42 = vpack.c.bf16 %v109_v40, %v109_v40 }
  0xa0   :  { %116 = vst.msk [vmem:[%s211_s3] sm:$0xf] %vm115_vm1, %v111_v41 }
  0xa1   :  { %118 = vst.msk [vmem:[%s211_s3 + $0x8] sm:$0xf] %vm115_vm1, %v113_v42  ;;  %v154_v43 = vpop.eup %153 }
  0xa2   :  { %v156_v44 = vpop.eup %155  ;;  %v104_v46 = vadd.f32 1.0, %v154_v43 }
  0xa3   :  { %v106_v48 = vadd.f32 1.0, %v156_v44 }
  0xa4   :  { %v108_v49 = vmul.f32 %v104_v46, %v76_v45 }
  0xa5   :  { %v110_v50 = vmul.f32 %v106_v48, %v78_v47 }
  0xa6   :  { %v112_v51 = vpack.c.bf16 %v108_v49, %v108_v49 }
  0xa7   :  { %v114_v52 = vpack.c.bf16 %v110_v50, %v110_v50 }
  0xa8   :  { %117 = vst.msk [vmem:[%s211_s3 + $0x4] sm:$0xf] %vm115_vm1, %v112_v51 }
  0xa9   :  { %119 = vst.msk [vmem:[%s211_s3 + $0xc] sm:$0xf] %vm115_vm1, %v114_v52 }

// kernel: _lambda_.23
= control target key start
LH: loop header
LB: loop body
LE: loop exit
PB: predicated region body
PF: predicated region fallthrough
CT: control target
= control target key end

     0   :  { %vm41_vm0 = vcmask 130048   ;;  %vm107_vm1 = vcmask 60416   ;;  %s191_s1 = inlined_call_operand.vmem [shape: bf16[16,8], index: 1, kind: input, shape index: {}]   ;;  %s192_s0 = inlined_call_operand.vmem [shape: bf16[32,16], index: 0, kind: input, shape index: {}]   ;;  %s193_s2 = inlined_call_operand.vmem [shape: f32[1,8], index: 2, kind: input, shape index: {}]   ;;  %s194_s3 = inlined_call_operand.vmem [shape: bf16[32,8], index: 3, kind: output, shape index: {}]  }
   0x1   :  { %v132_v0 = vld [vmem:[%s191_s1] sm:$0xff]  ;;  %v131_v2 = vld [vmem:[%s192_s0 + $0x8] sm:$0xff] }
   0x2   :  { %v130_v1 = vld [vmem:[%s192_s0] sm:$0xff]  ;;  %55 = vmatpush.bf16.msra.mxu0 %v132_v0  ;;  %133 = vmatpush.bf16.msra.mxu1 %v132_v0 }
   0x3   :  { %v134_v3 = vld [vmem:[%s193_s2] ss:$0 sm:$0xff] }
   0x5   :  { %128 = vmatmul.msk.bf16.vlgmr.msra.gmra.mxu0 %vm41_vm0, %v130_v1  ;;  %129 = vmatmul.msk.bf16.vlgmr.msra.gmra.mxu1 %vm41_vm0, %v131_v2 }
  0x82   :  { %v57_v4 = vpop.f32.mrf.mxu0  ;;  %v62_v5 = vpop.f32.mrf.mxu1 }
  0x83   :  { %v58_v6 = vadd.f32 %v134_v3, %v57_v4  ;;  %v63_v7 = vadd.f32 %v134_v3, %v62_v5 }
  0x85   :  { %v71_v8 = vmul.f32 0.044715, %v58_v6  ;;  %v73_v9 = vmul.f32 0.044715, %v63_v7  ;;  %v67_v32 = vmul.f32 0.5, %v58_v6  ;;  %v69_v36 = vmul.f32 0.5, %v63_v7 }
  0x87   :  { %v75_v10 = vmul.f32 %v71_v8, %v58_v6  ;;  %v77_v11 = vmul.f32 %v73_v9, %v63_v7 }
  0x89   :  { %v79_v12 = vmul.f32 %v75_v10, %v58_v6  ;;  %v81_v13 = vmul.f32 %v77_v11, %v63_v7 }
  0x8a   :  { %v59_v14 = vpop.f32.mrf.mxu0  ;;  %v64_v15 = vpop.f32.mrf.mxu1 }
  0x8b   :  { %v83_v16 = vadd.f32 %v79_v12, %v58_v6  ;;  %v85_v17 = vadd.f32 %v81_v13, %v63_v7  ;;  %v60_v18 = vadd.f32 %v134_v3, %v59_v14  ;;  %v65_v19 = vadd.f32 %v134_v3, %v64_v15 }
  0x8d   :  { %v87_v20 = vmul.f32 0.7978846, %v83_v16  ;;  %v89_v21 = vmul.f32 0.7978846, %v85_v17  ;;  %v72_v22 = vmul.f32 0.044715, %v60_v18 }
  0x8e   :  { %v74_v23 = vmul.f32 0.044715, %v65_v19  ;;  %v68_v44 = vmul.f32 0.5, %v60_v18  ;;  %v70_v46 = vmul.f32 0.5, %v65_v19 }
  0x8f   :  { %135 = vtanh.f32 %v87_v20  ;;  %v76_v24 = vmul.f32 %v72_v22, %v60_v18 }
  0x90   :  { %137 = vtanh.f32 %v89_v21  ;;  %v78_v25 = vmul.f32 %v74_v23, %v65_v19 }
  0x91   :  { %v80_v26 = vmul.f32 %v76_v24, %v60_v18 }
  0x92   :  { %v82_v27 = vmul.f32 %v78_v25, %v65_v19 }
  0x93   :  { %v84_v28 = vadd.f32 %v80_v26, %v60_v18 }
  0x94   :  { %v86_v29 = vadd.f32 %v82_v27, %v65_v19 }
  0x95   :  { %v136_v30 = vpop.eup %135  ;;  %v88_v34 = vmul.f32 0.7978846, %v84_v28 }
  0x96   :  { %v138_v31 = vpop.eup %137  ;;  %v95_v33 = vadd.f32 1.0, %v136_v30  ;;  %v90_v35 = vmul.f32 0.7978846, %v86_v29 }
  0x97   :  { %v97_v37 = vadd.f32 1.0, %v138_v31  ;;  %139 = vtanh.f32 %v88_v34 }
  0x98   :  { %v99_v38 = vmul.f32 %v95_v33, %v67_v32  ;;  %141 = vtanh.f32 %v90_v35 }
  0x99   :  { %v101_v39 = vmul.f32 %v97_v37, %v69_v36 }
  0x9a   :  { %v103_v40 = vpack.c.bf16 %v99_v38, %v99_v38 }
  0x9b   :  { %v105_v41 = vpack.c.bf16 %v101_v39, %v101_v39 }
  0x9c   :  { %108 = vst.msk [vmem:[%s194_s3] sm:$0xf] %vm107_vm1, %v103_v40 }
  0x9d   :  { %110 = vst.msk [vmem:[%s194_s3 + $0x8] sm:$0xf] %vm107_vm1, %v105_v41  ;;  %v140_v42 = vpop.eup %139 }
  0x9e   :  { %v142_v43 = vpop.eup %141  ;;  %v96_v45 = vadd.f32 1.0, %v140_v42 }
  0x9f   :  { %v98_v47 = vadd.f32 1.0, %v142_v43 }
  0xa0   :  { %v100_v48 = vmul.f32 %v96_v45, %v68_v44 }
  0xa1   :  { %v102_v49 = vmul.f32 %v98_v47, %v70_v46 }
  0xa2   :  { %v104_v50 = vpack.c.bf16 %v100_v48, %v100_v48 }
  0xa3   :  { %v106_v51 = vpack.c.bf16 %v102_v49, %v102_v49 }
  0xa4   :  { %109 = vst.msk [vmem:[%s194_s3 + $0x4] sm:$0xf] %vm107_vm1, %v104_v50 }
  0xa5   :  { %111 = vst.msk [vmem:[%s194_s3 + $0xc] sm:$0xf] %vm107_vm1, %v106_v51 }

// kernel: _lambda_.29
= control target key start
LH: loop header
LB: loop body
LE: loop exit
PB: predicated region body
PF: predicated region fallthrough
CT: control target
= control target key end

     0   :  { %vm18_vm0 = vcmask 261120   ;;  %v151_v8 = vmov 32.0   ;;  %s229_s0 = inlined_call_operand.vmem [shape: f32[32,32], index: 0, kind: input, shape index: {}]   ;;  %s230_s1 = inlined_call_operand.vmem [shape: f32[1,32], index: 1, kind: input, shape index: {}]   ;;  %s231_s2 = inlined_call_operand.vmem [shape: f32[1,32], index: 2, kind: input, shape index: {}]   ;;  %s232_s3 = inlined_call_operand.vmem [shape: f32[32,32], index: 3, kind: output, shape index: {}]  }
   0x1   :  { %v16_v0 = vld [vmem:[%s229_s0 + $0x10] sm:$0xff]  ;;  %v14_v1 = vld [vmem:[%s229_s0] sm:$0xff]  ;;  %v17_v4 = vld [vmem:[%s229_s0 + $0x18] sm:$0xff]  ;;  %141 = vrcp.f32 %v151_v8 }
   0x2   :  { %v25_v2 = vsel %vm18_vm0, %v16_v0, 0.0  ;;  %v19_v3 = vsel %vm18_vm0, %v14_v1, 0.0  ;;  %v15_v5 = vld [vmem:[%s229_s0 + $0x8] sm:$0xff]  ;;  %v28_v6 = vsel %vm18_vm0, %v17_v4, 0.0  ;;  %v139_v61 = vld [vmem:[%s230_s1] ss:$0 sm:$0xff] }
   0x3   :  { %26 = vadd.xlane.f32.xlu1 %v25_v2  ;;  %20 = vadd.xlane.f32.xlu0 %v19_v3  ;;  %v22_v7 = vsel %vm18_vm0, %v15_v5, 0.0  ;;  %v140_v2 = vld [vmem:[%s231_s2] ss:$0 sm:$0xff] }
   0x7   :  { %v142_v9 = vpop.eup %141 }
   0x8   :  { %v32_v10 = vmul.f32 32.0, %v142_v9  ;;  %vm36_vm1 = vweird.f32 %v142_v9 }
   0xa   :  { %v33_v11 = vsub.f32 1.0, %v32_v10 }
   0xb   :  { %29 = vadd.xlane.f32.xlu1 %v28_v6  ;;  %23 = vadd.xlane.f32.xlu0 %v22_v7 }
   0xc   :  { %v34_v12 = vmul.f32 %v142_v9, %v33_v11 }
   0xe   :  { %v35_v13 = vadd.f32 %v142_v9, %v34_v12 }
  0x10   :  { %v37_v14 = vsel %vm36_vm1, %v142_v9, %v35_v13 }
  0x76   :  { %v27_v15 = vpop.xlane.xlu1 %26  ;;  %v21_v16 = vpop.xlane.xlu0 %20 }
  0x77   :  { %v40_v17 = vmul.f32 %v37_v14, %v27_v15  ;;  %v38_v18 = vmul.f32 %v37_v14, %v21_v16 }
  0x79   :  { %v188_v19 = vsub.f32 %v16_v0, %v40_v17  ;;  %v42_v20 = vsub.f32 %v14_v1, %v38_v18 }
  0x7b   :  { %v48_v21 = vmul.f32 %v188_v19, %v188_v19  ;;  %v46_v22 = vmul.f32 %v42_v20, %v42_v20 }
  0x7d   :  { %v56_v23 = vsel %vm18_vm0, %v48_v21, 0.0  ;;  %v50_v24 = vsel %vm18_vm0, %v46_v22, 0.0 }
  0x7e   :  { %v30_v25 = vpop.xlane.xlu1 %29  ;;  %57 = vadd.xlane.f32.xlu0 %v56_v23  ;;  %51 = vadd.xlane.f32.xlu2 %v50_v24  ;;  %v24_v26 = vpop.xlane.xlu0 %23 }
  0x7f   :  { %v41_v27 = vmul.f32 %v37_v14, %v30_v25  ;;  %v39_v28 = vmul.f32 %v37_v14, %v24_v26 }
  0x81   :  { %v194_v29 = vsub.f32 %v17_v4, %v41_v27  ;;  %v196_v30 = vsub.f32 %v15_v5, %v39_v28 }
  0x83   :  { %v49_v31 = vmul.f32 %v194_v29, %v194_v29  ;;  %v47_v32 = vmul.f32 %v196_v30, %v196_v30 }
  0x85   :  { %v59_v33 = vsel %vm18_vm0, %v49_v31, 0.0  ;;  %v53_v34 = vsel %vm18_vm0, %v47_v32, 0.0 }
  0x86   :  { %60 = vadd.xlane.f32.xlu1 %v59_v33  ;;  %54 = vadd.xlane.f32.xlu2 %v53_v34 }
  0xf1   :  { %v52_v35 = vpop.xlane.xlu2 %51  ;;  %v58_v36 = vpop.xlane.xlu0 %57 }
  0xf2   :  { %v62_v37 = vmul.f32 %v52_v35, %v37_v14  ;;  %v64_v38 = vmul.f32 %v58_v36, %v37_v14 }
  0xf4   :  { %v66_v39 = vadd.f32 1e-05, %v62_v37  ;;  %v68_v40 = vadd.f32 1e-05, %v64_v38 }
  0xf6   :  { %143 = vrsqrt.f32 %v66_v39  ;;  %vm76_vm4 = vweird.f32 %v66_v39  ;;  %vm96_vm6 = vweird.f32 %v68_v40 }
  0xf7   :  { %145 = vrsqrt.f32 %v68_v40 }
  0xf9   :  { %v61_v41 = vpop.xlane.xlu1 %60  ;;  %v55_v42 = vpop.xlane.xlu2 %54 }
  0xfa   :  { %v65_v43 = vmul.f32 %v61_v41, %v37_v14  ;;  %v63_v44 = vmul.f32 %v55_v42, %v37_v14 }
  0xfc   :  { %v144_v45 = vpop.eup %143  ;;  %v69_v46 = vadd.f32 1e-05, %v65_v43  ;;  %v67_v47 = vadd.f32 1e-05, %v63_v44 }
  0xfd   :  { %v146_v48 = vpop.eup %145  ;;  %v71_v49 = vmul.f32 %v144_v45, %v66_v39  ;;  %vm77_vm2 = vweird.f32 %v144_v45 }
  0xfe   :  { %v91_v50 = vmul.f32 %v146_v48, %v68_v40  ;;  %147 = vrsqrt.f32 %v69_v46  ;;  %vm97_vm3 = vweird.f32 %v146_v48  ;;  %vm78_vm5 = vmor %vm76_vm4, %vm77_vm2  ;;  %vm106_vm10 = vweird.f32 %v69_v46 }
  0xff   :  { %v72_v51 = vmul.f32 %v144_v45, %v71_v49  ;;  %149 = vrsqrt.f32 %v67_v47  ;;  %vm98_vm7 = vmor %vm96_vm6, %vm97_vm3  ;;  %vm86_vm12 = vweird.f32 %v67_v47 }
 0x100   :  { %v92_v52 = vmul.f32 %v146_v48, %v91_v50 }
 0x101   :  { %v73_v53 = vmul.f32 0.5, %v72_v51 }
 0x102   :  { %v93_v54 = vmul.f32 0.5, %v92_v52 }
 0x103   :  { %v74_v55 = vsub.f32 1.5, %v73_v53 }
 0x104   :  { %v148_v56 = vpop.eup %147  ;;  %v94_v57 = vsub.f32 1.5, %v93_v54 }
 0x105   :  { %v150_v58 = vpop.eup %149  ;;  %v75_v59 = vmul.f32 %v144_v45, %v74_v55  ;;  %v101_v60 = vmul.f32 %v148_v56, %v69_v46  ;;  %vm107_vm8 = vweird.f32 %v148_v56 }
 0x106   :  { %v95_v62 = vmul.f32 %v146_v48, %v94_v57  ;;  %v81_v63 = vmul.f32 %v150_v58, %v67_v47  ;;  %vm87_vm9 = vweird.f32 %v150_v58  ;;  %vm108_vm11 = vmor %vm106_vm10, %vm107_vm8 }
 0x107   :  { %v79_v0 = vsel %vm78_vm5, %v144_v45, %v75_v59  ;;  %v102_v1 = vmul.f32 %v148_v56, %v101_v60  ;;  %vm88_vm13 = vmor %vm86_vm12, %vm87_vm9 }
 0x108   :  { %v110_v3 = vmul.f32 %v79_v0, %v42_v20  ;;  %v99_v4 = vsel %vm98_vm7, %v146_v48, %v95_v62  ;;  %v82_v5 = vmul.f32 %v150_v58, %v81_v63 }
 0x109   :  { %v112_v6 = vmul.f32 %v99_v4, %v188_v19  ;;  %v103_v7 = vmul.f32 0.5, %v102_v1 }
 0x10a   :  { %v118_v8 = vmul.f32 %v139_v61, %v110_v3  ;;  %v83_v9 = vmul.f32 0.5, %v82_v5 }
 0x10b   :  { %v120_v10 = vmul.f32 %v139_v61, %v112_v6  ;;  %v104_v11 = vsub.f32 1.5, %v103_v7 }
 0x10c   :  { %v126_v12 = vadd.f32 %v140_v2, %v118_v8  ;;  %v84_v13 = vsub.f32 1.5, %v83_v9 }
 0x10d   :  { %v128_v14 = vadd.f32 %v140_v2, %v120_v10  ;;  %v105_v15 = vmul.f32 %v148_v56, %v104_v11 }
 0x10e   :  { %130 = vst.msk [vmem:[%s232_s3] sm:$0xff] %vm18_vm0, %v126_v12  ;;  %v85_v16 = vmul.f32 %v150_v58, %v84_v13 }
 0x10f   :  { %132 = vst.msk [vmem:[%s232_s3 + $0x10] sm:$0xff] %vm18_vm0, %v128_v14  ;;  %v109_v17 = vsel %vm108_vm11, %v148_v56, %v105_v15 }
 0x110   :  { %v113_v18 = vmul.f32 %v109_v17, %v194_v29  ;;  %v89_v19 = vsel %vm88_vm13, %v150_v58, %v85_v16 }
 0x111   :  { %v111_v20 = vmul.f32 %v89_v19, %v196_v30 }
 0x112   :  { %v121_v21 = vmul.f32 %v139_v61, %v113_v18 }
 0x113   :  { %v119_v22 = vmul.f32 %v139_v61, %v111_v20 }
 0x114   :  { %v129_v23 = vadd.f32 %v140_v2, %v121_v21 }
 0x115   :  { %v127_v24 = vadd.f32 %v140_v2, %v119_v22 }
 0x116   :  { %133 = vst.msk [vmem:[%s232_s3 + $0x18] sm:$0xff] %vm18_vm0, %v129_v23 }
 0x117   :  { %131 = vst.msk [vmem:[%s232_s3 + $0x8] sm:$0xff] %vm18_vm0, %v127_v24 }

</bundles_post_ra>
